<compile_context>
chip_gen: v5e
topology: v5e:2x2
jax: 0.10.0
libtpu: 0.0.40
codegen_flags: <defaults>
</compile_context>

<pallas_src>
import functools

import jax
import jax.numpy as jnp
from jax import lax
from jax.experimental import pallas as pl
from jax.experimental.pallas import tpu as pltpu

_TM = 256  # row tile for the large conv matmul (>=2 'parallel' blocks -> both v7x TensorCores)


# ----------------------------------------------------------------------------
# Pallas kernels
# ----------------------------------------------------------------------------
def _conv_mm_kernel(x_ref, w_ref, b_ref, o_ref, *, relu):
    # bf16 x bf16 -> f32 accumulation on the MXU; bias/ReLU fused; store in out dtype (bf16).
    y = jnp.dot(x_ref[...], w_ref[...], preferred_element_type=jnp.float32) + b_ref[...]
    if relu:
        y = jnp.maximum(y, 0.0)
    o_ref[...] = y.astype(o_ref.dtype)


def _conv_bn_relu_kernel(x_ref, w_ref, g_ref, beta_ref, o_ref, *, eps, inv_m):
    # Conv matmul + training-mode BatchNorm (batch statistics) + ReLU in one VMEM block.
    # TODO(synk): if the PyTorch reference runs in eval() mode, running stats would be needed.
    y = jnp.dot(x_ref[...], w_ref[...], preferred_element_type=jnp.float32)   # (M, C) f32
    mean = jnp.sum(y, axis=0, keepdims=True) * inv_m
    var = jnp.sum(y * y, axis=0, keepdims=True) * inv_m - mean * mean
    var = jnp.maximum(var, 0.0)                       # clamp: one-pass var can go slightly < 0
    scale = g_ref[...] * lax.rsqrt(var + eps)
    shift = beta_ref[...] - mean * scale
    o_ref[...] = jnp.maximum(y * scale + shift, 0.0).astype(o_ref.dtype)


def _seq_model_kernel(x_ref,
                      wx1_ref, bx1_ref, wh1_ref, wl1_ref, bl1_ref,
                      wx2_ref, bx2_ref, wh2_ref, wl2_ref, bl2_ref,
                      wp_ref, bp_ref,
                      out_ref,
                      gx_ref, hf_ref, hb_ref,
                      *, T, B, H):
    """Fused SequenceModeling (BiLSTM x2) + Prediction head.

    x_ref   : (T*B, D0) f32, time-major flattened sequence.
    wx*     : (D, 8H) bf16   concat of fwd/bwd input projections W_ih^T.
    bx*     : (1, 8H) f32    concat of fwd/bwd (b_ih + b_hh).
    wh*     : (2H, 8H) bf16  block-diagonal [W_hh_f^T, W_hh_b^T] -> both directions in one push.
    wl*     : (2H, H) bf16   per-layer Linear(2H -> H) weight (transposed).
    wp/bp   : (H, num_class) bf16 / (1, num_class) f32  Prediction Linear.
    out_ref : (T*B, num_class) f32.
    Scratch : gx_ref (T*B, 8H) f32, hf_ref/hb_ref (T*B, H) f32.
    """
    H4 = 4 * H

    def cell(g, c):
        # PyTorch gate order: i, f, g, o.
        i = jax.nn.sigmoid(g[:, 0 * H:1 * H])
        f = jax.nn.sigmoid(g[:, 1 * H:2 * H])
        gg = jnp.tanh(g[:, 2 * H:3 * H])
        o = jax.nn.sigmoid(g[:, 3 * H:4 * H])
        c_new = f * c + i * gg
        return o * jnp.tanh(c_new), c_new

    def run_layer(x_bf16, wx_ref, bx_ref, wh_ref, wl_ref, bl_ref):
        # Hoisted time-independent input projection for BOTH directions: one matmul.
        gx_ref[...] = (jnp.dot(x_bf16, wx_ref[...], preferred_element_type=jnp.float32)
                       + bx_ref[...])

        def step(t, carry):
            hf, cf, hb, cb = carry
            tb = T - 1 - t
            gx_t = gx_ref[pl.ds(t * B, B), :]          # (B, 8H): fwd gates in lanes [:4H]
            gx_tb = gx_ref[pl.ds(tb * B, B), :]        # (B, 8H): bwd gates in lanes [4H:]
            hcat = jnp.concatenate([hf, hb], axis=1).astype(jnp.bfloat16)      # (B, 2H)
            gh = jnp.dot(hcat, wh_ref[...], preferred_element_type=jnp.float32)  # (B, 8H)
            gf = gx_t[:, :H4] + gh[:, :H4]
            gb = gx_tb[:, H4:] + gh[:, H4:]
            hf, cf = cell(gf, cf)
            hb, cb = cell(gb, cb)
            hf_ref[pl.ds(t * B, B), :] = hf
            hb_ref[pl.ds(tb * B, B), :] = hb
            return hf, cf, hb, cb

        zeros = jnp.zeros((B, H), jnp.float32)
        carry = (zeros, zeros, zeros, zeros)
        if T <= 8:
            # Fully unroll the tiny recurrence for scheduler visibility (static indexing).
            for t in range(T):
                carry = step(t, carry)
        else:
            lax.fori_loop(0, T, step, carry)

        # Batched output Linear(2H -> H) over the whole sequence: one lane-dense matmul.
        hs = jnp.concatenate([hf_ref[...], hb_ref[...]], axis=1).astype(jnp.bfloat16)  # (T*B, 2H)
        return jnp.dot(hs, wl_ref[...], preferred_element_type=jnp.float32) + bl_ref[...]

    y1 = run_layer(x_ref[...].astype(jnp.bfloat16),
                   wx1_ref, bx1_ref, wh1_ref, wl1_ref, bl1_ref)
    y2 = run_layer(y1.astype(jnp.bfloat16),
                   wx2_ref, bx2_ref, wh2_ref, wl2_ref, bl2_ref)
    out_ref[...] = (jnp.dot(y2.astype(jnp.bfloat16), wp_ref[...],
                            preferred_element_type=jnp.float32) + bp_ref[...])


# ----------------------------------------------------------------------------
# Pallas wrappers
# ----------------------------------------------------------------------------
def conv_matmul(x, w, b, *, relu):
    """x: (M, K) bf16, w: (K, N) bf16, b: (1, N) f32  ->  (M, N) bf16."""
    M, K = x.shape
    N = w.shape[1]
    kern = functools.partial(_conv_mm_kernel, relu=relu)
    if M >= 2 * _TM and M % _TM == 0:
        # Big activation (conv1): tile rows into >=2 'parallel' blocks (v7x dual TensorCores).
        return pl.pallas_call(
            kern,
            out_shape=jax.ShapeDtypeStruct((M, N), jnp.bfloat16),
            grid=(M // _TM,),
            in_specs=[
                pl.BlockSpec((_TM, K), lambda i: (i, 0)),
                pl.BlockSpec((K, N), lambda i: (0, 0)),
                pl.BlockSpec((1, N), lambda i: (0, 0)),
            ],
            out_specs=pl.BlockSpec((_TM, N), lambda i: (i, 0)),
            compiler_params=pltpu.CompilerParams(dimension_semantics=("parallel",)),
        )(x, w, b)
    # Small activations: one VMEM-resident block, no grid.
    return pl.pallas_call(
        kern, out_shape=jax.ShapeDtypeStruct((M, N), jnp.bfloat16),
    )(x, w, b)


def conv_matmul_bn_relu(x, w, gamma, beta, *, eps=1e-5):
    """relu(batchnorm(x @ w)) with training-mode batch stats; whole matrix in one VMEM block."""
    M, _ = x.shape
    N = w.shape[1]
    return pl.pallas_call(
        functools.partial(_conv_bn_relu_kernel, eps=eps, inv_m=1.0 / M),
        out_shape=jax.ShapeDtypeStruct((M, N), jnp.bfloat16),
    )(x, w, gamma, beta)


def sequence_model(visual_btd, p):
    """Both BiLSTM layers + Prediction Linear in one pallas_call.
    visual_btd: (B, T, D) f32  ->  (B, T, num_class) f32."""
    B, T, D = visual_btd.shape
    H = p["lstm1_wh"].shape[0] // 2
    ncls = p["pred_w"].shape[1]
    x_flat = visual_btd.transpose(1, 0, 2).reshape(T * B, D)        # time-major flatten
    out = pl.pallas_call(
        functools.partial(_seq_model_kernel, T=T, B=B, H=H),
        out_shape=jax.ShapeDtypeStruct((T * B, ncls), jnp.float32),
        scratch_shapes=[
            pltpu.VMEM((T * B, 8 * H), jnp.float32),   # hoisted input-projection gates
            pltpu.VMEM((T * B, H), jnp.float32),       # forward hidden states
            pltpu.VMEM((T * B, H), jnp.float32),       # backward hidden states
        ],
    )(x_flat,
      p["lstm1_wx"], p["lstm1_bx"], p["lstm1_wh"], p["lstm1_wl"], p["lstm1_bl"],
      p["lstm2_wx"], p["lstm2_bx"], p["lstm2_wh"], p["lstm2_wl"], p["lstm2_bl"],
      p["pred_w"], p["pred_b"])
    return out.reshape(T, B, ncls).transpose(1, 0, 2)


# ----------------------------------------------------------------------------
# Conv / pooling building blocks (XLA glue + Pallas matmuls)
# ----------------------------------------------------------------------------
def _im2col(x, kh, kw, pad):
    """x: (N, H, W, C) bf16 -> (N*Ho*Wo, kh*kw*C) bf16. Stride 1.
    TODO(synk): for large OCR-sized images, move this tap gather into the conv kernel
    (grid over the kh*kw taps) to avoid the HBM patch blow-up."""
    n, h, w, c = x.shape
    if pad > 0:
        x = jnp.pad(x, ((0, 0), (pad, pad), (pad, pad), (0, 0)))
    ho = h + 2 * pad - kh + 1
    wo = w + 2 * pad - kw + 1
    patches = [x[:, dy:dy + ho, dx:dx + wo, :] for dy in range(kh) for dx in range(kw)]
    patches = jnp.concatenate(patches, axis=-1)                      # (N, Ho, Wo, kh*kw*C)
    return patches.reshape(n * ho * wo, kh * kw * c), (n, ho, wo)


def conv_layer(x, w_mat, b, kh, kw, pad):
    """Conv + bias + ReLU via im2col + Pallas matmul. w_mat is the prepared (K, Cout) bf16."""
    xm, (n, ho, wo) = _im2col(x, kh, kw, pad)
    y = conv_matmul(xm, w_mat, b, relu=True)
    return y.reshape(n, ho, wo, w_mat.shape[1])


def conv_bn_layer(x, w_mat, gamma, beta, kh, kw, pad):
    """Conv (no bias) + BatchNorm2d (batch stats) + ReLU, fused."""
    xm, (n, ho, wo) = _im2col(x, kh, kw, pad)
    y = conv_matmul_bn_relu(xm, w_mat, gamma, beta)
    return y.reshape(n, ho, wo, w_mat.shape[1])


def maxpool2d(x, kh, kw):
    """Non-overlapping max pool (kernel == stride), matches nn.MaxPool2d((kh,kw),(kh,kw))."""
    # TODO(synk): could be fused into the preceding conv kernel's epilogue on the VMEM block.
    n, h, w, c = x.shape
    return x.reshape(n, h // kh, kh, w // kw, kw, c).max(axis=(2, 4))


def vgg_feature_extractor(x, p):
    x = conv_layer(x, p["c1_w"], p["c1_b"], 3, 3, 1)
    x = maxpool2d(x, 2, 2)
    x = conv_layer(x, p["c2_w"], p["c2_b"], 3, 3, 1)
    x = maxpool2d(x, 2, 2)
    x = conv_layer(x, p["c3_w"], p["c3_b"], 3, 3, 1)
    x = conv_layer(x, p["c4_w"], p["c4_b"], 3, 3, 1)
    x = maxpool2d(x, 2, 1)
    x = conv_bn_layer(x, p["c5_w"], p["bn5_g"], p["bn5_b"], 3, 3, 1)
    x = conv_bn_layer(x, p["c6_w"], p["bn6_g"], p["bn6_b"], 3, 3, 1)
    x = maxpool2d(x, 2, 1)
    x = conv_layer(x, p["c7_w"], p["c7_b"], 2, 2, 0)
    return x


def model_forward(prepared, image_nhwc, text):
    """Equivalent of Model.forward(input, text). `text` is unused by this forward."""
    del text
    x = image_nhwc.astype(jnp.bfloat16)                  # bf16 activations end-to-end
    feat = vgg_feature_extractor(x, prepared["vgg"])     # (N, Hf, Wf, C) bf16
    # AdaptiveAvgPool2d((None, 1)) after permute(0,3,1,2) + squeeze(3) == mean over H, T = W.
    visual = jnp.mean(feat.astype(jnp.float32), axis=1)  # (N, T, C) f32
    return sequence_model(visual, prepared["seq"])       # (N, T, num_class) f32
    # NOTE: bf16 MXU operands give ~1e-2 relative tolerance vs an f32 PyTorch reference.


# ----------------------------------------------------------------------------
# Parameters: raw (PyTorch-layout) construction + one-time kernel-layout preparation
# ----------------------------------------------------------------------------
def _init(key, shape, fan_in):
    return jax.random.normal(key, shape, jnp.float32) / jnp.sqrt(float(fan_in))


def make_params(key, input_channel, output_channel, hidden_size, num_class):
    oc = [output_channel // 8, output_channel // 4, output_channel // 2, output_channel]
    keys = iter(jax.random.split(key, 64))

    def conv_p(k, cin, cout, ksz, bias=True):
        w = _init(k, (ksz, ksz, cin, cout), ksz * ksz * cin)      # HWIO
        b = jnp.zeros((cout,), jnp.float32) if bias else None
        return w, b

    vgg = {}
    vgg["c1_w"], vgg["c1_b"] = conv_p(next(keys), input_channel, oc[0], 3)
    vgg["c2_w"], vgg["c2_b"] = conv_p(next(keys), oc[0], oc[1], 3)
    vgg["c3_w"], vgg["c3_b"] = conv_p(next(keys), oc[1], oc[2], 3)
    vgg["c4_w"], vgg["c4_b"] = conv_p(next(keys), oc[2], oc[2], 3)
    vgg["c5_w"], _ = conv_p(next(keys), oc[2], oc[3], 3, bias=False)
    vgg["bn5_g"] = jnp.ones((oc[3],), jnp.float32)
    vgg["bn5_b"] = jnp.zeros((oc[3],), jnp.float32)
    vgg["c6_w"], _ = conv_p(next(keys), oc[3], oc[3], 3, bias=False)
    vgg["bn6_g"] = jnp.ones((oc[3],), jnp.float32)
    vgg["bn6_b"] = jnp.zeros((oc[3],), jnp.float32)
    vgg["c7_w"], vgg["c7_b"] = conv_p(next(keys), oc[3], oc[3], 2)

    def bilstm_p(input_size, hidden, out_size):
        H4 = 4 * hidden
        p = {}
        for suf in ("f", "b"):
            p[f"w_ih_{suf}"] = _init(next(keys), (H4, input_size), input_size)
            p[f"w_hh_{suf}"] = _init(next(keys), (H4, hidden), hidden)
            p[f"b_ih_{suf}"] = jnp.zeros((H4,), jnp.float32)
            p[f"b_hh_{suf}"] = jnp.zeros((H4,), jnp.float32)
        p["w_lin"] = _init(next(keys), (out_size, 2 * hidden), 2 * hidden)
        p["b_lin"] = jnp.zeros((out_size,), jnp.float32)
        return p

    return {
        "vgg": vgg,
        "lstm1": bilstm_p(output_channel, hidden_size, hidden_size),
        "lstm2": bilstm_p(hidden_size, hidden_size, hidden_size),
        "pred_w": _init(next(keys), (num_class, hidden_size), hidden_size),
        "pred_b": jnp.zeros((num_class,), jnp.float32),
    }


def prepare_params(raw):
    """One-time conversion into kernel-ready layouts (transposes / bf16 casts / bias folding /
    block-diagonal recurrent weights) — kept OUT of the jitted forward."""
    v = raw["vgg"]

    def conv_w(w):                                     # (kh,kw,cin,cout) -> (kh*kw*cin, cout) bf16
        kh, kw, cin, cout = w.shape
        return w.reshape(kh * kw * cin, cout).astype(jnp.bfloat16)

    def row(b):
        return b.reshape(1, -1).astype(jnp.float32)

    vgg = {
        "c1_w": conv_w(v["c1_w"]), "c1_b": row(v["c1_b"]),
        "c2_w": conv_w(v["c2_w"]), "c2_b": row(v["c2_b"]),
        "c3_w": conv_w(v["c3_w"]), "c3_b": row(v["c3_b"]),
        "c4_w": conv_w(v["c4_w"]), "c4_b": row(v["c4_b"]),
        "c5_w": conv_w(v["c5_w"]), "bn5_g": row(v["bn5_g"]), "bn5_b": row(v["bn5_b"]),
        "c6_w": conv_w(v["c6_w"]), "bn6_g": row(v["bn6_g"]), "bn6_b": row(v["bn6_b"]),
        "c7_w": conv_w(v["c7_w"]), "c7_b": row(v["c7_b"]),
    }

    def lstm(p):
        H = p["w_hh_f"].shape[1]
        wx = jnp.concatenate([p["w_ih_f"].T, p["w_ih_b"].T], axis=1).astype(jnp.bfloat16)  # (D,8H)
        bx = jnp.concatenate([p["b_ih_f"] + p["b_hh_f"],
                              p["b_ih_b"] + p["b_hh_b"]]).reshape(1, -1).astype(jnp.float32)
        z = jnp.zeros((H, 4 * H), jnp.float32)
        wh = jnp.concatenate([jnp.concatenate([p["w_hh_f"].T, z], axis=1),
                              jnp.concatenate([z, p["w_hh_b"].T], axis=1)],
                             axis=0).astype(jnp.bfloat16)                                  # (2H,8H)
        wl = p["w_lin"].T.astype(jnp.bfloat16)                                             # (2H,out)
        bl = p["b_lin"].reshape(1, -1).astype(jnp.float32)
        return wx, bx, wh, wl, bl

    seq = {}
    for name, p in (("lstm1", raw["lstm1"]), ("lstm2", raw["lstm2"])):
        wx, bx, wh, wl, bl = lstm(p)
        seq[f"{name}_wx"], seq[f"{name}_bx"], seq[f"{name}_wh"] = wx, bx, wh
        seq[f"{name}_wl"], seq[f"{name}_bl"] = wl, bl
    seq["pred_w"] = raw["pred_w"].T.astype(jnp.bfloat16)          # (H, num_class)
    seq["pred_b"] = raw["pred_b"].reshape(1, -1).astype(jnp.float32)

    return {"vgg": vgg, "seq": seq}


# ----------------------------------------------------------------------------
if __name__ == "__main__":
    input_channel = 1
    output_channel = 64
    hidden_size = 32
    num_class = 10
    batch, img_h, img_w = 2, 32, 16   # NCHW (2,1,32,16) -> NHWC (2,32,16,1)

    key = jax.random.PRNGKey(0)
    k_param, k_img = jax.random.split(key)
    raw_params = make_params(k_param, input_channel, output_channel, hidden_size, num_class)
    params = prepare_params(raw_params)   # one-time weight layout prep, outside the jitted forward

    image = jax.random.normal(k_img, (batch, img_h, img_w, input_channel), jnp.float32)
    text = jnp.zeros((batch, 8), jnp.int32)   # unused by forward, kept for signature parity

    fwd = jax.jit(model_forward)
    out = jax.block_until_ready(fwd(params, image, text))

    expected_T = (img_w // 4) - 1   # W/2/2, then final 2x2 valid conv
    assert out.shape == (batch, expected_T, num_class), out.shape
    assert bool(jnp.all(jnp.isfinite(out)))
    print("KERNEL_OK")
</pallas_src>

<mosaic_0001>
module attributes {stable_mosaic.version = 11 : i64} {
  func.func @_conv_mm_kernel(%arg0: i32, %arg1: memref<256x9xbf16, #tpu.memory_space<vmem>>, %arg2: memref<9x8xbf16, #tpu.memory_space<vmem>>, %arg3: memref<1x8xf32, #tpu.memory_space<vmem>>, %arg4: memref<256x8xbf16, #tpu.memory_space<vmem>>) attributes {dimension_semantics = [#tpu.dimension_semantics<parallel>], iteration_bounds = array<i64: 4>, scalar_prefetch = 0 : i64, scratch_operands = 0 : i64, tpu.core_type = #tpu.core_type<tc>, window_params = [{transform_indices = @transform_0, window_bounds = array<i64: 256, 9>}, {pipeline_mode = #tpu.pipeline_mode<synchronous>, transform_indices = @transform_1, window_bounds = array<i64: 9, 8>}, {pipeline_mode = #tpu.pipeline_mode<synchronous>, transform_indices = @transform_2, window_bounds = array<i64: 1, 8>}, {transform_indices = @transform_3, window_bounds = array<i64: 256, 8>}]} {
    %c0 = arith.constant 0 : index
    %c0_0 = arith.constant 0 : index
    %0 = vector.load %arg1[%c0, %c0_0] : memref<256x9xbf16, #tpu.memory_space<vmem>>, vector<256x9xbf16>
    %c0_1 = arith.constant 0 : index
    %c0_2 = arith.constant 0 : index
    %1 = vector.load %arg2[%c0_1, %c0_2] : memref<9x8xbf16, #tpu.memory_space<vmem>>, vector<9x8xbf16>
    %cst = arith.constant dense<0.000000e+00> : vector<256x8xf32>
    %2 = tpu.matmul %0, %1, %cst {dimension_numbers = #tpu.dot_dimension_numbers<[1], [0], [0], [1], [0, 0, 1, 1], [], []>} : vector<256x9xbf16>, vector<9x8xbf16>, vector<256x8xf32> -> vector<256x8xf32>
    %c0_3 = arith.constant 0 : index
    %c0_4 = arith.constant 0 : index
    %3 = vector.load %arg3[%c0_3, %c0_4] : memref<1x8xf32, #tpu.memory_space<vmem>>, vector<1x8xf32>
    %4 = vector.broadcast %3 : vector<1x8xf32> to vector<256x8xf32>
    %5 = arith.addf %2, %4 : vector<256x8xf32>
    %cst_5 = arith.constant 0.000000e+00 : f32
    %6 = vector.broadcast %cst_5 : f32 to vector<256x8xf32>
    %7 = arith.maximumf %5, %6 : vector<256x8xf32>
    %8 = arith.truncf %7 : vector<256x8xf32> to vector<256x8xbf16>
    %c0_6 = arith.constant 0 : index
    %c0_7 = arith.constant 0 : index
    %9 = vector.load %arg4[%c0_6, %c0_7] : memref<256x8xbf16, #tpu.memory_space<vmem>>, vector<256x8xbf16>
    tpu.vector_store %arg4[%c0_6, %c0_7], %8 {strides = array<i32>} : memref<256x8xbf16, #tpu.memory_space<vmem>>, vector<256x8xbf16>,
    return
  }
  func.func @transform_0(%arg0: i32) -> (i32, i32) {
    %c0_i32 = arith.constant 0 : i32
    %c0_i32_0 = arith.constant 0 : i32
    return %arg0, %c0_i32 : i32, i32
  }
  func.func @transform_1(%arg0: i32) -> (i32, i32) {
    %c0_i32 = arith.constant 0 : i32
    %c0_i32_0 = arith.constant 0 : i32
    %c0_i32_1 = arith.constant 0 : i32
    return %c0_i32, %c0_i32_0 : i32, i32
  }
  func.func @transform_2(%arg0: i32) -> (i32, i32) {
    %c0_i32 = arith.constant 0 : i32
    %c0_i32_0 = arith.constant 0 : i32
    %c0_i32_1 = arith.constant 0 : i32
    return %c0_i32, %c0_i32_0 : i32, i32
  }
  func.func @transform_3(%arg0: i32) -> (i32, i32) {
    %c0_i32 = arith.constant 0 : i32
    %c0_i32_0 = arith.constant 0 : i32
    return %arg0, %c0_i32 : i32, i32
  }
}

module attributes {stable_mosaic.version = 11 : i64} {
  func.func @_conv_mm_kernel(%arg0: memref<256x72xbf16, #tpu.memory_space<vmem>>, %arg1: memref<72x16xbf16, #tpu.memory_space<vmem>>, %arg2: memref<1x16xf32, #tpu.memory_space<vmem>>, %arg3: memref<256x16xbf16, #tpu.memory_space<vmem>>) attributes {dimension_semantics = [], scalar_prefetch = 0 : i64, scratch_operands = 0 : i64, tpu.core_type = #tpu.core_type<tc>} {
    %c0 = arith.constant 0 : index
    %c0_0 = arith.constant 0 : index
    %0 = vector.load %arg0[%c0, %c0_0] : memref<256x72xbf16, #tpu.memory_space<vmem>>, vector<256x72xbf16>
    %c0_1 = arith.constant 0 : index
    %c0_2 = arith.constant 0 : index
    %1 = vector.load %arg1[%c0_1, %c0_2] : memref<72x16xbf16, #tpu.memory_space<vmem>>, vector<72x16xbf16>
    %cst = arith.constant dense<0.000000e+00> : vector<256x16xf32>
    %2 = tpu.matmul %0, %1, %cst {dimension_numbers = #tpu.dot_dimension_numbers<[1], [0], [0], [1], [0, 0, 1, 1], [], []>} : vector<256x72xbf16>, vector<72x16xbf16>, vector<256x16xf32> -> vector<256x16xf32>
    %c0_3 = arith.constant 0 : index
    %c0_4 = arith.constant 0 : index
    %3 = vector.load %arg2[%c0_3, %c0_4] : memref<1x16xf32, #tpu.memory_space<vmem>>, vector<1x16xf32>
    %4 = vector.broadcast %3 : vector<1x16xf32> to vector<256x16xf32>
    %5 = arith.addf %2, %4 : vector<256x16xf32>
    %cst_5 = arith.constant 0.000000e+00 : f32
    %6 = vector.broadcast %cst_5 : f32 to vector<256x16xf32>
    %7 = arith.maximumf %5, %6 : vector<256x16xf32>
    %8 = arith.truncf %7 : vector<256x16xf32> to vector<256x16xbf16>
    %c0_6 = arith.constant 0 : index
    %c0_7 = arith.constant 0 : index
    %9 = vector.load %arg3[%c0_6, %c0_7] : memref<256x16xbf16, #tpu.memory_space<vmem>>, vector<256x16xbf16>
    tpu.vector_store %arg3[%c0_6, %c0_7], %8 {strides = array<i32>} : memref<256x16xbf16, #tpu.memory_space<vmem>>, vector<256x16xbf16>,
    return
  }
}

module attributes {stable_mosaic.version = 11 : i64} {
  func.func @_conv_mm_kernel(%arg0: memref<64x144xbf16, #tpu.memory_space<vmem>>, %arg1: memref<144x32xbf16, #tpu.memory_space<vmem>>, %arg2: memref<1x32xf32, #tpu.memory_space<vmem>>, %arg3: memref<64x32xbf16, #tpu.memory_space<vmem>>) attributes {dimension_semantics = [], scalar_prefetch = 0 : i64, scratch_operands = 0 : i64, tpu.core_type = #tpu.core_type<tc>} {
    %c0 = arith.constant 0 : index
    %c0_0 = arith.constant 0 : index
    %0 = vector.load %arg0[%c0, %c0_0] : memref<64x144xbf16, #tpu.memory_space<vmem>>, vector<64x144xbf16>
    %c0_1 = arith.constant 0 : index
    %c0_2 = arith.constant 0 : index
    %1 = vector.load %arg1[%c0_1, %c0_2] : memref<144x32xbf16, #tpu.memory_space<vmem>>, vector<144x32xbf16>
    %cst = arith.constant dense<0.000000e+00> : vector<64x32xf32>
    %2 = tpu.matmul %0, %1, %cst {dimension_numbers = #tpu.dot_dimension_numbers<[1], [0], [0], [1], [0, 0, 1, 1], [], []>} : vector<64x144xbf16>, vector<144x32xbf16>, vector<64x32xf32> -> vector<64x32xf32>
    %c0_3 = arith.constant 0 : index
    %c0_4 = arith.constant 0 : index
    %3 = vector.load %arg2[%c0_3, %c0_4] : memref<1x32xf32, #tpu.memory_space<vmem>>, vector<1x32xf32>
    %4 = vector.broadcast %3 : vector<1x32xf32> to vector<64x32xf32>
    %5 = arith.addf %2, %4 : vector<64x32xf32>
    %cst_5 = arith.constant 0.000000e+00 : f32
    %6 = vector.broadcast %cst_5 : f32 to vector<64x32xf32>
    %7 = arith.maximumf %5, %6 : vector<64x32xf32>
    %8 = arith.truncf %7 : vector<64x32xf32> to vector<64x32xbf16>
    %c0_6 = arith.constant 0 : index
    %c0_7 = arith.constant 0 : index
    %9 = vector.load %arg3[%c0_6, %c0_7] : memref<64x32xbf16, #tpu.memory_space<vmem>>, vector<64x32xbf16>
    tpu.vector_store %arg3[%c0_6, %c0_7], %8 {strides = array<i32>} : memref<64x32xbf16, #tpu.memory_space<vmem>>, vector<64x32xbf16>,
    return
  }
}

module attributes {stable_mosaic.version = 11 : i64} {
  func.func @_conv_mm_kernel(%arg0: memref<64x288xbf16, #tpu.memory_space<vmem>>, %arg1: memref<288x32xbf16, #tpu.memory_space<vmem>>, %arg2: memref<1x32xf32, #tpu.memory_space<vmem>>, %arg3: memref<64x32xbf16, #tpu.memory_space<vmem>>) attributes {dimension_semantics = [], scalar_prefetch = 0 : i64, scratch_operands = 0 : i64, tpu.core_type = #tpu.core_type<tc>} {
    %c0 = arith.constant 0 : index
    %c0_0 = arith.constant 0 : index
    %0 = vector.load %arg0[%c0, %c0_0] : memref<64x288xbf16, #tpu.memory_space<vmem>>, vector<64x288xbf16>
    %c0_1 = arith.constant 0 : index
    %c0_2 = arith.constant 0 : index
    %1 = vector.load %arg1[%c0_1, %c0_2] : memref<288x32xbf16, #tpu.memory_space<vmem>>, vector<288x32xbf16>
    %cst = arith.constant dense<0.000000e+00> : vector<64x32xf32>
    %2 = tpu.matmul %0, %1, %cst {dimension_numbers = #tpu.dot_dimension_numbers<[1], [0], [0], [1], [0, 0, 1, 1], [], []>} : vector<64x288xbf16>, vector<288x32xbf16>, vector<64x32xf32> -> vector<64x32xf32>
    %c0_3 = arith.constant 0 : index
    %c0_4 = arith.constant 0 : index
    %3 = vector.load %arg2[%c0_3, %c0_4] : memref<1x32xf32, #tpu.memory_space<vmem>>, vector<1x32xf32>
    %4 = vector.broadcast %3 : vector<1x32xf32> to vector<64x32xf32>
    %5 = arith.addf %2, %4 : vector<64x32xf32>
    %cst_5 = arith.constant 0.000000e+00 : f32
    %6 = vector.broadcast %cst_5 : f32 to vector<64x32xf32>
    %7 = arith.maximumf %5, %6 : vector<64x32xf32>
    %8 = arith.truncf %7 : vector<64x32xf32> to vector<64x32xbf16>
    %c0_6 = arith.constant 0 : index
    %c0_7 = arith.constant 0 : index
    %9 = vector.load %arg3[%c0_6, %c0_7] : memref<64x32xbf16, #tpu.memory_space<vmem>>, vector<64x32xbf16>
    tpu.vector_store %arg3[%c0_6, %c0_7], %8 {strides = array<i32>} : memref<64x32xbf16, #tpu.memory_space<vmem>>, vector<64x32xbf16>,
    return
  }
}

module attributes {stable_mosaic.version = 11 : i64} {
  func.func @_conv_bn_relu_kernel(%arg0: memref<32x288xbf16, #tpu.memory_space<vmem>>, %arg1: memref<288x64xbf16, #tpu.memory_space<vmem>>, %arg2: memref<1x64xf32, #tpu.memory_space<vmem>>, %arg3: memref<1x64xf32, #tpu.memory_space<vmem>>, %arg4: memref<32x64xbf16, #tpu.memory_space<vmem>>) attributes {dimension_semantics = [], scalar_prefetch = 0 : i64, scratch_operands = 0 : i64, tpu.core_type = #tpu.core_type<tc>} {
    %c0 = arith.constant 0 : index
    %c0_0 = arith.constant 0 : index
    %0 = vector.load %arg0[%c0, %c0_0] : memref<32x288xbf16, #tpu.memory_space<vmem>>, vector<32x288xbf16>
    %c0_1 = arith.constant 0 : index
    %c0_2 = arith.constant 0 : index
    %1 = vector.load %arg1[%c0_1, %c0_2] : memref<288x64xbf16, #tpu.memory_space<vmem>>, vector<288x64xbf16>
    %cst = arith.constant dense<0.000000e+00> : vector<32x64xf32>
    %2 = tpu.matmul %0, %1, %cst {dimension_numbers = #tpu.dot_dimension_numbers<[1], [0], [0], [1], [0, 0, 1, 1], [], []>} : vector<32x288xbf16>, vector<288x64xbf16>, vector<32x64xf32> -> vector<32x64xf32>
    %cst_3 = arith.constant dense<0.000000e+00> : vector<64xf32>
    %3 = vector.multi_reduction <add>, %2, %cst_3 [0] : vector<32x64xf32> to vector<64xf32>
    %4 = vector.shape_cast %3 : vector<64xf32> to vector<1x64xf32>
    %cst_4 = arith.constant 3.125000e-02 : f32
    %5 = vector.broadcast %cst_4 : f32 to vector<1x64xf32>
    %6 = arith.mulf %4, %5 : vector<1x64xf32>
    %7 = arith.mulf %2, %2 : vector<32x64xf32>
    %cst_5 = arith.constant dense<0.000000e+00> : vector<64xf32>
    %8 = vector.multi_reduction <add>, %7, %cst_5 [0] : vector<32x64xf32> to vector<64xf32>
    %9 = vector.shape_cast %8 : vector<64xf32> to vector<1x64xf32>
    %cst_6 = arith.constant 3.125000e-02 : f32
    %10 = vector.broadcast %cst_6 : f32 to vector<1x64xf32>
    %11 = arith.mulf %9, %10 : vector<1x64xf32>
    %12 = arith.mulf %6, %6 : vector<1x64xf32>
    %13 = arith.subf %11, %12 : vector<1x64xf32>
    %cst_7 = arith.constant 0.000000e+00 : f32
    %14 = vector.broadcast %cst_7 : f32 to vector<1x64xf32>
    %15 = arith.maximumf %13, %14 : vector<1x64xf32>
    %c0_8 = arith.constant 0 : index
    %c0_9 = arith.constant 0 : index
    %16 = vector.load %arg2[%c0_8, %c0_9] : memref<1x64xf32, #tpu.memory_space<vmem>>, vector<1x64xf32>
    %cst_10 = arith.constant 9.99999974E-6 : f32
    %17 = vector.broadcast %cst_10 : f32 to vector<1x64xf32>
    %18 = arith.addf %15, %17 : vector<1x64xf32>
    %19 = math.rsqrt %18 : vector<1x64xf32>
    %20 = arith.mulf %16, %19 : vector<1x64xf32>
    %c0_11 = arith.constant 0 : index
    %c0_12 = arith.constant 0 : index
    %21 = vector.load %arg3[%c0_11, %c0_12] : memref<1x64xf32, #tpu.memory_space<vmem>>, vector<1x64xf32>
    %22 = arith.mulf %6, %20 : vector<1x64xf32>
    %23 = arith.subf %21, %22 : vector<1x64xf32>
    %24 = vector.broadcast %20 : vector<1x64xf32> to vector<32x64xf32>
    %25 = arith.mulf %2, %24 : vector<32x64xf32>
    %26 = vector.broadcast %23 : vector<1x64xf32> to vector<32x64xf32>
    %27 = arith.addf %25, %26 : vector<32x64xf32>
    %cst_13 = arith.constant 0.000000e+00 : f32
    %28 = vector.broadcast %cst_13 : f32 to vector<32x64xf32>
    %29 = arith.maximumf %27, %28 : vector<32x64xf32>
    %30 = arith.truncf %29 : vector<32x64xf32> to vector<32x64xbf16>
    %c0_14 = arith.constant 0 : index
    %c0_15 = arith.constant 0 : index
    %31 = vector.load %arg4[%c0_14, %c0_15] : memref<32x64xbf16, #tpu.memory_space<vmem>>, vector<32x64xbf16>
    tpu.vector_store %arg4[%c0_14, %c0_15], %30 {strides = array<i32>} : memref<32x64xbf16, #tpu.memory_space<vmem>>, vector<32x64xbf16>,
    return
  }
}

module attributes {stable_mosaic.version = 11 : i64} {
  func.func @_conv_bn_relu_kernel(%arg0: memref<32x576xbf16, #tpu.memory_space<vmem>>, %arg1: memref<576x64xbf16, #tpu.memory_space<vmem>>, %arg2: memref<1x64xf32, #tpu.memory_space<vmem>>, %arg3: memref<1x64xf32, #tpu.memory_space<vmem>>, %arg4: memref<32x64xbf16, #tpu.memory_space<vmem>>) attributes {dimension_semantics = [], scalar_prefetch = 0 : i64, scratch_operands = 0 : i64, tpu.core_type = #tpu.core_type<tc>} {
    %c0 = arith.constant 0 : index
    %c0_0 = arith.constant 0 : index
    %0 = vector.load %arg0[%c0, %c0_0] : memref<32x576xbf16, #tpu.memory_space<vmem>>, vector<32x576xbf16>
    %c0_1 = arith.constant 0 : index
    %c0_2 = arith.constant 0 : index
    %1 = vector.load %arg1[%c0_1, %c0_2] : memref<576x64xbf16, #tpu.memory_space<vmem>>, vector<576x64xbf16>
    %cst = arith.constant dense<0.000000e+00> : vector<32x64xf32>
    %2 = tpu.matmul %0, %1, %cst {dimension_numbers = #tpu.dot_dimension_numbers<[1], [0], [0], [1], [0, 0, 1, 1], [], []>} : vector<32x576xbf16>, vector<576x64xbf16>, vector<32x64xf32> -> vector<32x64xf32>
    %cst_3 = arith.constant dense<0.000000e+00> : vector<64xf32>
    %3 = vector.multi_reduction <add>, %2, %cst_3 [0] : vector<32x64xf32> to vector<64xf32>
    %4 = vector.shape_cast %3 : vector<64xf32> to vector<1x64xf32>
    %cst_4 = arith.constant 3.125000e-02 : f32
    %5 = vector.broadcast %cst_4 : f32 to vector<1x64xf32>
    %6 = arith.mulf %4, %5 : vector<1x64xf32>
    %7 = arith.mulf %2, %2 : vector<32x64xf32>
    %cst_5 = arith.constant dense<0.000000e+00> : vector<64xf32>
    %8 = vector.multi_reduction <add>, %7, %cst_5 [0] : vector<32x64xf32> to vector<64xf32>
    %9 = vector.shape_cast %8 : vector<64xf32> to vector<1x64xf32>
    %cst_6 = arith.constant 3.125000e-02 : f32
    %10 = vector.broadcast %cst_6 : f32 to vector<1x64xf32>
    %11 = arith.mulf %9, %10 : vector<1x64xf32>
    %12 = arith.mulf %6, %6 : vector<1x64xf32>
    %13 = arith.subf %11, %12 : vector<1x64xf32>
    %cst_7 = arith.constant 0.000000e+00 : f32
    %14 = vector.broadcast %cst_7 : f32 to vector<1x64xf32>
    %15 = arith.maximumf %13, %14 : vector<1x64xf32>
    %c0_8 = arith.constant 0 : index
    %c0_9 = arith.constant 0 : index
    %16 = vector.load %arg2[%c0_8, %c0_9] : memref<1x64xf32, #tpu.memory_space<vmem>>, vector<1x64xf32>
    %cst_10 = arith.constant 9.99999974E-6 : f32
    %17 = vector.broadcast %cst_10 : f32 to vector<1x64xf32>
    %18 = arith.addf %15, %17 : vector<1x64xf32>
    %19 = math.rsqrt %18 : vector<1x64xf32>
    %20 = arith.mulf %16, %19 : vector<1x64xf32>
    %c0_11 = arith.constant 0 : index
    %c0_12 = arith.constant 0 : index
    %21 = vector.load %arg3[%c0_11, %c0_12] : memref<1x64xf32, #tpu.memory_space<vmem>>, vector<1x64xf32>
    %22 = arith.mulf %6, %20 : vector<1x64xf32>
    %23 = arith.subf %21, %22 : vector<1x64xf32>
    %24 = vector.broadcast %20 : vector<1x64xf32> to vector<32x64xf32>
    %25 = arith.mulf %2, %24 : vector<32x64xf32>
    %26 = vector.broadcast %23 : vector<1x64xf32> to vector<32x64xf32>
    %27 = arith.addf %25, %26 : vector<32x64xf32>
    %cst_13 = arith.constant 0.000000e+00 : f32
    %28 = vector.broadcast %cst_13 : f32 to vector<32x64xf32>
    %29 = arith.maximumf %27, %28 : vector<32x64xf32>
    %30 = arith.truncf %29 : vector<32x64xf32> to vector<32x64xbf16>
    %c0_14 = arith.constant 0 : index
    %c0_15 = arith.constant 0 : index
    %31 = vector.load %arg4[%c0_14, %c0_15] : memref<32x64xbf16, #tpu.memory_space<vmem>>, vector<32x64xbf16>
    tpu.vector_store %arg4[%c0_14, %c0_15], %30 {strides = array<i32>} : memref<32x64xbf16, #tpu.memory_space<vmem>>, vector<32x64xbf16>,
    return
  }
}

module attributes {stable_mosaic.version = 11 : i64} {
  func.func @_conv_mm_kernel(%arg0: memref<6x256xbf16, #tpu.memory_space<vmem>>, %arg1: memref<256x64xbf16, #tpu.memory_space<vmem>>, %arg2: memref<1x64xf32, #tpu.memory_space<vmem>>, %arg3: memref<6x64xbf16, #tpu.memory_space<vmem>>) attributes {dimension_semantics = [], scalar_prefetch = 0 : i64, scratch_operands = 0 : i64, tpu.core_type = #tpu.core_type<tc>} {
    %c0 = arith.constant 0 : index
    %c0_0 = arith.constant 0 : index
    %0 = vector.load %arg0[%c0, %c0_0] : memref<6x256xbf16, #tpu.memory_space<vmem>>, vector<6x256xbf16>
    %c0_1 = arith.constant 0 : index
    %c0_2 = arith.constant 0 : index
    %1 = vector.load %arg1[%c0_1, %c0_2] : memref<256x64xbf16, #tpu.memory_space<vmem>>, vector<256x64xbf16>
    %cst = arith.constant dense<0.000000e+00> : vector<6x64xf32>
    %2 = tpu.matmul %0, %1, %cst {dimension_numbers = #tpu.dot_dimension_numbers<[1], [0], [0], [1], [0, 0, 1, 1], [], []>} : vector<6x256xbf16>, vector<256x64xbf16>, vector<6x64xf32> -> vector<6x64xf32>
    %c0_3 = arith.constant 0 : index
    %c0_4 = arith.constant 0 : index
    %3 = vector.load %arg2[%c0_3, %c0_4] : memref<1x64xf32, #tpu.memory_space<vmem>>, vector<1x64xf32>
    %4 = vector.broadcast %3 : vector<1x64xf32> to vector<6x64xf32>
    %5 = arith.addf %2, %4 : vector<6x64xf32>
    %cst_5 = arith.constant 0.000000e+00 : f32
    %6 = vector.broadcast %cst_5 : f32 to vector<6x64xf32>
    %7 = arith.maximumf %5, %6 : vector<6x64xf32>
    %8 = arith.truncf %7 : vector<6x64xf32> to vector<6x64xbf16>
    %c0_6 = arith.constant 0 : index
    %c0_7 = arith.constant 0 : index
    %9 = vector.load %arg3[%c0_6, %c0_7] : memref<6x64xbf16, #tpu.memory_space<vmem>>, vector<6x64xbf16>
    tpu.vector_store %arg3[%c0_6, %c0_7], %8 {strides = array<i32>} : memref<6x64xbf16, #tpu.memory_space<vmem>>, vector<6x64xbf16>,
    return
  }
}

module attributes {stable_mosaic.version = 11 : i64} {
  func.func @_seq_model_kernel(%arg0: memref<6x64xf32, #tpu.memory_space<vmem>>, %arg1: memref<64x256xbf16, #tpu.memory_space<vmem>>, %arg2: memref<1x256xf32, #tpu.memory_space<vmem>>, %arg3: memref<64x256xbf16, #tpu.memory_space<vmem>>, %arg4: memref<64x32xbf16, #tpu.memory_space<vmem>>, %arg5: memref<1x32xf32, #tpu.memory_space<vmem>>, %arg6: memref<32x256xbf16, #tpu.memory_space<vmem>>, %arg7: memref<1x256xf32, #tpu.memory_space<vmem>>, %arg8: memref<64x256xbf16, #tpu.memory_space<vmem>>, %arg9: memref<64x32xbf16, #tpu.memory_space<vmem>>, %arg10: memref<1x32xf32, #tpu.memory_space<vmem>>, %arg11: memref<32x10xbf16, #tpu.memory_space<vmem>>, %arg12: memref<1x10xf32, #tpu.memory_space<vmem>>, %arg13: memref<6x10xf32, #tpu.memory_space<vmem>>, %arg14: memref<6x256xf32, #tpu.memory_space<vmem>>, %arg15: memref<6x32xf32, #tpu.memory_space<vmem>>, %arg16: memref<6x32xf32, #tpu.memory_space<vmem>>) attributes {dimension_semantics = [], scalar_prefetch = 0 : i64, scratch_operands = 3 : i64, tpu.core_type = #tpu.core_type<tc>} {
    %c0 = arith.constant 0 : index
    %c0_0 = arith.constant 0 : index
    %0 = vector.load %arg0[%c0, %c0_0] : memref<6x64xf32, #tpu.memory_space<vmem>>, vector<6x64xf32>
    %1 = arith.truncf %0 : vector<6x64xf32> to vector<6x64xbf16>
    %c0_1 = arith.constant 0 : index
    %c0_2 = arith.constant 0 : index
    %2 = vector.load %arg1[%c0_1, %c0_2] : memref<64x256xbf16, #tpu.memory_space<vmem>>, vector<64x256xbf16>
    %cst = arith.constant dense<0.000000e+00> : vector<6x256xf32>
    %3 = tpu.matmul %1, %2, %cst {dimension_numbers = #tpu.dot_dimension_numbers<[1], [0], [0], [1], [0, 0, 1, 1], [], []>} : vector<6x64xbf16>, vector<64x256xbf16>, vector<6x256xf32> -> vector<6x256xf32>
    %c0_3 = arith.constant 0 : index
    %c0_4 = arith.constant 0 : index
    %4 = vector.load %arg2[%c0_3, %c0_4] : memref<1x256xf32, #tpu.memory_space<vmem>>, vector<1x256xf32>
    %5 = vector.broadcast %4 : vector<1x256xf32> to vector<6x256xf32>
    %6 = arith.addf %3, %5 : vector<6x256xf32>
    %c0_5 = arith.constant 0 : index
    %c0_6 = arith.constant 0 : index
    %7 = vector.load %arg14[%c0_5, %c0_6] : memref<6x256xf32, #tpu.memory_space<vmem>>, vector<6x256xf32>
    tpu.vector_store %arg14[%c0_5, %c0_6], %6 {strides = array<i32>} : memref<6x256xf32, #tpu.memory_space<vmem>>, vector<6x256xf32>,
    %cst_7 = arith.constant 0.000000e+00 : f32
    %8 = vector.broadcast %cst_7 : f32 to vector<2x32xf32>
    %c0_8 = arith.constant 0 : index
    %c0_9 = arith.constant 0 : index
    %9 = vector.load %arg14[%c0_8, %c0_9] : memref<6x256xf32, #tpu.memory_space<vmem>>, vector<2x256xf32>
    %c4 = arith.constant 4 : index
    %c0_10 = arith.constant 0 : index
    %10 = vector.load %arg14[%c4, %c0_10] : memref<6x256xf32, #tpu.memory_space<vmem>>, vector<2x256xf32>
    %11 = tpu.concatenate %8, %8 in 1 : vector<2x32xf32>, vector<2x32xf32> -> vector<2x64xf32>
    %12 = arith.truncf %11 : vector<2x64xf32> to vector<2x64xbf16>
    %c0_11 = arith.constant 0 : index
    %c0_12 = arith.constant 0 : index
    %13 = vector.load %arg3[%c0_11, %c0_12] : memref<64x256xbf16, #tpu.memory_space<vmem>>, vector<64x256xbf16>
    %cst_13 = arith.constant dense<0.000000e+00> : vector<2x256xf32>
    %14 = tpu.matmul %12, %13, %cst_13 {dimension_numbers = #tpu.dot_dimension_numbers<[1], [0], [0], [1], [0, 0, 1, 1], [], []>} : vector<2x64xbf16>, vector<64x256xbf16>, vector<2x256xf32> -> vector<2x256xf32>
    %15 = vector.extract_strided_slice %9 {offsets = [0, 0], sizes = [2, 128], strides = [1, 1]} : vector<2x256xf32> to vector<2x128xf32>
    %16 = vector.extract_strided_slice %14 {offsets = [0, 0], sizes = [2, 128], strides = [1, 1]} : vector<2x256xf32> to vector<2x128xf32>
    %17 = arith.addf %15, %16 : vector<2x128xf32>
    %18 = vector.extract_strided_slice %10 {offsets = [0, 128], sizes = [2, 128], strides = [1, 1]} : vector<2x256xf32> to vector<2x128xf32>
    %19 = vector.extract_strided_slice %14 {offsets = [0, 128], sizes = [2, 128], strides = [1, 1]} : vector<2x256xf32> to vector<2x128xf32>
    %20 = arith.addf %18, %19 : vector<2x128xf32>
    %21 = vector.extract_strided_slice %17 {offsets = [0, 0], sizes = [2, 32], strides = [1, 1]} : vector<2x128xf32> to vector<2x32xf32>
    %22 = arith.negf %21 : vector<2x32xf32>
    %23 = math.exp %22 : vector<2x32xf32>
    %cst_14 = arith.constant 1.000000e+00 : f32
    %24 = vector.broadcast %cst_14 : f32 to vector<2x32xf32>
    %25 = arith.addf %24, %23 : vector<2x32xf32>
    %26 = arith.divf %24, %25 : vector<2x32xf32>
    %27 = vector.extract_strided_slice %17 {offsets = [0, 32], sizes = [2, 32], strides = [1, 1]} : vector<2x128xf32> to vector<2x32xf32>
    %28 = arith.negf %27 : vector<2x32xf32>
    %29 = math.exp %28 : vector<2x32xf32>
    %cst_15 = arith.constant 1.000000e+00 : f32
    %30 = vector.broadcast %cst_15 : f32 to vector<2x32xf32>
    %31 = arith.addf %30, %29 : vector<2x32xf32>
    %32 = arith.divf %30, %31 : vector<2x32xf32>
    %33 = vector.extract_strided_slice %17 {offsets = [0, 64], sizes = [2, 32], strides = [1, 1]} : vector<2x128xf32> to vector<2x32xf32>
    %34 = math.tanh %33 : vector<2x32xf32>
    %35 = vector.extract_strided_slice %17 {offsets = [0, 96], sizes = [2, 32], strides = [1, 1]} : vector<2x128xf32> to vector<2x32xf32>
    %36 = arith.negf %35 : vector<2x32xf32>
    %37 = math.exp %36 : vector<2x32xf32>
    %cst_16 = arith.constant 1.000000e+00 : f32
    %38 = vector.broadcast %cst_16 : f32 to vector<2x32xf32>
    %39 = arith.addf %38, %37 : vector<2x32xf32>
    %40 = arith.divf %38, %39 : vector<2x32xf32>
    %41 = arith.mulf %32, %8 : vector<2x32xf32>
    %42 = arith.mulf %26, %34 : vector<2x32xf32>
    %43 = arith.addf %41, %42 : vector<2x32xf32>
    %44 = math.tanh %43 : vector<2x32xf32>
    %45 = arith.mulf %40, %44 : vector<2x32xf32>
    %46 = vector.extract_strided_slice %20 {offsets = [0, 0], sizes = [2, 32], strides = [1, 1]} : vector<2x128xf32> to vector<2x32xf32>
    %47 = arith.negf %46 : vector<2x32xf32>
    %48 = math.exp %47 : vector<2x32xf32>
    %cst_17 = arith.constant 1.000000e+00 : f32
    %49 = vector.broadcast %cst_17 : f32 to vector<2x32xf32>
    %50 = arith.addf %49, %48 : vector<2x32xf32>
    %51 = arith.divf %49, %50 : vector<2x32xf32>
    %52 = vector.extract_strided_slice %20 {offsets = [0, 32], sizes = [2, 32], strides = [1, 1]} : vector<2x128xf32> to vector<2x32xf32>
    %53 = arith.negf %52 : vector<2x32xf32>
    %54 = math.exp %53 : vector<2x32xf32>
    %cst_18 = arith.constant 1.000000e+00 : f32
    %55 = vector.broadcast %cst_18 : f32 to vector<2x32xf32>
    %56 = arith.addf %55, %54 : vector<2x32xf32>
    %57 = arith.divf %55, %56 : vector<2x32xf32>
    %58 = vector.extract_strided_slice %20 {offsets = [0, 64], sizes = [2, 32], strides = [1, 1]} : vector<2x128xf32> to vector<2x32xf32>
    %59 = math.tanh %58 : vector<2x32xf32>
    %60 = vector.extract_strided_slice %20 {offsets = [0, 96], sizes = [2, 32], strides = [1, 1]} : vector<2x128xf32> to vector<2x32xf32>
    %61 = arith.negf %60 : vector<2x32xf32>
    %62 = math.exp %61 : vector<2x32xf32>
    %cst_19 = arith.constant 1.000000e+00 : f32
    %63 = vector.broadcast %cst_19 : f32 to vector<2x32xf32>
    %64 = arith.addf %63, %62 : vector<2x32xf32>
    %65 = arith.divf %63, %64 : vector<2x32xf32>
    %66 = arith.mulf %57, %8 : vector<2x32xf32>
    %67 = arith.mulf %51, %59 : vector<2x32xf32>
    %68 = arith.addf %66, %67 : vector<2x32xf32>
    %69 = math.tanh %68 : vector<2x32xf32>
    %70 = arith.mulf %65, %69 : vector<2x32xf32>
    %c0_20 = arith.constant 0 : index
    %c0_21 = arith.constant 0 : index
    %71 = vector.load %arg15[%c0_20, %c0_21] : memref<6x32xf32, #tpu.memory_space<vmem>>, vector<2x32xf32>
    tpu.vector_store %arg15[%c0_20, %c0_21], %45 {strides = array<i32>} : memref<6x32xf32, #tpu.memory_space<vmem>>, vector<2x32xf32>,
    %c4_22 = arith.constant 4 : index
    %c0_23 = arith.constant 0 : index
    %72 = vector.load %arg16[%c4_22, %c0_23] : memref<6x32xf32, #tpu.memory_space<vmem>>, vector<2x32xf32>
    tpu.vector_store %arg16[%c4_22, %c0_23], %70 {strides = array<i32>} : memref<6x32xf32, #tpu.memory_space<vmem>>, vector<2x32xf32>,
    %c2 = arith.constant 2 : index
    %c0_24 = arith.constant 0 : index
    %73 = vector.load %arg14[%c2, %c0_24] : memref<6x256xf32, #tpu.memory_space<vmem>>, vector<2x256xf32>
    %c2_25 = arith.constant 2 : index
    %c0_26 = arith.constant 0 : index
    %74 = vector.load %arg14[%c2_25, %c0_26] : memref<6x256xf32, #tpu.memory_space<vmem>>, vector<2x256xf32>
    %75 = tpu.concatenate %45, %70 in 1 : vector<2x32xf32>, vector<2x32xf32> -> vector<2x64xf32>
    %76 = arith.truncf %75 : vector<2x64xf32> to vector<2x64xbf16>
    %c0_27 = arith.constant 0 : index
    %c0_28 = arith.constant 0 : index
    %77 = vector.load %arg3[%c0_27, %c0_28] : memref<64x256xbf16, #tpu.memory_space<vmem>>, vector<64x256xbf16>
    %cst_29 = arith.constant dense<0.000000e+00> : vector<2x256xf32>
    %78 = tpu.matmul %76, %77, %cst_29 {dimension_numbers = #tpu.dot_dimension_numbers<[1], [0], [0], [1], [0, 0, 1, 1], [], []>} : vector<2x64xbf16>, vector<64x256xbf16>, vector<2x256xf32> -> vector<2x256xf32>
    %79 = vector.extract_strided_slice %73 {offsets = [0, 0], sizes = [2, 128], strides = [1, 1]} : vector<2x256xf32> to vector<2x128xf32>
    %80 = vector.extract_strided_slice %78 {offsets = [0, 0], sizes = [2, 128], strides = [1, 1]} : vector<2x256xf32> to vector<2x128xf32>
    %81 = arith.addf %79, %80 : vector<2x128xf32>
    %82 = vector.extract_strided_slice %74 {offsets = [0, 128], sizes = [2, 128], strides = [1, 1]} : vector<2x256xf32> to vector<2x128xf32>
    %83 = vector.extract_strided_slice %78 {offsets = [0, 128], sizes = [2, 128], strides = [1, 1]} : vector<2x256xf32> to vector<2x128xf32>
    %84 = arith.addf %82, %83 : vector<2x128xf32>
    %85 = vector.extract_strided_slice %81 {offsets = [0, 0], sizes = [2, 32], strides = [1, 1]} : vector<2x128xf32> to vector<2x32xf32>
    %86 = arith.negf %85 : vector<2x32xf32>
    %87 = math.exp %86 : vector<2x32xf32>
    %cst_30 = arith.constant 1.000000e+00 : f32
    %88 = vector.broadcast %cst_30 : f32 to vector<2x32xf32>
    %89 = arith.addf %88, %87 : vector<2x32xf32>
    %90 = arith.divf %88, %89 : vector<2x32xf32>
    %91 = vector.extract_strided_slice %81 {offsets = [0, 32], sizes = [2, 32], strides = [1, 1]} : vector<2x128xf32> to vector<2x32xf32>
    %92 = arith.negf %91 : vector<2x32xf32>
    %93 = math.exp %92 : vector<2x32xf32>
    %cst_31 = arith.constant 1.000000e+00 : f32
    %94 = vector.broadcast %cst_31 : f32 to vector<2x32xf32>
    %95 = arith.addf %94, %93 : vector<2x32xf32>
    %96 = arith.divf %94, %95 : vector<2x32xf32>
    %97 = vector.extract_strided_slice %81 {offsets = [0, 64], sizes = [2, 32], strides = [1, 1]} : vector<2x128xf32> to vector<2x32xf32>
    %98 = math.tanh %97 : vector<2x32xf32>
    %99 = vector.extract_strided_slice %81 {offsets = [0, 96], sizes = [2, 32], strides = [1, 1]} : vector<2x128xf32> to vector<2x32xf32>
    %100 = arith.negf %99 : vector<2x32xf32>
    %101 = math.exp %100 : vector<2x32xf32>
    %cst_32 = arith.constant 1.000000e+00 : f32
    %102 = vector.broadcast %cst_32 : f32 to vector<2x32xf32>
    %103 = arith.addf %102, %101 : vector<2x32xf32>
    %104 = arith.divf %102, %103 : vector<2x32xf32>
    %105 = arith.mulf %96, %43 : vector<2x32xf32>
    %106 = arith.mulf %90, %98 : vector<2x32xf32>
    %107 = arith.addf %105, %106 : vector<2x32xf32>
    %108 = math.tanh %107 : vector<2x32xf32>
    %109 = arith.mulf %104, %108 : vector<2x32xf32>
    %110 = vector.extract_strided_slice %84 {offsets = [0, 0], sizes = [2, 32], strides = [1, 1]} : vector<2x128xf32> to vector<2x32xf32>
    %111 = arith.negf %110 : vector<2x32xf32>
    %112 = math.exp %111 : vector<2x32xf32>
    %cst_33 = arith.constant 1.000000e+00 : f32
    %113 = vector.broadcast %cst_33 : f32 to vector<2x32xf32>
    %114 = arith.addf %113, %112 : vector<2x32xf32>
    %115 = arith.divf %113, %114 : vector<2x32xf32>
    %116 = vector.extract_strided_slice %84 {offsets = [0, 32], sizes = [2, 32], strides = [1, 1]} : vector<2x128xf32> to vector<2x32xf32>
    %117 = arith.negf %116 : vector<2x32xf32>
    %118 = math.exp %117 : vector<2x32xf32>
    %cst_34 = arith.constant 1.000000e+00 : f32
    %119 = vector.broadcast %cst_34 : f32 to vector<2x32xf32>
    %120 = arith.addf %119, %118 : vector<2x32xf32>
    %121 = arith.divf %119, %120 : vector<2x32xf32>
    %122 = vector.extract_strided_slice %84 {offsets = [0, 64], sizes = [2, 32], strides = [1, 1]} : vector<2x128xf32> to vector<2x32xf32>
    %123 = math.tanh %122 : vector<2x32xf32>
    %124 = vector.extract_strided_slice %84 {offsets = [0, 96], sizes = [2, 32], strides = [1, 1]} : vector<2x128xf32> to vector<2x32xf32>
    %125 = arith.negf %124 : vector<2x32xf32>
    %126 = math.exp %125 : vector<2x32xf32>
    %cst_35 = arith.constant 1.000000e+00 : f32
    %127 = vector.broadcast %cst_35 : f32 to vector<2x32xf32>
    %128 = arith.addf %127, %126 : vector<2x32xf32>
    %129 = arith.divf %127, %128 : vector<2x32xf32>
    %130 = arith.mulf %121, %68 : vector<2x32xf32>
    %131 = arith.mulf %115, %123 : vector<2x32xf32>
    %132 = arith.addf %130, %131 : vector<2x32xf32>
    %133 = math.tanh %132 : vector<2x32xf32>
    %134 = arith.mulf %129, %133 : vector<2x32xf32>
    %c2_36 = arith.constant 2 : index
    %c0_37 = arith.constant 0 : index
    %135 = vector.load %arg15[%c2_36, %c0_37] : memref<6x32xf32, #tpu.memory_space<vmem>>, vector<2x32xf32>
    tpu.vector_store %arg15[%c2_36, %c0_37], %109 {strides = array<i32>} : memref<6x32xf32, #tpu.memory_space<vmem>>, vector<2x32xf32>,
    %c2_38 = arith.constant 2 : index
    %c0_39 = arith.constant 0 : index
    %136 = vector.load %arg16[%c2_38, %c0_39] : memref<6x32xf32, #tpu.memory_space<vmem>>, vector<2x32xf32>
    tpu.vector_store %arg16[%c2_38, %c0_39], %134 {strides = array<i32>} : memref<6x32xf32, #tpu.memory_space<vmem>>, vector<2x32xf32>,
    %c4_40 = arith.constant 4 : index
    %c0_41 = arith.constant 0 : index
    %137 = vector.load %arg14[%c4_40, %c0_41] : memref<6x256xf32, #tpu.memory_space<vmem>>, vector<2x256xf32>
    %c0_42 = arith.constant 0 : index
    %c0_43 = arith.constant 0 : index
    %138 = vector.load %arg14[%c0_42, %c0_43] : memref<6x256xf32, #tpu.memory_space<vmem>>, vector<2x256xf32>
    %139 = tpu.concatenate %109, %134 in 1 : vector<2x32xf32>, vector<2x32xf32> -> vector<2x64xf32>
    %140 = arith.truncf %139 : vector<2x64xf32> to vector<2x64xbf16>
    %c0_44 = arith.constant 0 : index
    %c0_45 = arith.constant 0 : index
    %141 = vector.load %arg3[%c0_44, %c0_45] : memref<64x256xbf16, #tpu.memory_space<vmem>>, vector<64x256xbf16>
    %cst_46 = arith.constant dense<0.000000e+00> : vector<2x256xf32>
    %142 = tpu.matmul %140, %141, %cst_46 {dimension_numbers = #tpu.dot_dimension_numbers<[1], [0], [0], [1], [0, 0, 1, 1], [], []>} : vector<2x64xbf16>, vector<64x256xbf16>, vector<2x256xf32> -> vector<2x256xf32>
    %143 = vector.extract_strided_slice %137 {offsets = [0, 0], sizes = [2, 128], strides = [1, 1]} : vector<2x256xf32> to vector<2x128xf32>
    %144 = vector.extract_strided_slice %142 {offsets = [0, 0], sizes = [2, 128], strides = [1, 1]} : vector<2x256xf32> to vector<2x128xf32>
    %145 = arith.addf %143, %144 : vector<2x128xf32>
    %146 = vector.extract_strided_slice %138 {offsets = [0, 128], sizes = [2, 128], strides = [1, 1]} : vector<2x256xf32> to vector<2x128xf32>
    %147 = vector.extract_strided_slice %142 {offsets = [0, 128], sizes = [2, 128], strides = [1, 1]} : vector<2x256xf32> to vector<2x128xf32>
    %148 = arith.addf %146, %147 : vector<2x128xf32>
    %149 = vector.extract_strided_slice %145 {offsets = [0, 0], sizes = [2, 32], strides = [1, 1]} : vector<2x128xf32> to vector<2x32xf32>
    %150 = arith.negf %149 : vector<2x32xf32>
    %151 = math.exp %150 : vector<2x32xf32>
    %cst_47 = arith.constant 1.000000e+00 : f32
    %152 = vector.broadcast %cst_47 : f32 to vector<2x32xf32>
    %153 = arith.addf %152, %151 : vector<2x32xf32>
    %154 = arith.divf %152, %153 : vector<2x32xf32>
    %155 = vector.extract_strided_slice %145 {offsets = [0, 32], sizes = [2, 32], strides = [1, 1]} : vector<2x128xf32> to vector<2x32xf32>
    %156 = arith.negf %155 : vector<2x32xf32>
    %157 = math.exp %156 : vector<2x32xf32>
    %cst_48 = arith.constant 1.000000e+00 : f32
    %158 = vector.broadcast %cst_48 : f32 to vector<2x32xf32>
    %159 = arith.addf %158, %157 : vector<2x32xf32>
    %160 = arith.divf %158, %159 : vector<2x32xf32>
    %161 = vector.extract_strided_slice %145 {offsets = [0, 64], sizes = [2, 32], strides = [1, 1]} : vector<2x128xf32> to vector<2x32xf32>
    %162 = math.tanh %161 : vector<2x32xf32>
    %163 = vector.extract_strided_slice %145 {offsets = [0, 96], sizes = [2, 32], strides = [1, 1]} : vector<2x128xf32> to vector<2x32xf32>
    %164 = arith.negf %163 : vector<2x32xf32>
    %165 = math.exp %164 : vector<2x32xf32>
    %cst_49 = arith.constant 1.000000e+00 : f32
    %166 = vector.broadcast %cst_49 : f32 to vector<2x32xf32>
    %167 = arith.addf %166, %165 : vector<2x32xf32>
    %168 = arith.divf %166, %167 : vector<2x32xf32>
    %169 = arith.mulf %160, %107 : vector<2x32xf32>
    %170 = arith.mulf %154, %162 : vector<2x32xf32>
    %171 = arith.addf %169, %170 : vector<2x32xf32>
    %172 = math.tanh %171 : vector<2x32xf32>
    %173 = arith.mulf %168, %172 : vector<2x32xf32>
    %174 = vector.extract_strided_slice %148 {offsets = [0, 0], sizes = [2, 32], strides = [1, 1]} : vector<2x128xf32> to vector<2x32xf32>
    %175 = arith.negf %174 : vector<2x32xf32>
    %176 = math.exp %175 : vector<2x32xf32>
    %cst_50 = arith.constant 1.000000e+00 : f32
    %177 = vector.broadcast %cst_50 : f32 to vector<2x32xf32>
    %178 = arith.addf %177, %176 : vector<2x32xf32>
    %179 = arith.divf %177, %178 : vector<2x32xf32>
    %180 = vector.extract_strided_slice %148 {offsets = [0, 32], sizes = [2, 32], strides = [1, 1]} : vector<2x128xf32> to vector<2x32xf32>
    %181 = arith.negf %180 : vector<2x32xf32>
    %182 = math.exp %181 : vector<2x32xf32>
    %cst_51 = arith.constant 1.000000e+00 : f32
    %183 = vector.broadcast %cst_51 : f32 to vector<2x32xf32>
    %184 = arith.addf %183, %182 : vector<2x32xf32>
    %185 = arith.divf %183, %184 : vector<2x32xf32>
    %186 = vector.extract_strided_slice %148 {offsets = [0, 64], sizes = [2, 32], strides = [1, 1]} : vector<2x128xf32> to vector<2x32xf32>
    %187 = math.tanh %186 : vector<2x32xf32>
    %188 = vector.extract_strided_slice %148 {offsets = [0, 96], sizes = [2, 32], strides = [1, 1]} : vector<2x128xf32> to vector<2x32xf32>
    %189 = arith.negf %188 : vector<2x32xf32>
    %190 = math.exp %189 : vector<2x32xf32>
    %cst_52 = arith.constant 1.000000e+00 : f32
    %191 = vector.broadcast %cst_52 : f32 to vector<2x32xf32>
    %192 = arith.addf %191, %190 : vector<2x32xf32>
    %193 = arith.divf %191, %192 : vector<2x32xf32>
    %194 = arith.mulf %185, %132 : vector<2x32xf32>
    %195 = arith.mulf %179, %187 : vector<2x32xf32>
    %196 = arith.addf %194, %195 : vector<2x32xf32>
    %197 = math.tanh %196 : vector<2x32xf32>
    %198 = arith.mulf %193, %197 : vector<2x32xf32>
    %c4_53 = arith.constant 4 : index
    %c0_54 = arith.constant 0 : index
    %199 = vector.load %arg15[%c4_53, %c0_54] : memref<6x32xf32, #tpu.memory_space<vmem>>, vector<2x32xf32>
    tpu.vector_store %arg15[%c4_53, %c0_54], %173 {strides = array<i32>} : memref<6x32xf32, #tpu.memory_space<vmem>>, vector<2x32xf32>,
    %c0_55 = arith.constant 0 : index
    %c0_56 = arith.constant 0 : index
    %200 = vector.load %arg16[%c0_55, %c0_56] : memref<6x32xf32, #tpu.memory_space<vmem>>, vector<2x32xf32>
    tpu.vector_store %arg16[%c0_55, %c0_56], %198 {strides = array<i32>} : memref<6x32xf32, #tpu.memory_space<vmem>>, vector<2x32xf32>,
    %c0_57 = arith.constant 0 : index
    %c0_58 = arith.constant 0 : index
    %201 = vector.load %arg15[%c0_57, %c0_58] : memref<6x32xf32, #tpu.memory_space<vmem>>, vector<6x32xf32>
    %c0_59 = arith.constant 0 : index
    %c0_60 = arith.constant 0 : index
    %202 = vector.load %arg16[%c0_59, %c0_60] : memref<6x32xf32, #tpu.memory_space<vmem>>, vector<6x32xf32>
    %203 = tpu.concatenate %201, %202 in 1 : vector<6x32xf32>, vector<6x32xf32> -> vector<6x64xf32>
    %204 = arith.truncf %203 : vector<6x64xf32> to vector<6x64xbf16>
    %c0_61 = arith.constant 0 : index
    %c0_62 = arith.constant 0 : index
    %205 = vector.load %arg4[%c0_61, %c0_62] : memref<64x32xbf16, #tpu.memory_space<vmem>>, vector<64x32xbf16>
    %cst_63 = arith.constant dense<0.000000e+00> : vector<6x32xf32>
    %206 = tpu.matmul %204, %205, %cst_63 {dimension_numbers = #tpu.dot_dimension_numbers<[1], [0], [0], [1], [0, 0, 1, 1], [], []>} : vector<6x64xbf16>, vector<64x32xbf16>, vector<6x32xf32> -> vector<6x32xf32>
    %c0_64 = arith.constant 0 : index
    %c0_65 = arith.constant 0 : index
    %207 = vector.load %arg5[%c0_64, %c0_65] : memref<1x32xf32, #tpu.memory_space<vmem>>, vector<1x32xf32>
    %208 = vector.broadcast %207 : vector<1x32xf32> to vector<6x32xf32>
    %209 = arith.addf %206, %208 : vector<6x32xf32>
    %210 = arith.truncf %209 : vector<6x32xf32> to vector<6x32xbf16>
    %c0_66 = arith.constant 0 : index
    %c0_67 = arith.constant 0 : index
    %211 = vector.load %arg6[%c0_66, %c0_67] : memref<32x256xbf16, #tpu.memory_space<vmem>>, vector<32x256xbf16>
    %cst_68 = arith.constant dense<0.000000e+00> : vector<6x256xf32>
    %212 = tpu.matmul %210, %211, %cst_68 {dimension_numbers = #tpu.dot_dimension_numbers<[1], [0], [0], [1], [0, 0, 1, 1], [], []>} : vector<6x32xbf16>, vector<32x256xbf16>, vector<6x256xf32> -> vector<6x256xf32>
    %c0_69 = arith.constant 0 : index
    %c0_70 = arith.constant 0 : index
    %213 = vector.load %arg7[%c0_69, %c0_70] : memref<1x256xf32, #tpu.memory_space<vmem>>, vector<1x256xf32>
    %214 = vector.broadcast %213 : vector<1x256xf32> to vector<6x256xf32>
    %215 = arith.addf %212, %214 : vector<6x256xf32>
    %c0_71 = arith.constant 0 : index
    %c0_72 = arith.constant 0 : index
    %216 = vector.load %arg14[%c0_71, %c0_72] : memref<6x256xf32, #tpu.memory_space<vmem>>, vector<6x256xf32>
    tpu.vector_store %arg14[%c0_71, %c0_72], %215 {strides = array<i32>} : memref<6x256xf32, #tpu.memory_space<vmem>>, vector<6x256xf32>,
    %cst_73 = arith.constant 0.000000e+00 : f32
    %217 = vector.broadcast %cst_73 : f32 to vector<2x32xf32>
    %c0_74 = arith.constant 0 : index
    %c0_75 = arith.constant 0 : index
    %218 = vector.load %arg14[%c0_74, %c0_75] : memref<6x256xf32, #tpu.memory_space<vmem>>, vector<2x256xf32>
    %c4_76 = arith.constant 4 : index
    %c0_77 = arith.constant 0 : index
    %219 = vector.load %arg14[%c4_76, %c0_77] : memref<6x256xf32, #tpu.memory_space<vmem>>, vector<2x256xf32>
    %220 = tpu.concatenate %217, %217 in 1 : vector<2x32xf32>, vector<2x32xf32> -> vector<2x64xf32>
    %221 = arith.truncf %220 : vector<2x64xf32> to vector<2x64xbf16>
    %c0_78 = arith.constant 0 : index
    %c0_79 = arith.constant 0 : index
    %222 = vector.load %arg8[%c0_78, %c0_79] : memref<64x256xbf16, #tpu.memory_space<vmem>>, vector<64x256xbf16>
    %cst_80 = arith.constant dense<0.000000e+00> : vector<2x256xf32>
    %223 = tpu.matmul %221, %222, %cst_80 {dimension_numbers = #tpu.dot_dimension_numbers<[1], [0], [0], [1], [0, 0, 1, 1], [], []>} : vector<2x64xbf16>, vector<64x256xbf16>, vector<2x256xf32> -> vector<2x256xf32>
    %224 = vector.extract_strided_slice %218 {offsets = [0, 0], sizes = [2, 128], strides = [1, 1]} : vector<2x256xf32> to vector<2x128xf32>
    %225 = vector.extract_strided_slice %223 {offsets = [0, 0], sizes = [2, 128], strides = [1, 1]} : vector<2x256xf32> to vector<2x128xf32>
    %226 = arith.addf %224, %225 : vector<2x128xf32>
    %227 = vector.extract_strided_slice %219 {offsets = [0, 128], sizes = [2, 128], strides = [1, 1]} : vector<2x256xf32> to vector<2x128xf32>
    %228 = vector.extract_strided_slice %223 {offsets = [0, 128], sizes = [2, 128], strides = [1, 1]} : vector<2x256xf32> to vector<2x128xf32>
    %229 = arith.addf %227, %228 : vector<2x128xf32>
    %230 = vector.extract_strided_slice %226 {offsets = [0, 0], sizes = [2, 32], strides = [1, 1]} : vector<2x128xf32> to vector<2x32xf32>
    %231 = arith.negf %230 : vector<2x32xf32>
    %232 = math.exp %231 : vector<2x32xf32>
    %cst_81 = arith.constant 1.000000e+00 : f32
    %233 = vector.broadcast %cst_81 : f32 to vector<2x32xf32>
    %234 = arith.addf %233, %232 : vector<2x32xf32>
    %235 = arith.divf %233, %234 : vector<2x32xf32>
    %236 = vector.extract_strided_slice %226 {offsets = [0, 32], sizes = [2, 32], strides = [1, 1]} : vector<2x128xf32> to vector<2x32xf32>
    %237 = arith.negf %236 : vector<2x32xf32>
    %238 = math.exp %237 : vector<2x32xf32>
    %cst_82 = arith.constant 1.000000e+00 : f32
    %239 = vector.broadcast %cst_82 : f32 to vector<2x32xf32>
    %240 = arith.addf %239, %238 : vector<2x32xf32>
    %241 = arith.divf %239, %240 : vector<2x32xf32>
    %242 = vector.extract_strided_slice %226 {offsets = [0, 64], sizes = [2, 32], strides = [1, 1]} : vector<2x128xf32> to vector<2x32xf32>
    %243 = math.tanh %242 : vector<2x32xf32>
    %244 = vector.extract_strided_slice %226 {offsets = [0, 96], sizes = [2, 32], strides = [1, 1]} : vector<2x128xf32> to vector<2x32xf32>
    %245 = arith.negf %244 : vector<2x32xf32>
    %246 = math.exp %245 : vector<2x32xf32>
    %cst_83 = arith.constant 1.000000e+00 : f32
    %247 = vector.broadcast %cst_83 : f32 to vector<2x32xf32>
    %248 = arith.addf %247, %246 : vector<2x32xf32>
    %249 = arith.divf %247, %248 : vector<2x32xf32>
    %250 = arith.mulf %241, %217 : vector<2x32xf32>
    %251 = arith.mulf %235, %243 : vector<2x32xf32>
    %252 = arith.addf %250, %251 : vector<2x32xf32>
    %253 = math.tanh %252 : vector<2x32xf32>
    %254 = arith.mulf %249, %253 : vector<2x32xf32>
    %255 = vector.extract_strided_slice %229 {offsets = [0, 0], sizes = [2, 32], strides = [1, 1]} : vector<2x128xf32> to vector<2x32xf32>
    %256 = arith.negf %255 : vector<2x32xf32>
    %257 = math.exp %256 : vector<2x32xf32>
    %cst_84 = arith.constant 1.000000e+00 : f32
    %258 = vector.broadcast %cst_84 : f32 to vector<2x32xf32>
    %259 = arith.addf %258, %257 : vector<2x32xf32>
    %260 = arith.divf %258, %259 : vector<2x32xf32>
    %261 = vector.extract_strided_slice %229 {offsets = [0, 32], sizes = [2, 32], strides = [1, 1]} : vector<2x128xf32> to vector<2x32xf32>
    %262 = arith.negf %261 : vector<2x32xf32>
    %263 = math.exp %262 : vector<2x32xf32>
    %cst_85 = arith.constant 1.000000e+00 : f32
    %264 = vector.broadcast %cst_85 : f32 to vector<2x32xf32>
    %265 = arith.addf %264, %263 : vector<2x32xf32>
    %266 = arith.divf %264, %265 : vector<2x32xf32>
    %267 = vector.extract_strided_slice %229 {offsets = [0, 64], sizes = [2, 32], strides = [1, 1]} : vector<2x128xf32> to vector<2x32xf32>
    %268 = math.tanh %267 : vector<2x32xf32>
    %269 = vector.extract_strided_slice %229 {offsets = [0, 96], sizes = [2, 32], strides = [1, 1]} : vector<2x128xf32> to vector<2x32xf32>
    %270 = arith.negf %269 : vector<2x32xf32>
    %271 = math.exp %270 : vector<2x32xf32>
    %cst_86 = arith.constant 1.000000e+00 : f32
    %272 = vector.broadcast %cst_86 : f32 to vector<2x32xf32>
    %273 = arith.addf %272, %271 : vector<2x32xf32>
    %274 = arith.divf %272, %273 : vector<2x32xf32>
    %275 = arith.mulf %266, %217 : vector<2x32xf32>
    %276 = arith.mulf %260, %268 : vector<2x32xf32>
    %277 = arith.addf %275, %276 : vector<2x32xf32>
    %278 = math.tanh %277 : vector<2x32xf32>
    %279 = arith.mulf %274, %278 : vector<2x32xf32>
    %c0_87 = arith.constant 0 : index
    %c0_88 = arith.constant 0 : index
    %280 = vector.load %arg15[%c0_87, %c0_88] : memref<6x32xf32, #tpu.memory_space<vmem>>, vector<2x32xf32>
    tpu.vector_store %arg15[%c0_87, %c0_88], %254 {strides = array<i32>} : memref<6x32xf32, #tpu.memory_space<vmem>>, vector<2x32xf32>,
    %c4_89 = arith.constant 4 : index
    %c0_90 = arith.constant 0 : index
    %281 = vector.load %arg16[%c4_89, %c0_90] : memref<6x32xf32, #tpu.memory_space<vmem>>, vector<2x32xf32>
    tpu.vector_store %arg16[%c4_89, %c0_90], %279 {strides = array<i32>} : memref<6x32xf32, #tpu.memory_space<vmem>>, vector<2x32xf32>,
    %c2_91 = arith.constant 2 : index
    %c0_92 = arith.constant 0 : index
    %282 = vector.load %arg14[%c2_91, %c0_92] : memref<6x256xf32, #tpu.memory_space<vmem>>, vector<2x256xf32>
    %c2_93 = arith.constant 2 : index
    %c0_94 = arith.constant 0 : index
    %283 = vector.load %arg14[%c2_93, %c0_94] : memref<6x256xf32, #tpu.memory_space<vmem>>, vector<2x256xf32>
    %284 = tpu.concatenate %254, %279 in 1 : vector<2x32xf32>, vector<2x32xf32> -> vector<2x64xf32>
    %285 = arith.truncf %284 : vector<2x64xf32> to vector<2x64xbf16>
    %c0_95 = arith.constant 0 : index
    %c0_96 = arith.constant 0 : index
    %286 = vector.load %arg8[%c0_95, %c0_96] : memref<64x256xbf16, #tpu.memory_space<vmem>>, vector<64x256xbf16>
    %cst_97 = arith.constant dense<0.000000e+00> : vector<2x256xf32>
    %287 = tpu.matmul %285, %286, %cst_97 {dimension_numbers = #tpu.dot_dimension_numbers<[1], [0], [0], [1], [0, 0, 1, 1], [], []>} : vector<2x64xbf16>, vector<64x256xbf16>, vector<2x256xf32> -> vector<2x256xf32>
    %288 = vector.extract_strided_slice %282 {offsets = [0, 0], sizes = [2, 128], strides = [1, 1]} : vector<2x256xf32> to vector<2x128xf32>
    %289 = vector.extract_strided_slice %287 {offsets = [0, 0], sizes = [2, 128], strides = [1, 1]} : vector<2x256xf32> to vector<2x128xf32>
    %290 = arith.addf %288, %289 : vector<2x128xf32>
    %291 = vector.extract_strided_slice %283 {offsets = [0, 128], sizes = [2, 128], strides = [1, 1]} : vector<2x256xf32> to vector<2x128xf32>
    %292 = vector.extract_strided_slice %287 {offsets = [0, 128], sizes = [2, 128], strides = [1, 1]} : vector<2x256xf32> to vector<2x128xf32>
    %293 = arith.addf %291, %292 : vector<2x128xf32>
    %294 = vector.extract_strided_slice %290 {offsets = [0, 0], sizes = [2, 32], strides = [1, 1]} : vector<2x128xf32> to vector<2x32xf32>
    %295 = arith.negf %294 : vector<2x32xf32>
    %296 = math.exp %295 : vector<2x32xf32>
    %cst_98 = arith.constant 1.000000e+00 : f32
    %297 = vector.broadcast %cst_98 : f32 to vector<2x32xf32>
    %298 = arith.addf %297, %296 : vector<2x32xf32>
    %299 = arith.divf %297, %298 : vector<2x32xf32>
    %300 = vector.extract_strided_slice %290 {offsets = [0, 32], sizes = [2, 32], strides = [1, 1]} : vector<2x128xf32> to vector<2x32xf32>
    %301 = arith.negf %300 : vector<2x32xf32>
    %302 = math.exp %301 : vector<2x32xf32>
    %cst_99 = arith.constant 1.000000e+00 : f32
    %303 = vector.broadcast %cst_99 : f32 to vector<2x32xf32>
    %304 = arith.addf %303, %302 : vector<2x32xf32>
    %305 = arith.divf %303, %304 : vector<2x32xf32>
    %306 = vector.extract_strided_slice %290 {offsets = [0, 64], sizes = [2, 32], strides = [1, 1]} : vector<2x128xf32> to vector<2x32xf32>
    %307 = math.tanh %306 : vector<2x32xf32>
    %308 = vector.extract_strided_slice %290 {offsets = [0, 96], sizes = [2, 32], strides = [1, 1]} : vector<2x128xf32> to vector<2x32xf32>
    %309 = arith.negf %308 : vector<2x32xf32>
    %310 = math.exp %309 : vector<2x32xf32>
    %cst_100 = arith.constant 1.000000e+00 : f32
    %311 = vector.broadcast %cst_100 : f32 to vector<2x32xf32>
    %312 = arith.addf %311, %310 : vector<2x32xf32>
    %313 = arith.divf %311, %312 : vector<2x32xf32>
    %314 = arith.mulf %305, %252 : vector<2x32xf32>
    %315 = arith.mulf %299, %307 : vector<2x32xf32>
    %316 = arith.addf %314, %315 : vector<2x32xf32>
    %317 = math.tanh %316 : vector<2x32xf32>
    %318 = arith.mulf %313, %317 : vector<2x32xf32>
    %319 = vector.extract_strided_slice %293 {offsets = [0, 0], sizes = [2, 32], strides = [1, 1]} : vector<2x128xf32> to vector<2x32xf32>
    %320 = arith.negf %319 : vector<2x32xf32>
    %321 = math.exp %320 : vector<2x32xf32>
    %cst_101 = arith.constant 1.000000e+00 : f32
    %322 = vector.broadcast %cst_101 : f32 to vector<2x32xf32>
    %323 = arith.addf %322, %321 : vector<2x32xf32>
    %324 = arith.divf %322, %323 : vector<2x32xf32>
    %325 = vector.extract_strided_slice %293 {offsets = [0, 32], sizes = [2, 32], strides = [1, 1]} : vector<2x128xf32> to vector<2x32xf32>
    %326 = arith.negf %325 : vector<2x32xf32>
    %327 = math.exp %326 : vector<2x32xf32>
    %cst_102 = arith.constant 1.000000e+00 : f32
    %328 = vector.broadcast %cst_102 : f32 to vector<2x32xf32>
    %329 = arith.addf %328, %327 : vector<2x32xf32>
    %330 = arith.divf %328, %329 : vector<2x32xf32>
    %331 = vector.extract_strided_slice %293 {offsets = [0, 64], sizes = [2, 32], strides = [1, 1]} : vector<2x128xf32> to vector<2x32xf32>
    %332 = math.tanh %331 : vector<2x32xf32>
    %333 = vector.extract_strided_slice %293 {offsets = [0, 96], sizes = [2, 32], strides = [1, 1]} : vector<2x128xf32> to vector<2x32xf32>
    %334 = arith.negf %333 : vector<2x32xf32>
    %335 = math.exp %334 : vector<2x32xf32>
    %cst_103 = arith.constant 1.000000e+00 : f32
    %336 = vector.broadcast %cst_103 : f32 to vector<2x32xf32>
    %337 = arith.addf %336, %335 : vector<2x32xf32>
    %338 = arith.divf %336, %337 : vector<2x32xf32>
    %339 = arith.mulf %330, %277 : vector<2x32xf32>
    %340 = arith.mulf %324, %332 : vector<2x32xf32>
    %341 = arith.addf %339, %340 : vector<2x32xf32>
    %342 = math.tanh %341 : vector<2x32xf32>
    %343 = arith.mulf %338, %342 : vector<2x32xf32>
    %c2_104 = arith.constant 2 : index
    %c0_105 = arith.constant 0 : index
    %344 = vector.load %arg15[%c2_104, %c0_105] : memref<6x32xf32, #tpu.memory_space<vmem>>, vector<2x32xf32>
    tpu.vector_store %arg15[%c2_104, %c0_105], %318 {strides = array<i32>} : memref<6x32xf32, #tpu.memory_space<vmem>>, vector<2x32xf32>,
    %c2_106 = arith.constant 2 : index
    %c0_107 = arith.constant 0 : index
    %345 = vector.load %arg16[%c2_106, %c0_107] : memref<6x32xf32, #tpu.memory_space<vmem>>, vector<2x32xf32>
    tpu.vector_store %arg16[%c2_106, %c0_107], %343 {strides = array<i32>} : memref<6x32xf32, #tpu.memory_space<vmem>>, vector<2x32xf32>,
    %c4_108 = arith.constant 4 : index
    %c0_109 = arith.constant 0 : index
    %346 = vector.load %arg14[%c4_108, %c0_109] : memref<6x256xf32, #tpu.memory_space<vmem>>, vector<2x256xf32>
    %c0_110 = arith.constant 0 : index
    %c0_111 = arith.constant 0 : index
    %347 = vector.load %arg14[%c0_110, %c0_111] : memref<6x256xf32, #tpu.memory_space<vmem>>, vector<2x256xf32>
    %348 = tpu.concatenate %318, %343 in 1 : vector<2x32xf32>, vector<2x32xf32> -> vector<2x64xf32>
    %349 = arith.truncf %348 : vector<2x64xf32> to vector<2x64xbf16>
    %c0_112 = arith.constant 0 : index
    %c0_113 = arith.constant 0 : index
    %350 = vector.load %arg8[%c0_112, %c0_113] : memref<64x256xbf16, #tpu.memory_space<vmem>>, vector<64x256xbf16>
    %cst_114 = arith.constant dense<0.000000e+00> : vector<2x256xf32>
    %351 = tpu.matmul %349, %350, %cst_114 {dimension_numbers = #tpu.dot_dimension_numbers<[1], [0], [0], [1], [0, 0, 1, 1], [], []>} : vector<2x64xbf16>, vector<64x256xbf16>, vector<2x256xf32> -> vector<2x256xf32>
    %352 = vector.extract_strided_slice %346 {offsets = [0, 0], sizes = [2, 128], strides = [1, 1]} : vector<2x256xf32> to vector<2x128xf32>
    %353 = vector.extract_strided_slice %351 {offsets = [0, 0], sizes = [2, 128], strides = [1, 1]} : vector<2x256xf32> to vector<2x128xf32>
    %354 = arith.addf %352, %353 : vector<2x128xf32>
    %355 = vector.extract_strided_slice %347 {offsets = [0, 128], sizes = [2, 128], strides = [1, 1]} : vector<2x256xf32> to vector<2x128xf32>
    %356 = vector.extract_strided_slice %351 {offsets = [0, 128], sizes = [2, 128], strides = [1, 1]} : vector<2x256xf32> to vector<2x128xf32>
    %357 = arith.addf %355, %356 : vector<2x128xf32>
    %358 = vector.extract_strided_slice %354 {offsets = [0, 0], sizes = [2, 32], strides = [1, 1]} : vector<2x128xf32> to vector<2x32xf32>
    %359 = arith.negf %358 : vector<2x32xf32>
    %360 = math.exp %359 : vector<2x32xf32>
    %cst_115 = arith.constant 1.000000e+00 : f32
    %361 = vector.broadcast %cst_115 : f32 to vector<2x32xf32>
    %362 = arith.addf %361, %360 : vector<2x32xf32>
    %363 = arith.divf %361, %362 : vector<2x32xf32>
    %364 = vector.extract_strided_slice %354 {offsets = [0, 32], sizes = [2, 32], strides = [1, 1]} : vector<2x128xf32> to vector<2x32xf32>
    %365 = arith.negf %364 : vector<2x32xf32>
    %366 = math.exp %365 : vector<2x32xf32>
    %cst_116 = arith.constant 1.000000e+00 : f32
    %367 = vector.broadcast %cst_116 : f32 to vector<2x32xf32>
    %368 = arith.addf %367, %366 : vector<2x32xf32>
    %369 = arith.divf %367, %368 : vector<2x32xf32>
    %370 = vector.extract_strided_slice %354 {offsets = [0, 64], sizes = [2, 32], strides = [1, 1]} : vector<2x128xf32> to vector<2x32xf32>
    %371 = math.tanh %370 : vector<2x32xf32>
    %372 = vector.extract_strided_slice %354 {offsets = [0, 96], sizes = [2, 32], strides = [1, 1]} : vector<2x128xf32> to vector<2x32xf32>
    %373 = arith.negf %372 : vector<2x32xf32>
    %374 = math.exp %373 : vector<2x32xf32>
    %cst_117 = arith.constant 1.000000e+00 : f32
    %375 = vector.broadcast %cst_117 : f32 to vector<2x32xf32>
    %376 = arith.addf %375, %374 : vector<2x32xf32>
    %377 = arith.divf %375, %376 : vector<2x32xf32>
    %378 = arith.mulf %369, %316 : vector<2x32xf32>
    %379 = arith.mulf %363, %371 : vector<2x32xf32>
    %380 = arith.addf %378, %379 : vector<2x32xf32>
    %381 = math.tanh %380 : vector<2x32xf32>
    %382 = arith.mulf %377, %381 : vector<2x32xf32>
    %383 = vector.extract_strided_slice %357 {offsets = [0, 0], sizes = [2, 32], strides = [1, 1]} : vector<2x128xf32> to vector<2x32xf32>
    %384 = arith.negf %383 : vector<2x32xf32>
    %385 = math.exp %384 : vector<2x32xf32>
    %cst_118 = arith.constant 1.000000e+00 : f32
    %386 = vector.broadcast %cst_118 : f32 to vector<2x32xf32>
    %387 = arith.addf %386, %385 : vector<2x32xf32>
    %388 = arith.divf %386, %387 : vector<2x32xf32>
    %389 = vector.extract_strided_slice %357 {offsets = [0, 32], sizes = [2, 32], strides = [1, 1]} : vector<2x128xf32> to vector<2x32xf32>
    %390 = arith.negf %389 : vector<2x32xf32>
    %391 = math.exp %390 : vector<2x32xf32>
    %cst_119 = arith.constant 1.000000e+00 : f32
    %392 = vector.broadcast %cst_119 : f32 to vector<2x32xf32>
    %393 = arith.addf %392, %391 : vector<2x32xf32>
    %394 = arith.divf %392, %393 : vector<2x32xf32>
    %395 = vector.extract_strided_slice %357 {offsets = [0, 64], sizes = [2, 32], strides = [1, 1]} : vector<2x128xf32> to vector<2x32xf32>
    %396 = math.tanh %395 : vector<2x32xf32>
    %397 = vector.extract_strided_slice %357 {offsets = [0, 96], sizes = [2, 32], strides = [1, 1]} : vector<2x128xf32> to vector<2x32xf32>
    %398 = arith.negf %397 : vector<2x32xf32>
    %399 = math.exp %398 : vector<2x32xf32>
    %cst_120 = arith.constant 1.000000e+00 : f32
    %400 = vector.broadcast %cst_120 : f32 to vector<2x32xf32>
    %401 = arith.addf %400, %399 : vector<2x32xf32>
    %402 = arith.divf %400, %401 : vector<2x32xf32>
    %403 = arith.mulf %394, %341 : vector<2x32xf32>
    %404 = arith.mulf %388, %396 : vector<2x32xf32>
    %405 = arith.addf %403, %404 : vector<2x32xf32>
    %406 = math.tanh %405 : vector<2x32xf32>
    %407 = arith.mulf %402, %406 : vector<2x32xf32>
    %c4_121 = arith.constant 4 : index
    %c0_122 = arith.constant 0 : index
    %408 = vector.load %arg15[%c4_121, %c0_122] : memref<6x32xf32, #tpu.memory_space<vmem>>, vector<2x32xf32>
    tpu.vector_store %arg15[%c4_121, %c0_122], %382 {strides = array<i32>} : memref<6x32xf32, #tpu.memory_space<vmem>>, vector<2x32xf32>,
    %c0_123 = arith.constant 0 : index
    %c0_124 = arith.constant 0 : index
    %409 = vector.load %arg16[%c0_123, %c0_124] : memref<6x32xf32, #tpu.memory_space<vmem>>, vector<2x32xf32>
    tpu.vector_store %arg16[%c0_123, %c0_124], %407 {strides = array<i32>} : memref<6x32xf32, #tpu.memory_space<vmem>>, vector<2x32xf32>,
    %c0_125 = arith.constant 0 : index
    %c0_126 = arith.constant 0 : index
    %410 = vector.load %arg15[%c0_125, %c0_126] : memref<6x32xf32, #tpu.memory_space<vmem>>, vector<6x32xf32>
    %c0_127 = arith.constant 0 : index
    %c0_128 = arith.constant 0 : index
    %411 = vector.load %arg16[%c0_127, %c0_128] : memref<6x32xf32, #tpu.memory_space<vmem>>, vector<6x32xf32>
    %412 = tpu.concatenate %410, %411 in 1 : vector<6x32xf32>, vector<6x32xf32> -> vector<6x64xf32>
    %413 = arith.truncf %412 : vector<6x64xf32> to vector<6x64xbf16>
    %c0_129 = arith.constant 0 : index
    %c0_130 = arith.constant 0 : index
    %414 = vector.load %arg9[%c0_129, %c0_130] : memref<64x32xbf16, #tpu.memory_space<vmem>>, vector<64x32xbf16>
    %cst_131 = arith.constant dense<0.000000e+00> : vector<6x32xf32>
    %415 = tpu.matmul %413, %414, %cst_131 {dimension_numbers = #tpu.dot_dimension_numbers<[1], [0], [0], [1], [0, 0, 1, 1], [], []>} : vector<6x64xbf16>, vector<64x32xbf16>, vector<6x32xf32> -> vector<6x32xf32>
    %c0_132 = arith.constant 0 : index
    %c0_133 = arith.constant 0 : index
    %416 = vector.load %arg10[%c0_132, %c0_133] : memref<1x32xf32, #tpu.memory_space<vmem>>, vector<1x32xf32>
    %417 = vector.broadcast %416 : vector<1x32xf32> to vector<6x32xf32>
    %418 = arith.addf %415, %417 : vector<6x32xf32>
    %419 = arith.truncf %418 : vector<6x32xf32> to vector<6x32xbf16>
    %c0_134 = arith.constant 0 : index
    %c0_135 = arith.constant 0 : index
    %420 = vector.load %arg11[%c0_134, %c0_135] : memref<32x10xbf16, #tpu.memory_space<vmem>>, vector<32x10xbf16>
    %cst_136 = arith.constant dense<0.000000e+00> : vector<6x10xf32>
    %421 = tpu.matmul %419, %420, %cst_136 {dimension_numbers = #tpu.dot_dimension_numbers<[1], [0], [0], [1], [0, 0, 1, 1], [], []>} : vector<6x32xbf16>, vector<32x10xbf16>, vector<6x10xf32> -> vector<6x10xf32>
    %c0_137 = arith.constant 0 : index
    %c0_138 = arith.constant 0 : index
    %422 = vector.load %arg12[%c0_137, %c0_138] : memref<1x10xf32, #tpu.memory_space<vmem>>, vector<1x10xf32>
    %423 = vector.broadcast %422 : vector<1x10xf32> to vector<6x10xf32>
    %424 = arith.addf %421, %423 : vector<6x10xf32>
    %c0_139 = arith.constant 0 : index
    %c0_140 = arith.constant 0 : index
    %425 = vector.load %arg13[%c0_139, %c0_140] : memref<6x10xf32, #tpu.memory_space<vmem>>, vector<6x10xf32>
    tpu.vector_store %arg13[%c0_139, %c0_140], %424 {strides = array<i32>} : memref<6x10xf32, #tpu.memory_space<vmem>>, vector<6x10xf32>,
    return
  }
}

</mosaic_0001>

<bundles_post_ra>
// kernel: model_forward.8
= control target key start
LH: loop header
LB: loop body
LE: loop exit
PB: predicated region body
PF: predicated region fallthrough
CT: control target
= control target key end

     0   :  { %s750_s12 = smov 0   ;;  %s899_s0 = inlined_call_operand.vmem [shape: bf16[1024,9], index: 0, kind: input, shape index: {}]   ;;  %s900_s1 = inlined_call_operand.vmem [shape: bf16[9,8], index: 1, kind: input, shape index: {}]   ;;  %s901_s2 = inlined_call_operand.vmem [shape: f32[1,8], index: 2, kind: input, shape index: {}]   ;;  %s902_s3 = inlined_call_operand.vmem [shape: bf16[1024,8], index: 3, kind: output, shape index: {}]  }
   0x1 LB: > { %s596_s13 = sadd.s32 4294967295, %s727_s12   ;;  %p600_p0 = scmp.ge.s32.totalorder %s727_s12, 1  ;;  %s727_s12 = sphi %s750_s12, %s13_s12  }
   0x2   : > { %p138_p1 = scmp.lt.s32.totalorder %s727_s12, 5 }
   0x4   : > { %p139_p2 = pnand %p600_p0, %p138_p1 }
   0x5   : > { %s601_s18 = sshll.u32 (!%p139_p2), %s596_s13, 5 }
   0x6   : > { %142 = sbr.rel (%p139_p2) target bundleno = 217 (0xd9), region = 32  ;;  %p163_p3 = scmp.lt.s32.totalorder (!%p139_p2), %s601_s18, 127 }
   0xb   : > { %v671_v0 = vld [vmem:[%s900_s1] sm:$0xf]  ;;  %v707_v1 = vld [vmem:[%s900_s1] sm:$0x10]  ;;  %vm347_vm0 = vcmask 1043456   ;;  %vm348_vm1 = vcmask 1044480  }
   0xc   : > { %v672_v2 = vor.u32 %v707_v1, %v671_v0  ;;  %v729_v3 = vmov 65535   ;;  %s904_s18 = smov (!%p163_p3, %s601_s18), 127  ;;  %vm298_vm2 = vcmask 72704   ;;  %v791_v23 = vld [vmem:[%s901_s2] ss:$0 sm:$0xff]  ;;  %vm507_vm3 = vcmask 60416  }
   0xd   : > { %v349_v4 = vsel %vm347_vm0, 4294967295, %v729_v3  ;;  %s602_s19 = sshll.u32 %s904_s18, 2 }
   0xe   : > { %v350_v5 = vsel %vm348_vm1, %v349_v4, 0  ;;  %s166_s22 = scalar_lea.vmem %s899_s0, %s602_s19  ;;  %s800_s27 = scalar_lea.vmem %s902_s3, %s602_s19 }
   0xf   : > { %v352_v6 = vand.u32 %v672_v2, %v350_v5  ;;  %v691_v7 = vld [vmem:[%s166_s22] sm:$0xff]  ;;  %v692_v11 = vld [vmem:[%s166_s22 + $0x8] sm:$0xff]  ;;  %v693_v15 = vld [vmem:[%s166_s22 + $0x10] sm:$0xff] }
  0x10   : > { %v695_v8 = vld [vmem:[%s166_s22 + $0x20] sm:$0xff]  ;;  %v696_v12 = vld [vmem:[%s166_s22 + $0x28] sm:$0xff]  ;;  %v697_v16 = vld [vmem:[%s166_s22 + $0x30] sm:$0xff] }
  0x11   : > { %361 = vmatpush.bf16.msra.mxu0 %v352_v6  ;;  %708 = vmatpush.bf16.msra.mxu1 %v352_v6  ;;  %v699_v9 = vld [vmem:[%s166_s22 + $0x40] sm:$0xff]  ;;  %v700_v13 = vld [vmem:[%s166_s22 + $0x48] sm:$0xff]  ;;  %v701_v17 = vld [vmem:[%s166_s22 + $0x50] sm:$0xff] }
  0x12   : > { %709 = vmatpush.bf16.msra.mxu2 %v352_v6  ;;  %710 = vmatpush.bf16.msra.mxu3 %v352_v6  ;;  %v703_v10 = vld [vmem:[%s166_s22 + $0x60] sm:$0xff]  ;;  %v704_v14 = vld [vmem:[%s166_s22 + $0x68] sm:$0xff]  ;;  %v705_v18 = vld [vmem:[%s166_s22 + $0x70] sm:$0xff] }
  0x13   : > { %v694_v19 = vld [vmem:[%s166_s22 + $0x18] sm:$0xff] }
  0x14   : > { %673 = vmatmul.msk.bf16.vlgmr.msra.gmra.mxu0 %vm298_vm2, %v691_v7  ;;  %677 = vmatmul.msk.bf16.vlgmr.msra.gmra.mxu1 %vm298_vm2, %v695_v8  ;;  %v698_v20 = vld [vmem:[%s166_s22 + $0x38] sm:$0xff] }
  0x15   : > { %681 = vmatmul.msk.bf16.vlgmr.msra.gmra.mxu2 %vm298_vm2, %v699_v9  ;;  %685 = vmatmul.msk.bf16.vlgmr.msra.gmra.mxu3 %vm298_vm2, %v703_v10  ;;  %v702_v21 = vld [vmem:[%s166_s22 + $0x58] sm:$0xff] }
  0x16   : > { %v706_v22 = vld [vmem:[%s166_s22 + $0x78] sm:$0xff] }
  0x24   : > { %674 = vmatmul.msk.bf16.gmra.mxu0 %vm298_vm2, %v692_v11  ;;  %678 = vmatmul.msk.bf16.gmra.mxu1 %vm298_vm2, %v696_v12 }
  0x25   : > { %682 = vmatmul.msk.bf16.gmra.mxu2 %vm298_vm2, %v700_v13  ;;  %686 = vmatmul.msk.bf16.gmra.mxu3 %vm298_vm2, %v704_v14 }
  0x34   : > { %675 = vmatmul.msk.bf16.gmra.mxu0 %vm298_vm2, %v693_v15  ;;  %679 = vmatmul.msk.bf16.gmra.mxu1 %vm298_vm2, %v697_v16 }
  0x35   : > { %683 = vmatmul.msk.bf16.gmra.mxu2 %vm298_vm2, %v701_v17  ;;  %687 = vmatmul.msk.bf16.gmra.mxu3 %vm298_vm2, %v705_v18 }
  0x44   : > { %676 = vmatmul.msk.bf16.gmra.mxu0 %vm298_vm2, %v694_v19  ;;  %680 = vmatmul.msk.bf16.gmra.mxu1 %vm298_vm2, %v698_v20 }
  0x45   : > { %684 = vmatmul.msk.bf16.gmra.mxu2 %vm298_vm2, %v702_v21  ;;  %688 = vmatmul.msk.bf16.gmra.mxu3 %vm298_vm2, %v706_v22 }
  0x91   : > { %v363_v24 = vpop.f32.mrf.mxu0  ;;  %v383_v25 = vpop.f32.mrf.mxu1 }
  0x92   : > { %v364_v26 = vadd.f32 %v791_v23, %v363_v24  ;;  %v384_v27 = vadd.f32 %v791_v23, %v383_v25 }
  0x94   : > { %v443_v28 = vmax.f32 %v364_v26, 0.0  ;;  %v451_v29 = vmax.f32 %v384_v27, 0.0 }
  0x96   : > { %v475_v30 = vpack.c.bf16 %v443_v28, %v443_v28  ;;  %v483_v31 = vpack.c.bf16 %v451_v29, %v451_v29 }
  0x98   : > { %508 = vst.msk [vmem:[%s800_s27] sm:$0xf] %vm507_vm3, %v475_v30  ;;  %v403_v32 = vpop.f32.mrf.mxu2  ;;  %v423_v33 = vpop.f32.mrf.mxu3 }
  0x99   : > { %516 = vst.msk [vmem:[%s800_s27 + $0x20] sm:$0xf] %vm507_vm3, %v483_v31  ;;  %v404_v34 = vadd.f32 %v791_v23, %v403_v32  ;;  %v424_v35 = vadd.f32 %v791_v23, %v423_v33  ;;  %v365_v36 = vpop.f32.mrf.mxu0  ;;  %v385_v37 = vpop.f32.mrf.mxu1 }
  0x9a   : > { %v366_v38 = vadd.f32 %v791_v23, %v365_v36  ;;  %v386_v39 = vadd.f32 %v791_v23, %v385_v37 }
  0x9b   : > { %v459_v40 = vmax.f32 %v404_v34, 0.0  ;;  %v467_v41 = vmax.f32 %v424_v35, 0.0 }
  0x9c   : > { %v444_v42 = vmax.f32 %v366_v38, 0.0  ;;  %v452_v43 = vmax.f32 %v386_v39, 0.0 }
  0x9d   : > { %v491_v44 = vpack.c.bf16 %v459_v40, %v459_v40  ;;  %v499_v45 = vpack.c.bf16 %v467_v41, %v467_v41 }
  0x9e   : > { %v476_v46 = vpack.c.bf16 %v444_v42, %v444_v42  ;;  %v484_v47 = vpack.c.bf16 %v452_v43, %v452_v43 }
  0x9f   : > { %524 = vst.msk [vmem:[%s800_s27 + $0x40] sm:$0xf] %vm507_vm3, %v491_v44 }
  0xa0   : > { %532 = vst.msk [vmem:[%s800_s27 + $0x60] sm:$0xf] %vm507_vm3, %v499_v45  ;;  %v405_v48 = vpop.f32.mrf.mxu2  ;;  %v425_v49 = vpop.f32.mrf.mxu3 }
  0xa1   : > { %509 = vst.msk [vmem:[%s800_s27 + $0x4] sm:$0xf] %vm507_vm3, %v476_v46  ;;  %v406_v50 = vadd.f32 %v791_v23, %v405_v48  ;;  %v426_v51 = vadd.f32 %v791_v23, %v425_v49  ;;  %v368_v52 = vpop.f32.mrf.mxu0  ;;  %v388_v53 = vpop.f32.mrf.mxu1 }
  0xa2   : > { %517 = vst.msk [vmem:[%s800_s27 + $0x24] sm:$0xf] %vm507_vm3, %v484_v47  ;;  %v369_v54 = vadd.f32 %v791_v23, %v368_v52  ;;  %v389_v55 = vadd.f32 %v791_v23, %v388_v53 }
  0xa3   : > { %v460_v56 = vmax.f32 %v406_v50, 0.0  ;;  %v468_v57 = vmax.f32 %v426_v51, 0.0 }
  0xa4   : > { %v445_v58 = vmax.f32 %v369_v54, 0.0  ;;  %v453_v59 = vmax.f32 %v389_v55, 0.0 }
  0xa5   : > { %v492_v60 = vpack.c.bf16 %v460_v56, %v460_v56  ;;  %v500_v61 = vpack.c.bf16 %v468_v57, %v468_v57 }
  0xa6   : > { %v477_v62 = vpack.c.bf16 %v445_v58, %v445_v58  ;;  %v485_v63 = vpack.c.bf16 %v453_v59, %v453_v59 }
  0xa7   : > { %525 = vst.msk [vmem:[%s800_s27 + $0x44] sm:$0xf] %vm507_vm3, %v492_v60 }
  0xa8   : > { %533 = vst.msk [vmem:[%s800_s27 + $0x64] sm:$0xf] %vm507_vm3, %v500_v61  ;;  %v408_v0 = vpop.f32.mrf.mxu2  ;;  %v428_v1 = vpop.f32.mrf.mxu3 }
  0xa9   : > { %510 = vst.msk [vmem:[%s800_s27 + $0x8] sm:$0xf] %vm507_vm3, %v477_v62  ;;  %v409_v2 = vadd.f32 %v791_v23, %v408_v0  ;;  %v429_v3 = vadd.f32 %v791_v23, %v428_v1  ;;  %v370_v4 = vpop.f32.mrf.mxu0  ;;  %v390_v5 = vpop.f32.mrf.mxu1 }
  0xaa   : > { %518 = vst.msk [vmem:[%s800_s27 + $0x28] sm:$0xf] %vm507_vm3, %v485_v63  ;;  %v371_v6 = vadd.f32 %v791_v23, %v370_v4  ;;  %v391_v7 = vadd.f32 %v791_v23, %v390_v5 }
  0xab   : > { %v461_v8 = vmax.f32 %v409_v2, 0.0  ;;  %v469_v9 = vmax.f32 %v429_v3, 0.0 }
  0xac   : > { %v446_v10 = vmax.f32 %v371_v6, 0.0  ;;  %v454_v11 = vmax.f32 %v391_v7, 0.0 }
  0xad   : > { %v493_v12 = vpack.c.bf16 %v461_v8, %v461_v8  ;;  %v501_v13 = vpack.c.bf16 %v469_v9, %v469_v9 }
  0xae   : > { %v478_v14 = vpack.c.bf16 %v446_v10, %v446_v10  ;;  %v486_v15 = vpack.c.bf16 %v454_v11, %v454_v11 }
  0xaf   : > { %526 = vst.msk [vmem:[%s800_s27 + $0x48] sm:$0xf] %vm507_vm3, %v493_v12 }
  0xb0   : > { %534 = vst.msk [vmem:[%s800_s27 + $0x68] sm:$0xf] %vm507_vm3, %v501_v13  ;;  %v410_v16 = vpop.f32.mrf.mxu2  ;;  %v430_v17 = vpop.f32.mrf.mxu3 }
  0xb1   : > { %511 = vst.msk [vmem:[%s800_s27 + $0xc] sm:$0xf] %vm507_vm3, %v478_v14  ;;  %v411_v18 = vadd.f32 %v791_v23, %v410_v16  ;;  %v431_v19 = vadd.f32 %v791_v23, %v430_v17  ;;  %v373_v20 = vpop.f32.mrf.mxu0  ;;  %v393_v21 = vpop.f32.mrf.mxu1 }
  0xb2   : > { %519 = vst.msk [vmem:[%s800_s27 + $0x2c] sm:$0xf] %vm507_vm3, %v486_v15  ;;  %v374_v22 = vadd.f32 %v791_v23, %v373_v20  ;;  %v394_v24 = vadd.f32 %v791_v23, %v393_v21 }
  0xb3   : > { %v462_v25 = vmax.f32 %v411_v18, 0.0  ;;  %v470_v26 = vmax.f32 %v431_v19, 0.0 }
  0xb4   : > { %v447_v27 = vmax.f32 %v374_v22, 0.0  ;;  %v455_v28 = vmax.f32 %v394_v24, 0.0 }
  0xb5   : > { %v494_v29 = vpack.c.bf16 %v462_v25, %v462_v25  ;;  %v502_v30 = vpack.c.bf16 %v470_v26, %v470_v26 }
  0xb6   : > { %v479_v31 = vpack.c.bf16 %v447_v27, %v447_v27  ;;  %v487_v32 = vpack.c.bf16 %v455_v28, %v455_v28 }
  0xb7   : > { %527 = vst.msk [vmem:[%s800_s27 + $0x4c] sm:$0xf] %vm507_vm3, %v494_v29 }
  0xb8   : > { %535 = vst.msk [vmem:[%s800_s27 + $0x6c] sm:$0xf] %vm507_vm3, %v502_v30  ;;  %v413_v33 = vpop.f32.mrf.mxu2  ;;  %v433_v34 = vpop.f32.mrf.mxu3 }
  0xb9   : > { %512 = vst.msk [vmem:[%s800_s27 + $0x10] sm:$0xf] %vm507_vm3, %v479_v31  ;;  %v414_v35 = vadd.f32 %v791_v23, %v413_v33  ;;  %v434_v36 = vadd.f32 %v791_v23, %v433_v34  ;;  %v375_v37 = vpop.f32.mrf.mxu0  ;;  %v395_v38 = vpop.f32.mrf.mxu1 }
  0xba   : > { %520 = vst.msk [vmem:[%s800_s27 + $0x30] sm:$0xf] %vm507_vm3, %v487_v32  ;;  %v376_v39 = vadd.f32 %v791_v23, %v375_v37  ;;  %v396_v40 = vadd.f32 %v791_v23, %v395_v38 }
  0xbb   : > { %v463_v41 = vmax.f32 %v414_v35, 0.0  ;;  %v471_v42 = vmax.f32 %v434_v36, 0.0 }
  0xbc   : > { %v448_v43 = vmax.f32 %v376_v39, 0.0  ;;  %v456_v44 = vmax.f32 %v396_v40, 0.0 }
  0xbd   : > { %v495_v45 = vpack.c.bf16 %v463_v41, %v463_v41  ;;  %v503_v46 = vpack.c.bf16 %v471_v42, %v471_v42 }
  0xbe   : > { %v480_v47 = vpack.c.bf16 %v448_v43, %v448_v43  ;;  %v488_v48 = vpack.c.bf16 %v456_v44, %v456_v44 }
  0xbf   : > { %528 = vst.msk [vmem:[%s800_s27 + $0x50] sm:$0xf] %vm507_vm3, %v495_v45 }
  0xc0   : > { %536 = vst.msk [vmem:[%s800_s27 + $0x70] sm:$0xf] %vm507_vm3, %v503_v46  ;;  %v415_v49 = vpop.f32.mrf.mxu2  ;;  %v435_v50 = vpop.f32.mrf.mxu3 }
  0xc1   : > { %513 = vst.msk [vmem:[%s800_s27 + $0x14] sm:$0xf] %vm507_vm3, %v480_v47  ;;  %v416_v51 = vadd.f32 %v791_v23, %v415_v49  ;;  %v436_v52 = vadd.f32 %v791_v23, %v435_v50  ;;  %v378_v53 = vpop.f32.mrf.mxu0  ;;  %v398_v54 = vpop.f32.mrf.mxu1 }
  0xc2   : > { %521 = vst.msk [vmem:[%s800_s27 + $0x34] sm:$0xf] %vm507_vm3, %v488_v48  ;;  %v379_v55 = vadd.f32 %v791_v23, %v378_v53  ;;  %v399_v56 = vadd.f32 %v791_v23, %v398_v54 }
  0xc3   : > { %v464_v57 = vmax.f32 %v416_v51, 0.0  ;;  %v472_v58 = vmax.f32 %v436_v52, 0.0 }
  0xc4   : > { %v449_v59 = vmax.f32 %v379_v55, 0.0  ;;  %v457_v60 = vmax.f32 %v399_v56, 0.0 }
  0xc5   : > { %v496_v61 = vpack.c.bf16 %v464_v57, %v464_v57  ;;  %v504_v62 = vpack.c.bf16 %v472_v58, %v472_v58 }
  0xc6   : > { %v481_v63 = vpack.c.bf16 %v449_v59, %v449_v59  ;;  %v489_v0 = vpack.c.bf16 %v457_v60, %v457_v60 }
  0xc7   : > { %529 = vst.msk [vmem:[%s800_s27 + $0x54] sm:$0xf] %vm507_vm3, %v496_v61 }
  0xc8   : > { %537 = vst.msk [vmem:[%s800_s27 + $0x74] sm:$0xf] %vm507_vm3, %v504_v62  ;;  %v418_v1 = vpop.f32.mrf.mxu2  ;;  %v438_v2 = vpop.f32.mrf.mxu3 }
  0xc9   : > { %514 = vst.msk [vmem:[%s800_s27 + $0x18] sm:$0xf] %vm507_vm3, %v481_v63  ;;  %v419_v3 = vadd.f32 %v791_v23, %v418_v1  ;;  %v439_v4 = vadd.f32 %v791_v23, %v438_v2  ;;  %v380_v5 = vpop.f32.mrf.mxu0  ;;  %v400_v6 = vpop.f32.mrf.mxu1 }
  0xca   : > { %522 = vst.msk [vmem:[%s800_s27 + $0x38] sm:$0xf] %vm507_vm3, %v489_v0  ;;  %v381_v7 = vadd.f32 %v791_v23, %v380_v5  ;;  %v401_v8 = vadd.f32 %v791_v23, %v400_v6 }
  0xcb   : > { %v465_v9 = vmax.f32 %v419_v3, 0.0  ;;  %v473_v10 = vmax.f32 %v439_v4, 0.0 }
  0xcc   : > { %v450_v11 = vmax.f32 %v381_v7, 0.0  ;;  %v458_v12 = vmax.f32 %v401_v8, 0.0 }
  0xcd   : > { %v497_v13 = vpack.c.bf16 %v465_v9, %v465_v9  ;;  %v505_v14 = vpack.c.bf16 %v473_v10, %v473_v10 }
  0xce   : > { %v482_v15 = vpack.c.bf16 %v450_v11, %v450_v11  ;;  %v490_v16 = vpack.c.bf16 %v458_v12, %v458_v12 }
  0xcf   : > { %530 = vst.msk [vmem:[%s800_s27 + $0x58] sm:$0xf] %vm507_vm3, %v497_v13 }
  0xd0   : > { %538 = vst.msk [vmem:[%s800_s27 + $0x78] sm:$0xf] %vm507_vm3, %v505_v14  ;;  %v420_v17 = vpop.f32.mrf.mxu2  ;;  %v440_v18 = vpop.f32.mrf.mxu3 }
  0xd1   : > { %515 = vst.msk [vmem:[%s800_s27 + $0x1c] sm:$0xf] %vm507_vm3, %v482_v15  ;;  %v421_v19 = vadd.f32 %v791_v23, %v420_v17  ;;  %v441_v20 = vadd.f32 %v791_v23, %v440_v18 }
  0xd2   : > { %523 = vst.msk [vmem:[%s800_s27 + $0x3c] sm:$0xf] %vm507_vm3, %v490_v16 }
  0xd3   : > { %v466_v21 = vmax.f32 %v421_v19, 0.0  ;;  %v474_v22 = vmax.f32 %v441_v20, 0.0 }
  0xd5   : > { %v498_v24 = vpack.c.bf16 %v466_v21, %v466_v21  ;;  %v506_v25 = vpack.c.bf16 %v474_v22, %v474_v22 }
  0xd7   : > { %531 = vst.msk [vmem:[%s800_s27 + $0x5c] sm:$0xf] %vm507_vm3, %v498_v24 }
  0xd8   : > { %539 = vst.msk [vmem:[%s800_s27 + $0x7c] sm:$0xf] %vm507_vm3, %v506_v25 }
  0xd9 PF: > { %s13_s12 = sadd.s32 1, %s727_s12  }
  0xda   : > { %p10_p4 = scmp.ge.s32.totalorder %s13_s12, 6  }
  0xdc   :  { %12 = sbr.rel (!%p10_p4) target bundleno = 1 (0x1), region = 62 }

// kernel: model_forward.9
= control target key start
LH: loop header
LB: loop body
LE: loop exit
PB: predicated region body
PF: predicated region fallthrough
CT: control target
= control target key end

     0   :  { %vm216_vm0 = vcmask 1043456   ;;  %vm167_vm1 = vcmask 588800   ;;  %vm373_vm2 = vcmask 125952   ;;  %s806_s1 = inlined_call_operand.vmem [shape: bf16[72,16], index: 1, kind: input, shape index: {}]   ;;  %s807_s2 = inlined_call_operand.vmem [shape: f32[1,16], index: 2, kind: input, shape index: {}]   ;;  %s808_s0 = inlined_call_operand.vmem [shape: bf16[256,72], index: 0, kind: input, shape index: {}]   ;;  %s809_s3 = inlined_call_operand.vmem [shape: bf16[256,16], index: 3, kind: output, shape index: {}]  }
   0x1   :  { %v55_v0 = vld [vmem:[%s806_s1 + $0x20] sm:$0xf]  ;;  %v525_v4 = vld [vmem:[%s806_s1 + $0x18] sm:$0xff]  ;;  %v524_v5 = vld [vmem:[%s806_s1 + $0x10] sm:$0xff] }
   0x2   :  { %v157_v1 = vunpack.c.l.b16 %v55_v0  ;;  %v523_v6 = vld [vmem:[%s806_s1 + $0x8] sm:$0xff]  ;;  %v522_v7 = vld [vmem:[%s806_s1] sm:$0xff]  ;;  %v508_v16 = vld [vmem:[%s808_s0 + $0x10] sm:$0xff] }
   0x3   :  { %v506_v8 = vld [vmem:[%s808_s0] sm:$0xff]  ;;  %v507_v12 = vld [vmem:[%s808_s0 + $0x8] sm:$0xff]  ;;  %v512_v17 = vld [vmem:[%s808_s0 + $0x30] sm:$0xff] }
   0x4   :  { %v162_v2 = vpack.c.b16 %v157_v1, %v157_v1  ;;  %v510_v9 = vld [vmem:[%s808_s0 + $0x20] sm:$0xff]  ;;  %v511_v13 = vld [vmem:[%s808_s0 + $0x28] sm:$0xff]  ;;  %v516_v18 = vld [vmem:[%s808_s0 + $0x50] sm:$0xff] }
   0x5   :  { %v514_v10 = vld [vmem:[%s808_s0 + $0x40] sm:$0xff]  ;;  %v515_v14 = vld [vmem:[%s808_s0 + $0x48] sm:$0xff]  ;;  %v520_v19 = vld [vmem:[%s808_s0 + $0x70] sm:$0xff] }
   0x6   :  { %v218_v3 = vsel %vm216_vm0, %v162_v2, 0  ;;  %v518_v11 = vld [vmem:[%s808_s0 + $0x60] sm:$0xff]  ;;  %v519_v15 = vld [vmem:[%s808_s0 + $0x68] sm:$0xff]  ;;  %v509_v20 = vld [vmem:[%s808_s0 + $0x18] sm:$0xff] }
   0x7   :  { %223 = vmatpush.bf16.msra.mxu0 %v218_v3  ;;  %526 = vmatpush.bf16.msra.mxu1 %v218_v3  ;;  %v513_v21 = vld [vmem:[%s808_s0 + $0x38] sm:$0xff]  ;;  %v644_v24 = vld [vmem:[%s807_s2] ss:$0 sm:$0xff] }
   0x8   :  { %527 = vmatpush.bf16.msra.mxu2 %v218_v3  ;;  %528 = vmatpush.bf16.msra.mxu3 %v218_v3  ;;  %v517_v22 = vld [vmem:[%s808_s0 + $0x58] sm:$0xff] }
   0x9   :  { %v521_v23 = vld [vmem:[%s808_s0 + $0x78] sm:$0xff] }
   0xb   :  { %224 = vmatpush.bf16.msra.mxu0 %v525_v4  ;;  %529 = vmatpush.bf16.msra.mxu1 %v525_v4 }
   0xc   :  { %530 = vmatpush.bf16.msra.mxu2 %v525_v4  ;;  %531 = vmatpush.bf16.msra.mxu3 %v525_v4 }
   0xf   :  { %225 = vmatpush.bf16.msra.mxu0 %v524_v5  ;;  %532 = vmatpush.bf16.msra.mxu1 %v524_v5 }
  0x10   :  { %533 = vmatpush.bf16.msra.mxu2 %v524_v5  ;;  %534 = vmatpush.bf16.msra.mxu3 %v524_v5 }
  0x13   :  { %226 = vmatpush.bf16.msra.mxu0 %v523_v6  ;;  %535 = vmatpush.bf16.msra.mxu1 %v523_v6 }
  0x14   :  { %536 = vmatpush.bf16.msra.mxu2 %v523_v6  ;;  %537 = vmatpush.bf16.msra.mxu3 %v523_v6 }
  0x17   :  { %227 = vmatpush.bf16.msra.mxu0 %v522_v7  ;;  %538 = vmatpush.bf16.msra.mxu1 %v522_v7 }
  0x18   :  { %539 = vmatpush.bf16.msra.mxu2 %v522_v7  ;;  %540 = vmatpush.bf16.msra.mxu3 %v522_v7 }
  0x1a   :  { %490 = vmatmul.msk.bf16.vlgmr.msra.gmra.mxu0 %vm167_vm1, %v506_v8  ;;  %494 = vmatmul.msk.bf16.vlgmr.msra.gmra.mxu1 %vm167_vm1, %v510_v9 }
  0x1b   :  { %498 = vmatmul.msk.bf16.vlgmr.msra.gmra.mxu2 %vm167_vm1, %v514_v10  ;;  %502 = vmatmul.msk.bf16.vlgmr.msra.gmra.mxu3 %vm167_vm1, %v518_v11 }
  0x2a   :  { %491 = vmatmul.msk.bf16.gmra.mxu0 %vm167_vm1, %v507_v12  ;;  %495 = vmatmul.msk.bf16.gmra.mxu1 %vm167_vm1, %v511_v13 }
  0x2b   :  { %499 = vmatmul.msk.bf16.gmra.mxu2 %vm167_vm1, %v515_v14  ;;  %503 = vmatmul.msk.bf16.gmra.mxu3 %vm167_vm1, %v519_v15 }
  0x3a   :  { %492 = vmatmul.msk.bf16.gmra.mxu0 %vm167_vm1, %v508_v16  ;;  %496 = vmatmul.msk.bf16.gmra.mxu1 %vm167_vm1, %v512_v17 }
  0x3b   :  { %500 = vmatmul.msk.bf16.gmra.mxu2 %vm167_vm1, %v516_v18  ;;  %504 = vmatmul.msk.bf16.gmra.mxu3 %vm167_vm1, %v520_v19 }
  0x4a   :  { %493 = vmatmul.msk.bf16.gmra.mxu0 %vm167_vm1, %v509_v20  ;;  %497 = vmatmul.msk.bf16.gmra.mxu1 %vm167_vm1, %v513_v21 }
  0x4b   :  { %501 = vmatmul.msk.bf16.gmra.mxu2 %vm167_vm1, %v517_v22  ;;  %505 = vmatmul.msk.bf16.gmra.mxu3 %vm167_vm1, %v521_v23 }
  0x97   :  { %v229_v25 = vpop.f32.mrf.mxu0  ;;  %v249_v26 = vpop.f32.mrf.mxu1 }
  0x98   :  { %v230_v27 = vadd.f32 %v644_v24, %v229_v25  ;;  %v250_v28 = vadd.f32 %v644_v24, %v249_v26 }
  0x9a   :  { %v309_v29 = vmax.f32 %v230_v27, 0.0  ;;  %v317_v30 = vmax.f32 %v250_v28, 0.0 }
  0x9c   :  { %v341_v31 = vpack.c.bf16 %v309_v29, %v309_v29  ;;  %v349_v32 = vpack.c.bf16 %v317_v30, %v317_v30 }
  0x9e   :  { %374 = vst.msk [vmem:[%s809_s3] sm:$0xf] %vm373_vm2, %v341_v31  ;;  %v269_v33 = vpop.f32.mrf.mxu2  ;;  %v289_v34 = vpop.f32.mrf.mxu3 }
  0x9f   :  { %382 = vst.msk [vmem:[%s809_s3 + $0x20] sm:$0xf] %vm373_vm2, %v349_v32  ;;  %v270_v35 = vadd.f32 %v644_v24, %v269_v33  ;;  %v290_v36 = vadd.f32 %v644_v24, %v289_v34  ;;  %v231_v37 = vpop.f32.mrf.mxu0  ;;  %v251_v38 = vpop.f32.mrf.mxu1 }
  0xa0   :  { %v232_v39 = vadd.f32 %v644_v24, %v231_v37  ;;  %v252_v40 = vadd.f32 %v644_v24, %v251_v38 }
  0xa1   :  { %v325_v41 = vmax.f32 %v270_v35, 0.0  ;;  %v333_v42 = vmax.f32 %v290_v36, 0.0 }
  0xa2   :  { %v310_v43 = vmax.f32 %v232_v39, 0.0  ;;  %v318_v44 = vmax.f32 %v252_v40, 0.0 }
  0xa3   :  { %v357_v45 = vpack.c.bf16 %v325_v41, %v325_v41  ;;  %v365_v46 = vpack.c.bf16 %v333_v42, %v333_v42 }
  0xa4   :  { %v342_v47 = vpack.c.bf16 %v310_v43, %v310_v43  ;;  %v350_v48 = vpack.c.bf16 %v318_v44, %v318_v44 }
  0xa5   :  { %390 = vst.msk [vmem:[%s809_s3 + $0x40] sm:$0xf] %vm373_vm2, %v357_v45 }
  0xa6   :  { %398 = vst.msk [vmem:[%s809_s3 + $0x60] sm:$0xf] %vm373_vm2, %v365_v46  ;;  %v271_v49 = vpop.f32.mrf.mxu2  ;;  %v291_v50 = vpop.f32.mrf.mxu3 }
  0xa7   :  { %375 = vst.msk [vmem:[%s809_s3 + $0x4] sm:$0xf] %vm373_vm2, %v342_v47  ;;  %v272_v51 = vadd.f32 %v644_v24, %v271_v49  ;;  %v292_v52 = vadd.f32 %v644_v24, %v291_v50  ;;  %v234_v53 = vpop.f32.mrf.mxu0  ;;  %v254_v54 = vpop.f32.mrf.mxu1 }
  0xa8   :  { %383 = vst.msk [vmem:[%s809_s3 + $0x24] sm:$0xf] %vm373_vm2, %v350_v48  ;;  %v235_v55 = vadd.f32 %v644_v24, %v234_v53  ;;  %v255_v56 = vadd.f32 %v644_v24, %v254_v54 }
  0xa9   :  { %v326_v57 = vmax.f32 %v272_v51, 0.0  ;;  %v334_v58 = vmax.f32 %v292_v52, 0.0 }
  0xaa   :  { %v311_v59 = vmax.f32 %v235_v55, 0.0  ;;  %v319_v60 = vmax.f32 %v255_v56, 0.0 }
  0xab   :  { %v358_v61 = vpack.c.bf16 %v326_v57, %v326_v57  ;;  %v366_v62 = vpack.c.bf16 %v334_v58, %v334_v58 }
  0xac   :  { %v343_v63 = vpack.c.bf16 %v311_v59, %v311_v59  ;;  %v351_v0 = vpack.c.bf16 %v319_v60, %v319_v60 }
  0xad   :  { %391 = vst.msk [vmem:[%s809_s3 + $0x44] sm:$0xf] %vm373_vm2, %v358_v61 }
  0xae   :  { %399 = vst.msk [vmem:[%s809_s3 + $0x64] sm:$0xf] %vm373_vm2, %v366_v62  ;;  %v274_v1 = vpop.f32.mrf.mxu2  ;;  %v294_v2 = vpop.f32.mrf.mxu3 }
  0xaf   :  { %376 = vst.msk [vmem:[%s809_s3 + $0x8] sm:$0xf] %vm373_vm2, %v343_v63  ;;  %v275_v3 = vadd.f32 %v644_v24, %v274_v1  ;;  %v295_v4 = vadd.f32 %v644_v24, %v294_v2  ;;  %v236_v5 = vpop.f32.mrf.mxu0  ;;  %v256_v6 = vpop.f32.mrf.mxu1 }
  0xb0   :  { %384 = vst.msk [vmem:[%s809_s3 + $0x28] sm:$0xf] %vm373_vm2, %v351_v0  ;;  %v237_v7 = vadd.f32 %v644_v24, %v236_v5  ;;  %v257_v8 = vadd.f32 %v644_v24, %v256_v6 }
  0xb1   :  { %v327_v9 = vmax.f32 %v275_v3, 0.0  ;;  %v335_v10 = vmax.f32 %v295_v4, 0.0 }
  0xb2   :  { %v312_v11 = vmax.f32 %v237_v7, 0.0  ;;  %v320_v12 = vmax.f32 %v257_v8, 0.0 }
  0xb3   :  { %v359_v13 = vpack.c.bf16 %v327_v9, %v327_v9  ;;  %v367_v14 = vpack.c.bf16 %v335_v10, %v335_v10 }
  0xb4   :  { %v344_v15 = vpack.c.bf16 %v312_v11, %v312_v11  ;;  %v352_v16 = vpack.c.bf16 %v320_v12, %v320_v12 }
  0xb5   :  { %392 = vst.msk [vmem:[%s809_s3 + $0x48] sm:$0xf] %vm373_vm2, %v359_v13 }
  0xb6   :  { %400 = vst.msk [vmem:[%s809_s3 + $0x68] sm:$0xf] %vm373_vm2, %v367_v14  ;;  %v276_v17 = vpop.f32.mrf.mxu2  ;;  %v296_v18 = vpop.f32.mrf.mxu3 }
  0xb7   :  { %377 = vst.msk [vmem:[%s809_s3 + $0xc] sm:$0xf] %vm373_vm2, %v344_v15  ;;  %v277_v19 = vadd.f32 %v644_v24, %v276_v17  ;;  %v297_v20 = vadd.f32 %v644_v24, %v296_v18  ;;  %v239_v21 = vpop.f32.mrf.mxu0  ;;  %v259_v22 = vpop.f32.mrf.mxu1 }
  0xb8   :  { %385 = vst.msk [vmem:[%s809_s3 + $0x2c] sm:$0xf] %vm373_vm2, %v352_v16  ;;  %v240_v23 = vadd.f32 %v644_v24, %v239_v21  ;;  %v260_v25 = vadd.f32 %v644_v24, %v259_v22 }
  0xb9   :  { %v328_v26 = vmax.f32 %v277_v19, 0.0  ;;  %v336_v27 = vmax.f32 %v297_v20, 0.0 }
  0xba   :  { %v313_v28 = vmax.f32 %v240_v23, 0.0  ;;  %v321_v29 = vmax.f32 %v260_v25, 0.0 }
  0xbb   :  { %v360_v30 = vpack.c.bf16 %v328_v26, %v328_v26  ;;  %v368_v31 = vpack.c.bf16 %v336_v27, %v336_v27 }
  0xbc   :  { %v345_v32 = vpack.c.bf16 %v313_v28, %v313_v28  ;;  %v353_v33 = vpack.c.bf16 %v321_v29, %v321_v29 }
  0xbd   :  { %393 = vst.msk [vmem:[%s809_s3 + $0x4c] sm:$0xf] %vm373_vm2, %v360_v30 }
  0xbe   :  { %401 = vst.msk [vmem:[%s809_s3 + $0x6c] sm:$0xf] %vm373_vm2, %v368_v31  ;;  %v279_v34 = vpop.f32.mrf.mxu2  ;;  %v299_v35 = vpop.f32.mrf.mxu3 }
  0xbf   :  { %378 = vst.msk [vmem:[%s809_s3 + $0x10] sm:$0xf] %vm373_vm2, %v345_v32  ;;  %v280_v36 = vadd.f32 %v644_v24, %v279_v34  ;;  %v300_v37 = vadd.f32 %v644_v24, %v299_v35  ;;  %v241_v38 = vpop.f32.mrf.mxu0  ;;  %v261_v39 = vpop.f32.mrf.mxu1 }
  0xc0   :  { %386 = vst.msk [vmem:[%s809_s3 + $0x30] sm:$0xf] %vm373_vm2, %v353_v33  ;;  %v242_v40 = vadd.f32 %v644_v24, %v241_v38  ;;  %v262_v41 = vadd.f32 %v644_v24, %v261_v39 }
  0xc1   :  { %v329_v42 = vmax.f32 %v280_v36, 0.0  ;;  %v337_v43 = vmax.f32 %v300_v37, 0.0 }
  0xc2   :  { %v314_v44 = vmax.f32 %v242_v40, 0.0  ;;  %v322_v45 = vmax.f32 %v262_v41, 0.0 }
  0xc3   :  { %v361_v46 = vpack.c.bf16 %v329_v42, %v329_v42  ;;  %v369_v47 = vpack.c.bf16 %v337_v43, %v337_v43 }
  0xc4   :  { %v346_v48 = vpack.c.bf16 %v314_v44, %v314_v44  ;;  %v354_v49 = vpack.c.bf16 %v322_v45, %v322_v45 }
  0xc5   :  { %394 = vst.msk [vmem:[%s809_s3 + $0x50] sm:$0xf] %vm373_vm2, %v361_v46 }
  0xc6   :  { %402 = vst.msk [vmem:[%s809_s3 + $0x70] sm:$0xf] %vm373_vm2, %v369_v47  ;;  %v281_v50 = vpop.f32.mrf.mxu2  ;;  %v301_v51 = vpop.f32.mrf.mxu3 }
  0xc7   :  { %379 = vst.msk [vmem:[%s809_s3 + $0x14] sm:$0xf] %vm373_vm2, %v346_v48  ;;  %v282_v52 = vadd.f32 %v644_v24, %v281_v50  ;;  %v302_v53 = vadd.f32 %v644_v24, %v301_v51  ;;  %v244_v54 = vpop.f32.mrf.mxu0  ;;  %v264_v55 = vpop.f32.mrf.mxu1 }
  0xc8   :  { %387 = vst.msk [vmem:[%s809_s3 + $0x34] sm:$0xf] %vm373_vm2, %v354_v49  ;;  %v245_v56 = vadd.f32 %v644_v24, %v244_v54  ;;  %v265_v57 = vadd.f32 %v644_v24, %v264_v55 }
  0xc9   :  { %v330_v58 = vmax.f32 %v282_v52, 0.0  ;;  %v338_v59 = vmax.f32 %v302_v53, 0.0 }
  0xca   :  { %v315_v60 = vmax.f32 %v245_v56, 0.0  ;;  %v323_v61 = vmax.f32 %v265_v57, 0.0 }
  0xcb   :  { %v362_v62 = vpack.c.bf16 %v330_v58, %v330_v58  ;;  %v370_v63 = vpack.c.bf16 %v338_v59, %v338_v59 }
  0xcc   :  { %v347_v0 = vpack.c.bf16 %v315_v60, %v315_v60  ;;  %v355_v1 = vpack.c.bf16 %v323_v61, %v323_v61 }
  0xcd   :  { %395 = vst.msk [vmem:[%s809_s3 + $0x54] sm:$0xf] %vm373_vm2, %v362_v62 }
  0xce   :  { %403 = vst.msk [vmem:[%s809_s3 + $0x74] sm:$0xf] %vm373_vm2, %v370_v63  ;;  %v284_v2 = vpop.f32.mrf.mxu2  ;;  %v304_v3 = vpop.f32.mrf.mxu3 }
  0xcf   :  { %380 = vst.msk [vmem:[%s809_s3 + $0x18] sm:$0xf] %vm373_vm2, %v347_v0  ;;  %v285_v4 = vadd.f32 %v644_v24, %v284_v2  ;;  %v305_v5 = vadd.f32 %v644_v24, %v304_v3  ;;  %v246_v6 = vpop.f32.mrf.mxu0  ;;  %v266_v7 = vpop.f32.mrf.mxu1 }
  0xd0   :  { %388 = vst.msk [vmem:[%s809_s3 + $0x38] sm:$0xf] %vm373_vm2, %v355_v1  ;;  %v247_v8 = vadd.f32 %v644_v24, %v246_v6  ;;  %v267_v9 = vadd.f32 %v644_v24, %v266_v7 }
  0xd1   :  { %v331_v10 = vmax.f32 %v285_v4, 0.0  ;;  %v339_v11 = vmax.f32 %v305_v5, 0.0 }
  0xd2   :  { %v316_v12 = vmax.f32 %v247_v8, 0.0  ;;  %v324_v13 = vmax.f32 %v267_v9, 0.0 }
  0xd3   :  { %v363_v14 = vpack.c.bf16 %v331_v10, %v331_v10  ;;  %v371_v15 = vpack.c.bf16 %v339_v11, %v339_v11 }
  0xd4   :  { %v348_v16 = vpack.c.bf16 %v316_v12, %v316_v12  ;;  %v356_v17 = vpack.c.bf16 %v324_v13, %v324_v13 }
  0xd5   :  { %396 = vst.msk [vmem:[%s809_s3 + $0x58] sm:$0xf] %vm373_vm2, %v363_v14 }
  0xd6   :  { %404 = vst.msk [vmem:[%s809_s3 + $0x78] sm:$0xf] %vm373_vm2, %v371_v15  ;;  %v286_v18 = vpop.f32.mrf.mxu2  ;;  %v306_v19 = vpop.f32.mrf.mxu3 }
  0xd7   :  { %381 = vst.msk [vmem:[%s809_s3 + $0x1c] sm:$0xf] %vm373_vm2, %v348_v16  ;;  %v287_v20 = vadd.f32 %v644_v24, %v286_v18  ;;  %v307_v21 = vadd.f32 %v644_v24, %v306_v19 }
  0xd8   :  { %389 = vst.msk [vmem:[%s809_s3 + $0x3c] sm:$0xf] %vm373_vm2, %v356_v17 }
  0xd9   :  { %v332_v22 = vmax.f32 %v287_v20, 0.0  ;;  %v340_v23 = vmax.f32 %v307_v21, 0.0 }
  0xdb   :  { %v364_v25 = vpack.c.bf16 %v332_v22, %v332_v22  ;;  %v372_v26 = vpack.c.bf16 %v340_v23, %v340_v23 }
  0xdd   :  { %397 = vst.msk [vmem:[%s809_s3 + $0x5c] sm:$0xf] %vm373_vm2, %v364_v25 }
  0xde   :  { %405 = vst.msk [vmem:[%s809_s3 + $0x7c] sm:$0xf] %vm373_vm2, %v372_v26 }

// kernel: model_forward.10
= control target key start
LH: loop header
LB: loop body
LE: loop exit
PB: predicated region body
PF: predicated region fallthrough
CT: control target
= control target key end

     0   :  { %vm135_vm0 = vcmask 130048   ;;  %vm222_vm1 = vcmask 257024   ;;  %s468_s1 = inlined_call_operand.vmem [shape: bf16[144,32], index: 1, kind: input, shape index: {}]   ;;  %s469_s0 = inlined_call_operand.vmem [shape: bf16[64,144], index: 0, kind: input, shape index: {}]   ;;  %s470_s2 = inlined_call_operand.vmem [shape: f32[1,32], index: 2, kind: input, shape index: {}]   ;;  %s471_s3 = inlined_call_operand.vmem [shape: bf16[64,32], index: 3, kind: output, shape index: {}]  }
   0x1   :  { %v322_v0 = vld [vmem:[%s468_s1 + $0x38] sm:$0xff]  ;;  %v323_v1 = vld [vmem:[%s468_s1 + $0x40] sm:$0xff]  ;;  %v309_v2 = vld [vmem:[%s469_s0 + $0x14] sm:$0xf] }
   0x2   :  { %v247_v3 = vld [vmem:[%s469_s0 + $0x18] sm:$0xf0]  ;;  %148 = vmatpush.bf16.msra.mxu0 %v322_v0  ;;  %324 = vmatpush.bf16.msra.mxu2 %v322_v0  ;;  %v321_v4 = vld [vmem:[%s468_s1 + $0x30] sm:$0xff]  ;;  %v307_v6 = vld [vmem:[%s469_s0 + $0x4] sm:$0xf] }
   0x3   :  { %332 = vmatpush.bf16.msra.mxu3 %v323_v1  ;;  %v250_v5 = vor.u32 %v309_v2, %v247_v3  ;;  %184 = vmatpush.bf16.msra.mxu1 %v323_v1  ;;  %v320_v7 = vld [vmem:[%s468_s1 + $0x28] sm:$0xff]  ;;  %v319_v10 = vld [vmem:[%s468_s1 + $0x20] sm:$0xff]  ;;  %v318_v11 = vld [vmem:[%s468_s1 + $0x18] sm:$0xff] }
   0x4   :  { %v239_v8 = vld [vmem:[%s469_s0 + $0x8] sm:$0xf0]  ;;  %v311_v12 = vld [vmem:[%s469_s0 + $0x24] sm:$0xf]  ;;  %v317_v14 = vld [vmem:[%s468_s1 + $0x10] sm:$0xff] }
   0x5   :  { %v242_v9 = vor.u32 %v307_v6, %v239_v8  ;;  %v255_v13 = vld [vmem:[%s469_s0 + $0x28] sm:$0xf0]  ;;  %v315_v17 = vld [vmem:[%s468_s1] sm:$0xff]  ;;  %v308_v19 = vld [vmem:[%s469_s0 + $0x4] sm:$0xf0] }
   0x6   :  { %149 = vmatpush.bf16.msra.mxu0 %v321_v4  ;;  %325 = vmatpush.bf16.msra.mxu2 %v321_v4  ;;  %v258_v15 = vor.u32 %v311_v12, %v255_v13  ;;  %v316_v16 = vld [vmem:[%s468_s1 + $0x8] sm:$0xff]  ;;  %v237_v18 = vld [vmem:[%s469_s0] sm:$0xf]  ;;  %v313_v24 = vld [vmem:[%s469_s0 + $0x34] sm:$0xf] }
   0x7   :  { %304 = vmatmul.msk.bf16.vlgmr.msra.gmra.mxu3 %vm135_vm0, %v250_v5  ;;  %303 = vmatmul.msk.bf16.vlgmr.msra.gmra.mxu1 %vm135_vm0, %v242_v9  ;;  %v253_v20 = vld [vmem:[%s469_s0 + $0x20] sm:$0xf]  ;;  %v312_v21 = vld [vmem:[%s469_s0 + $0x24] sm:$0xf0]  ;;  %v238_v22 = vor.u32 %v308_v19, %v237_v18  ;;  %v263_v25 = vld [vmem:[%s469_s0 + $0x38] sm:$0xf0] }
   0x8   :  { %v254_v23 = vor.u32 %v312_v21, %v253_v20  ;;  %v266_v26 = vor.u32 %v313_v24, %v263_v25  ;;  %v245_v27 = vld [vmem:[%s469_s0 + $0x10] sm:$0xf]  ;;  %v310_v28 = vld [vmem:[%s469_s0 + $0x14] sm:$0xf0]  ;;  %v333_v35 = vld [vmem:[%s470_s2] ss:$0 sm:$0xff] }
   0x9   :  { %v261_v29 = vld [vmem:[%s469_s0 + $0x30] sm:$0xf]  ;;  %v314_v30 = vld [vmem:[%s469_s0 + $0x34] sm:$0xf0]  ;;  %v246_v31 = vor.u32 %v310_v28, %v245_v27 }
   0xa   :  { %150 = vmatpush.bf16.msra.mxu0 %v320_v7  ;;  %326 = vmatpush.bf16.msra.mxu2 %v320_v7  ;;  %v262_v32 = vor.u32 %v314_v30, %v261_v29 }
   0xe   :  { %151 = vmatpush.bf16.msra.mxu0 %v319_v10  ;;  %327 = vmatpush.bf16.msra.mxu2 %v319_v10 }
  0x12   :  { %152 = vmatpush.bf16.msra.mxu0 %v318_v11  ;;  %328 = vmatpush.bf16.msra.mxu2 %v318_v11 }
  0x16   :  { %153 = vmatpush.bf16.msra.mxu0 %v317_v14  ;;  %329 = vmatpush.bf16.msra.mxu2 %v317_v14 }
  0x17   :  { %305 = vmatmul.msk.bf16.gmra.mxu3 %vm135_vm0, %v258_v15 }
  0x1a   :  { %154 = vmatpush.bf16.msra.mxu0 %v316_v16  ;;  %330 = vmatpush.bf16.msra.mxu2 %v316_v16 }
  0x1e   :  { %155 = vmatpush.bf16.msra.mxu0 %v315_v17  ;;  %331 = vmatpush.bf16.msra.mxu2 %v315_v17 }
  0x21   :  { %156 = vmatmul.bf16.vlgmr.msra.gmra.mxu0 %v238_v22  ;;  %166 = vmatmul.bf16.vlgmr.msra.gmra.mxu2 %v254_v23 }
  0x27   :  { %306 = vmatmul.msk.bf16.gmra.mxu3 %vm135_vm0, %v266_v26 }
  0x31   :  { %161 = vmatmul.bf16.gmra.mxu0 %v246_v31  ;;  %171 = vmatmul.bf16.gmra.mxu2 %v262_v32 }
  0x84   :  { %v186_v36 = vpop.f32.mrf.mxu1 }
  0x8a   :  { %v191_v33 = vpop.f32.mrf.mxu3 }
  0x8c   :  { %v188_v46 = vpop.f32.mrf.mxu1 }
  0x92   :  { %v193_v34 = vpop.f32.mrf.mxu3 }
  0x9a   :  { %v196_v39 = vpop.f32.mrf.mxu3 }
  0x9e   :  { %v157_v37 = vpop.f32.mrf.mxu0 }
  0x9f   :  { %v158_v38 = vadd.f32 %v333_v35, %v157_v37 }
  0xa1   :  { %v187_v40 = vadd.f32 %v186_v36, %v158_v38 }
  0xa2   :  { %v198_v51 = vpop.f32.mrf.mxu3 }
  0xa3   :  { %v206_v41 = vmax.f32 %v187_v40, 0.0 }
  0xa4   :  { %v167_v42 = vpop.f32.mrf.mxu2 }
  0xa5   :  { %v214_v43 = vpack.c.bf16 %v206_v41, %v206_v41  ;;  %v168_v44 = vadd.f32 %v333_v35, %v167_v42 }
  0xa6   :  { %v159_v45 = vpop.f32.mrf.mxu0 }
  0xa7   :  { %223 = vst.msk [vmem:[%s471_s3] sm:$0xf] %vm222_vm1, %v214_v43  ;;  %v197_v47 = vadd.f32 %v196_v39, %v168_v44  ;;  %v160_v48 = vadd.f32 %v333_v35, %v159_v45 }
  0xa9   :  { %v210_v49 = vmax.f32 %v197_v47, 0.0  ;;  %v189_v50 = vadd.f32 %v188_v46, %v160_v48 }
  0xaa   :  { %v201_v0 = vpop.f32.mrf.mxu3 }
  0xab   :  { %v218_v52 = vpack.c.bf16 %v210_v49, %v210_v49  ;;  %v207_v53 = vmax.f32 %v189_v50, 0.0 }
  0xac   :  { %v169_v54 = vpop.f32.mrf.mxu2 }
  0xad   :  { %227 = vst.msk [vmem:[%s471_s3 + $0x10] sm:$0xf] %vm222_vm1, %v218_v52  ;;  %v215_v55 = vpack.c.bf16 %v207_v53, %v207_v53  ;;  %v170_v56 = vadd.f32 %v333_v35, %v169_v54 }
  0xae   :  { %v162_v57 = vpop.f32.mrf.mxu0 }
  0xaf   :  { %224 = vst.msk [vmem:[%s471_s3 + $0x4] sm:$0xf] %vm222_vm1, %v215_v55  ;;  %v199_v58 = vadd.f32 %v198_v51, %v170_v56  ;;  %v163_v59 = vadd.f32 %v333_v35, %v162_v57 }
  0xb1   :  { %v211_v60 = vmax.f32 %v199_v58, 0.0  ;;  %v192_v61 = vadd.f32 %v191_v33, %v163_v59 }
  0xb2   :  { %v203_v14 = vpop.f32.mrf.mxu3 }
  0xb3   :  { %v219_v62 = vpack.c.bf16 %v211_v60, %v211_v60  ;;  %v208_v63 = vmax.f32 %v192_v61, 0.0 }
  0xb4   :  { %v172_v1 = vpop.f32.mrf.mxu2 }
  0xb5   :  { %228 = vst.msk [vmem:[%s471_s3 + $0x14] sm:$0xf] %vm222_vm1, %v219_v62  ;;  %v216_v2 = vpack.c.bf16 %v208_v63, %v208_v63  ;;  %v173_v3 = vadd.f32 %v333_v35, %v172_v1 }
  0xb6   :  { %v164_v4 = vpop.f32.mrf.mxu0 }
  0xb7   :  { %225 = vst.msk [vmem:[%s471_s3 + $0x8] sm:$0xf] %vm222_vm1, %v216_v2  ;;  %v202_v5 = vadd.f32 %v201_v0, %v173_v3  ;;  %v165_v6 = vadd.f32 %v333_v35, %v164_v4 }
  0xb9   :  { %v212_v7 = vmax.f32 %v202_v5, 0.0  ;;  %v194_v8 = vadd.f32 %v193_v34, %v165_v6 }
  0xbb   :  { %v220_v9 = vpack.c.bf16 %v212_v7, %v212_v7  ;;  %v209_v10 = vmax.f32 %v194_v8, 0.0 }
  0xbc   :  { %v174_v11 = vpop.f32.mrf.mxu2 }
  0xbd   :  { %229 = vst.msk [vmem:[%s471_s3 + $0x18] sm:$0xf] %vm222_vm1, %v220_v9  ;;  %v217_v12 = vpack.c.bf16 %v209_v10, %v209_v10  ;;  %v175_v13 = vadd.f32 %v333_v35, %v174_v11 }
  0xbf   :  { %226 = vst.msk [vmem:[%s471_s3 + $0xc] sm:$0xf] %vm222_vm1, %v217_v12  ;;  %v204_v15 = vadd.f32 %v203_v14, %v175_v13 }
  0xc1   :  { %v213_v16 = vmax.f32 %v204_v15, 0.0 }
  0xc3   :  { %v221_v17 = vpack.c.bf16 %v213_v16, %v213_v16 }
  0xc5   :  { %230 = vst.msk [vmem:[%s471_s3 + $0x1c] sm:$0xf] %vm222_vm1, %v221_v17 }

// kernel: model_forward.11
= control target key start
LH: loop header
LB: loop body
LE: loop exit
PB: predicated region body
PF: predicated region fallthrough
CT: control target
= control target key end

     0   :  { %vm239_vm0 = vcmask 261120   ;;  %vm355_vm1 = vcmask 257024   ;;  %s724_s1 = inlined_call_operand.vmem [shape: bf16[288,32], index: 1, kind: input, shape index: {}]   ;;  %s725_s0 = inlined_call_operand.vmem [shape: bf16[64,288], index: 0, kind: input, shape index: {}]   ;;  %s726_s2 = inlined_call_operand.vmem [shape: f32[1,32], index: 2, kind: input, shape index: {}]   ;;  %s727_s3 = inlined_call_operand.vmem [shape: bf16[64,32], index: 3, kind: output, shape index: {}]  }
   0x1   :  { %v511_v0 = vld [vmem:[%s724_s1 + $0x38] sm:$0xff]  ;;  %v521_v2 = vld [vmem:[%s724_s1 + $0x88] sm:$0xff]  ;;  %v510_v3 = vld [vmem:[%s724_s1 + $0x30] sm:$0xff] }
   0x2   :  { %v519_v1 = vld [vmem:[%s724_s1 + $0x78] sm:$0xff]  ;;  %252 = vmatpush.bf16.msra.mxu0 %v511_v0  ;;  %522 = vmatpush.bf16.msra.mxu3 %v511_v0  ;;  %v518_v4 = vld [vmem:[%s724_s1 + $0x70] sm:$0xff]  ;;  %v520_v5 = vld [vmem:[%s724_s1 + $0x80] sm:$0xff] }
   0x3   :  { %530 = vmatpush.bf16.msra.mxu1 %v519_v1  ;;  %316 = vmatpush.bf16.msra.mxu2 %v521_v2  ;;  %v378_v6 = vld [vmem:[%s725_s0 + $0x8] sm:$0xf]  ;;  %v494_v7 = vld [vmem:[%s725_s0 + $0x10] sm:$0xf0]  ;;  %v508_v11 = vld [vmem:[%s724_s1 + $0x20] sm:$0xff] }
   0x4   :  { %v509_v8 = vld [vmem:[%s724_s1 + $0x28] sm:$0xff]  ;;  %v379_v10 = vor.u32 %v494_v7, %v378_v6  ;;  %v516_v12 = vld [vmem:[%s724_s1 + $0x60] sm:$0xff]  ;;  %v507_v13 = vld [vmem:[%s724_s1 + $0x18] sm:$0xff] }
   0x5   :  { %v517_v9 = vld [vmem:[%s724_s1 + $0x68] sm:$0xff]  ;;  %v515_v14 = vld [vmem:[%s724_s1 + $0x58] sm:$0xff]  ;;  %v506_v15 = vld [vmem:[%s724_s1 + $0x10] sm:$0xff] }
   0x6   :  { %253 = vmatpush.bf16.msra.mxu0 %v510_v3  ;;  %523 = vmatpush.bf16.msra.mxu3 %v510_v3  ;;  %v514_v16 = vld [vmem:[%s724_s1 + $0x50] sm:$0xff]  ;;  %v390_v17 = vld [vmem:[%s725_s0 + $0x20] sm:$0xf]  ;;  %v497_v18 = vld [vmem:[%s725_s0 + $0x28] sm:$0xf0] }
   0x7   :  { %531 = vmatpush.bf16.msra.mxu1 %v518_v4  ;;  %317 = vmatpush.bf16.msra.mxu2 %v520_v5  ;;  %v505_v19 = vld [vmem:[%s724_s1 + $0x8] sm:$0xff]  ;;  %v391_v21 = vor.u32 %v497_v18, %v390_v17  ;;  %v504_v22 = vld [vmem:[%s724_s1] sm:$0xff]  ;;  %v382_v23 = vld [vmem:[%s725_s0 + $0x18] sm:$0xf] }
   0x8   :  { %v513_v20 = vld [vmem:[%s724_s1 + $0x48] sm:$0xff]  ;;  %v496_v24 = vld [vmem:[%s725_s0 + $0x20] sm:$0xf0]  ;;  %v370_v25 = vld [vmem:[%s725_s0] sm:$0xf] }
   0x9   :  { %v493_v26 = vld [vmem:[%s725_s0 + $0x8] sm:$0xf0]  ;;  %v512_v27 = vld [vmem:[%s724_s1 + $0x40] sm:$0xff]  ;;  %v495_v28 = vld [vmem:[%s725_s0 + $0x1c] sm:$0xf]  ;;  %v383_v30 = vor.u32 %v496_v24, %v382_v23 }
   0xa   :  { %254 = vmatpush.bf16.msra.mxu0 %v509_v8  ;;  %524 = vmatpush.bf16.msra.mxu3 %v509_v8  ;;  %v384_v29 = vld [vmem:[%s725_s0 + $0x24] sm:$0xf0]  ;;  %v371_v31 = vor.u32 %v493_v26, %v370_v25  ;;  %v402_v33 = vld [vmem:[%s725_s0 + $0x38] sm:$0xf]  ;;  %v500_v34 = vld [vmem:[%s725_s0 + $0x40] sm:$0xf0] }
   0xb   :  { %532 = vmatpush.bf16.msra.mxu1 %v517_v9  ;;  %488 = vmatmul.msk.bf16.vlgmr.msra.gmra.mxu2 %vm239_vm0, %v379_v10  ;;  %v387_v32 = vor.u32 %v495_v28, %v384_v29  ;;  %v403_v35 = vor.u32 %v500_v34, %v402_v33  ;;  %v394_v36 = vld [vmem:[%s725_s0 + $0x30] sm:$0xf]  ;;  %v499_v37 = vld [vmem:[%s725_s0 + $0x38] sm:$0xf0]  ;;  %v498_v38 = vld [vmem:[%s725_s0 + $0x34] sm:$0xf] }
   0xc   :  { %v396_v39 = vld [vmem:[%s725_s0 + $0x3c] sm:$0xf0]  ;;  %v395_v40 = vor.u32 %v499_v37, %v394_v36  ;;  %v414_v42 = vld [vmem:[%s725_s0 + $0x50] sm:$0xf]  ;;  %v503_v43 = vld [vmem:[%s725_s0 + $0x58] sm:$0xf0] }
   0xd   :  { %v399_v41 = vor.u32 %v498_v38, %v396_v39  ;;  %v415_v44 = vor.u32 %v503_v43, %v414_v42  ;;  %v492_v45 = vld [vmem:[%s725_s0 + $0x4] sm:$0xf]  ;;  %v372_v46 = vld [vmem:[%s725_s0 + $0xc] sm:$0xf0]  ;;  %v406_v48 = vld [vmem:[%s725_s0 + $0x48] sm:$0xf] }
   0xe   :  { %255 = vmatpush.bf16.msra.mxu0 %v508_v11  ;;  %525 = vmatpush.bf16.msra.mxu3 %v508_v11  ;;  %v375_v47 = vor.u32 %v492_v45, %v372_v46  ;;  %v502_v49 = vld [vmem:[%s725_s0 + $0x50] sm:$0xf0]  ;;  %v501_v50 = vld [vmem:[%s725_s0 + $0x4c] sm:$0xf]  ;;  %v408_v51 = vld [vmem:[%s725_s0 + $0x54] sm:$0xf0] }
   0xf   :  { %533 = vmatpush.bf16.msra.mxu1 %v516_v12  ;;  %v407_v52 = vor.u32 %v502_v49, %v406_v48  ;;  %v411_v53 = vor.u32 %v501_v50, %v408_v51  ;;  %v538_v58 = vld [vmem:[%s726_s2] ss:$0 sm:$0xff] }
  0x12   :  { %256 = vmatpush.bf16.msra.mxu0 %v507_v13  ;;  %526 = vmatpush.bf16.msra.mxu3 %v507_v13 }
  0x13   :  { %534 = vmatpush.bf16.msra.mxu1 %v515_v14 }
  0x16   :  { %257 = vmatpush.bf16.msra.mxu0 %v506_v15  ;;  %527 = vmatpush.bf16.msra.mxu3 %v506_v15 }
  0x17   :  { %535 = vmatpush.bf16.msra.mxu1 %v514_v16 }
  0x1a   :  { %258 = vmatpush.bf16.msra.mxu0 %v505_v19  ;;  %528 = vmatpush.bf16.msra.mxu3 %v505_v19 }
  0x1b   :  { %536 = vmatpush.bf16.msra.mxu1 %v513_v20  ;;  %489 = vmatmul.msk.bf16.gmra.mxu2 %vm239_vm0, %v391_v21 }
  0x1e   :  { %259 = vmatpush.bf16.msra.mxu0 %v504_v22  ;;  %529 = vmatpush.bf16.msra.mxu3 %v504_v22 }
  0x1f   :  { %537 = vmatpush.bf16.msra.mxu1 %v512_v27 }
  0x21   :  { %265 = vmatmul.bf16.vlgmr.msra.gmra.mxu3 %v383_v30  ;;  %260 = vmatmul.bf16.vlgmr.msra.gmra.mxu0 %v371_v31 }
  0x22   :  { %281 = vmatpush.bf16.msrb.mxu0 %v519_v1  ;;  %294 = vmatmul.bf16.vlgmr.msra.gmra.mxu1 %v387_v32 }
  0x26   :  { %282 = vmatpush.bf16.msrb.mxu0 %v518_v4 }
  0x2a   :  { %283 = vmatpush.bf16.msrb.mxu0 %v517_v9 }
  0x2b   :  { %490 = vmatmul.msk.bf16.gmra.mxu2 %vm239_vm0, %v403_v35 }
  0x2e   :  { %284 = vmatpush.bf16.msrb.mxu0 %v516_v12 }
  0x31   :  { %270 = vmatmul.bf16.gmra.mxu3 %v395_v40 }
  0x32   :  { %285 = vmatpush.bf16.msrb.mxu0 %v515_v14  ;;  %299 = vmatmul.bf16.gmra.mxu1 %v399_v41 }
  0x36   :  { %286 = vmatpush.bf16.msrb.mxu0 %v514_v16 }
  0x3a   :  { %287 = vmatpush.bf16.msrb.mxu0 %v513_v20 }
  0x3b   :  { %491 = vmatmul.msk.bf16.gmra.mxu2 %vm239_vm0, %v415_v44 }
  0x3e   :  { %288 = vmatpush.bf16.msrb.mxu0 %v512_v27 }
  0x41   :  { %289 = vmatmul.bf16.vlgmr.msrb.gmra.mxu0 %v375_v47  ;;  %275 = vmatmul.bf16.gmra.mxu3 %v407_v52 }
  0x42   :  { %304 = vmatmul.bf16.gmra.mxu1 %v411_v53 }
  0x8e   :  { %v319_v54 = vpop.f32.mrf.mxu2 }
  0x96   :  { %v321_v55 = vpop.f32.mrf.mxu2 }
  0x9e   :  { %v324_v56 = vpop.f32.mrf.mxu2  ;;  %v261_v63 = vpop.f32.mrf.mxu0 }
  0x9f   :  { %v295_v57 = vpop.f32.mrf.mxu1  ;;  %v262_v17 = vadd.f32 %v538_v58, %v261_v63 }
  0xa4   :  { %v266_v59 = vpop.f32.mrf.mxu3 }
  0xa5   :  { %v267_v60 = vadd.f32 %v538_v58, %v266_v59 }
  0xa6   :  { %v326_v0 = vpop.f32.mrf.mxu2  ;;  %v263_v9 = vpop.f32.mrf.mxu0 }
  0xa7   :  { %v296_v61 = vadd.f32 %v295_v57, %v267_v60  ;;  %v297_v62 = vpop.f32.mrf.mxu1  ;;  %v264_v30 = vadd.f32 %v538_v58, %v263_v9 }
  0xa9   :  { %v325_v1 = vadd.f32 %v324_v56, %v296_v61 }
  0xab   :  { %v341_v2 = vmax.f32 %v325_v1, 0.0 }
  0xac   :  { %v268_v3 = vpop.f32.mrf.mxu3 }
  0xad   :  { %v349_v4 = vpack.c.bf16 %v341_v2, %v341_v2  ;;  %v269_v5 = vadd.f32 %v538_v58, %v268_v3 }
  0xae   :  { %v329_v10 = vpop.f32.mrf.mxu2 }
  0xaf   :  { %358 = vst.msk [vmem:[%s727_s3 + $0x8] sm:$0xf] %vm355_vm1, %v349_v4  ;;  %v298_v6 = vadd.f32 %v297_v62, %v269_v5  ;;  %v300_v7 = vpop.f32.mrf.mxu1 }
  0xb1   :  { %v327_v8 = vadd.f32 %v326_v0, %v298_v6 }
  0xb3   :  { %v342_v11 = vmax.f32 %v327_v8, 0.0 }
  0xb4   :  { %v271_v12 = vpop.f32.mrf.mxu3 }
  0xb5   :  { %v350_v13 = vpack.c.bf16 %v342_v11, %v342_v11  ;;  %v272_v14 = vadd.f32 %v538_v58, %v271_v12 }
  0xb6   :  { %v331_v21 = vpop.f32.mrf.mxu2 }
  0xb7   :  { %359 = vst.msk [vmem:[%s727_s3 + $0xc] sm:$0xf] %vm355_vm1, %v350_v13  ;;  %v301_v15 = vadd.f32 %v300_v7, %v272_v14  ;;  %v302_v18 = vpop.f32.mrf.mxu1 }
  0xb9   :  { %v330_v16 = vadd.f32 %v329_v10, %v301_v15 }
  0xbb   :  { %v343_v19 = vmax.f32 %v330_v16, 0.0 }
  0xbc   :  { %v273_v23 = vpop.f32.mrf.mxu3 }
  0xbd   :  { %v351_v24 = vpack.c.bf16 %v343_v19, %v343_v19  ;;  %v274_v25 = vadd.f32 %v538_v58, %v273_v23 }
  0xbe   :  { %v290_v20 = vpop.f32.mrf.mxu0  ;;  %v334_v39 = vpop.f32.mrf.mxu2 }
  0xbf   :  { %v291_v22 = vadd.f32 %v290_v20, %v262_v17  ;;  %360 = vst.msk [vmem:[%s727_s3 + $0x10] sm:$0xf] %vm355_vm1, %v351_v24  ;;  %v303_v27 = vadd.f32 %v302_v18, %v274_v25  ;;  %v305_v34 = vpop.f32.mrf.mxu1 }
  0xc1   :  { %v320_v26 = vadd.f32 %v319_v54, %v291_v22  ;;  %v332_v29 = vadd.f32 %v331_v21, %v303_v27 }
  0xc3   :  { %v339_v28 = vmax.f32 %v320_v26, 0.0  ;;  %v344_v32 = vmax.f32 %v332_v29, 0.0 }
  0xc4   :  { %v276_v36 = vpop.f32.mrf.mxu3 }
  0xc5   :  { %v347_v31 = vpack.c.bf16 %v339_v28, %v339_v28  ;;  %v352_v37 = vpack.c.bf16 %v344_v32, %v344_v32  ;;  %v277_v38 = vadd.f32 %v538_v58, %v276_v36 }
  0xc6   :  { %v292_v33 = vpop.f32.mrf.mxu0  ;;  %v336_v51 = vpop.f32.mrf.mxu2 }
  0xc7   :  { %356 = vst.msk [vmem:[%s727_s3] sm:$0xf] %vm355_vm1, %v347_v31  ;;  %v293_v35 = vadd.f32 %v292_v33, %v264_v30  ;;  %v306_v41 = vadd.f32 %v305_v34, %v277_v38  ;;  %v307_v49 = vpop.f32.mrf.mxu1 }
  0xc8   :  { %361 = vst.msk [vmem:[%s727_s3 + $0x14] sm:$0xf] %vm355_vm1, %v352_v37 }
  0xc9   :  { %v322_v40 = vadd.f32 %v321_v55, %v293_v35  ;;  %v335_v43 = vadd.f32 %v334_v39, %v306_v41 }
  0xcb   :  { %v340_v42 = vmax.f32 %v322_v40, 0.0  ;;  %v345_v45 = vmax.f32 %v335_v43, 0.0 }
  0xcc   :  { %v278_v46 = vpop.f32.mrf.mxu3 }
  0xcd   :  { %v348_v44 = vpack.c.bf16 %v340_v42, %v340_v42  ;;  %v353_v47 = vpack.c.bf16 %v345_v45, %v345_v45  ;;  %v279_v48 = vadd.f32 %v538_v58, %v278_v46 }
  0xcf   :  { %357 = vst.msk [vmem:[%s727_s3 + $0x4] sm:$0xf] %vm355_vm1, %v348_v44  ;;  %v308_v50 = vadd.f32 %v307_v49, %v279_v48 }
  0xd0   :  { %362 = vst.msk [vmem:[%s727_s3 + $0x18] sm:$0xf] %vm355_vm1, %v353_v47 }
  0xd1   :  { %v337_v52 = vadd.f32 %v336_v51, %v308_v50 }
  0xd3   :  { %v346_v53 = vmax.f32 %v337_v52, 0.0 }
  0xd5   :  { %v354_v54 = vpack.c.bf16 %v346_v53, %v346_v53 }
  0xd7   :  { %363 = vst.msk [vmem:[%s727_s3 + $0x1c] sm:$0xf] %vm355_vm1, %v354_v54 }

// kernel: model_forward.12
= control target key start
LH: loop header
LB: loop body
LE: loop exit
PB: predicated region body
PF: predicated region fallthrough
CT: control target
= control target key end

     0   :  { %vm200_vm0 = vcmask 261120   ;;  %vm264_vm1 = vcmask 523264   ;;  %vm338_vm5 = vcmask 519168   ;;  %s640_s1 = inlined_call_operand.vmem [shape: bf16[288,64], index: 1, kind: input, shape index: {}]   ;;  %s641_s0 = inlined_call_operand.vmem [shape: bf16[32,288], index: 0, kind: input, shape index: {}]   ;;  %s642_s2 = inlined_call_operand.vmem [shape: f32[1,64], index: 2, kind: input, shape index: {}]   ;;  %s643_s3 = inlined_call_operand.vmem [shape: f32[1,64], index: 3, kind: input, shape index: {}]   ;;  %s644_s4 = inlined_call_operand.vmem [shape: bf16[32,64], index: 4, kind: output, shape index: {}]  }
   0x1   :  { %v458_v0 = vld [vmem:[%s640_s1 + $0x38] sm:$0xff]  ;;  %v457_v2 = vld [vmem:[%s640_s1 + $0x30] sm:$0xff]  ;;  %v468_v4 = vld [vmem:[%s640_s1 + $0x88] sm:$0xff] }
   0x2   :  { %v466_v1 = vld [vmem:[%s640_s1 + $0x78] sm:$0xff]  ;;  %207 = vmatpush.bf16.msra.mxu0 %v458_v0  ;;  %v465_v3 = vld [vmem:[%s640_s1 + $0x70] sm:$0xff]  ;;  %469 = vmatpush.bf16.msra.mxu3 %v458_v0  ;;  %v467_v5 = vld [vmem:[%s640_s1 + $0x80] sm:$0xff] }
   0x3   :  { %226 = vmatpush.bf16.msra.mxu1 %v466_v1  ;;  %251 = vmatpush.bf16.msra.mxu2 %v468_v4  ;;  %v357_v6 = vld [vmem:[%s641_s0 + $0x8] sm:$0xf]  ;;  %v447_v7 = vld [vmem:[%s641_s0 + $0x10] sm:$0xf0]  ;;  %v455_v11 = vld [vmem:[%s640_s1 + $0x20] sm:$0xff] }
   0x4   :  { %v456_v8 = vld [vmem:[%s640_s1 + $0x28] sm:$0xff]  ;;  %v358_v10 = vor.u32 %v447_v7, %v357_v6  ;;  %v463_v12 = vld [vmem:[%s640_s1 + $0x60] sm:$0xff]  ;;  %v454_v13 = vld [vmem:[%s640_s1 + $0x18] sm:$0xff] }
   0x5   :  { %v464_v9 = vld [vmem:[%s640_s1 + $0x68] sm:$0xff]  ;;  %v462_v14 = vld [vmem:[%s640_s1 + $0x58] sm:$0xff]  ;;  %v453_v15 = vld [vmem:[%s640_s1 + $0x10] sm:$0xff] }
   0x6   :  { %208 = vmatpush.bf16.msra.mxu0 %v457_v2  ;;  %470 = vmatpush.bf16.msra.mxu3 %v457_v2  ;;  %v461_v16 = vld [vmem:[%s640_s1 + $0x50] sm:$0xff]  ;;  %v369_v17 = vld [vmem:[%s641_s0 + $0x20] sm:$0xf]  ;;  %v450_v18 = vld [vmem:[%s641_s0 + $0x28] sm:$0xf0] }
   0x7   :  { %227 = vmatpush.bf16.msra.mxu1 %v465_v3  ;;  %252 = vmatpush.bf16.msra.mxu2 %v467_v5  ;;  %v452_v19 = vld [vmem:[%s640_s1 + $0x8] sm:$0xff]  ;;  %v370_v21 = vor.u32 %v450_v18, %v369_v17  ;;  %v451_v22 = vld [vmem:[%s640_s1] sm:$0xff]  ;;  %v351_v27 = vld [vmem:[%s641_s0 + $0xc] sm:$0xf0] }
   0x8   :  { %v460_v20 = vld [vmem:[%s640_s1 + $0x48] sm:$0xff]  ;;  %v459_v23 = vld [vmem:[%s640_s1 + $0x40] sm:$0xff]  ;;  %v361_v28 = vld [vmem:[%s641_s0 + $0x18] sm:$0xf] }
   0x9   :  { %v349_v24 = vld [vmem:[%s641_s0] sm:$0xf]  ;;  %v446_v25 = vld [vmem:[%s641_s0 + $0x8] sm:$0xf0]  ;;  %v445_v26 = vld [vmem:[%s641_s0 + $0x4] sm:$0xf] }
   0xa   :  { %209 = vmatpush.bf16.msra.mxu0 %v456_v8  ;;  %471 = vmatpush.bf16.msra.mxu3 %v456_v8  ;;  %v449_v29 = vld [vmem:[%s641_s0 + $0x20] sm:$0xf0]  ;;  %v350_v30 = vor.u32 %v446_v25, %v349_v24  ;;  %v354_v31 = vor.u32 %v445_v26, %v351_v27  ;;  %v448_v33 = vld [vmem:[%s641_s0 + $0x1c] sm:$0xf]  ;;  %v363_v34 = vld [vmem:[%s641_s0 + $0x24] sm:$0xf0] }
   0xb   :  { %228 = vmatpush.bf16.msra.mxu1 %v464_v9  ;;  %443 = vmatmul.msk.bf16.vlgmr.msra.gmra.mxu2 %vm200_vm0, %v358_v10  ;;  %v362_v32 = vor.u32 %v449_v29, %v361_v28  ;;  %v366_v35 = vor.u32 %v448_v33, %v363_v34  ;;  %v300_v33 = vld [vmem:[%s642_s2] sm:$0x1] }
   0xe   :  { %210 = vmatpush.bf16.msra.mxu0 %v455_v11  ;;  %472 = vmatpush.bf16.msra.mxu3 %v455_v11 }
   0xf   :  { %229 = vmatpush.bf16.msra.mxu1 %v463_v12 }
  0x12   :  { %211 = vmatpush.bf16.msra.mxu0 %v454_v13  ;;  %473 = vmatpush.bf16.msra.mxu3 %v454_v13 }
  0x13   :  { %230 = vmatpush.bf16.msra.mxu1 %v462_v14 }
  0x16   :  { %212 = vmatpush.bf16.msra.mxu0 %v453_v15  ;;  %474 = vmatpush.bf16.msra.mxu3 %v453_v15 }
  0x17   :  { %231 = vmatpush.bf16.msra.mxu1 %v461_v16 }
  0x1a   :  { %213 = vmatpush.bf16.msra.mxu0 %v452_v19  ;;  %475 = vmatpush.bf16.msra.mxu3 %v452_v19 }
  0x1b   :  { %232 = vmatpush.bf16.msra.mxu1 %v460_v20  ;;  %444 = vmatmul.msk.bf16.gmra.mxu2 %vm200_vm0, %v370_v21 }
  0x1e   :  { %214 = vmatpush.bf16.msra.mxu0 %v451_v22  ;;  %476 = vmatpush.bf16.msra.mxu3 %v451_v22 }
  0x1f   :  { %233 = vmatpush.bf16.msra.mxu1 %v459_v23 }
  0x21   :  { %215 = vmatmul.bf16.vlgmr.msra.gmra.mxu0 %v350_v30  ;;  %220 = vmatmul.bf16.vlgmr.msra.gmra.mxu3 %v362_v32 }
  0x22   :  { %234 = vmatmul.bf16.vlgmr.msra.gmra.mxu1 %v354_v31 }
  0x32   :  { %239 = vmatmul.bf16.gmra.mxu1 %v366_v35 }
  0x8e   :  { %v254_v36 = vpop.f32.mrf.mxu2 }
  0x96   :  { %v256_v39 = vpop.f32.mrf.mxu2 }
  0x9e   :  { %v216_v37 = vpop.f32.mrf.mxu0  ;;  %v259_v45 = vpop.f32.mrf.mxu2 }
  0x9f   :  { %v235_v38 = vpop.f32.mrf.mxu1 }
  0xa0   :  { %v236_v44 = vadd.f32 %v235_v38, %v216_v37  ;;  %v313_v37 = vld [vmem:[%s643_s3] sm:$0x1] }
  0xa2   :  { %v598_v49 = vadd.f32 %v254_v36, %v236_v44 }
  0xa4   :  { %v221_v43 = vpop.f32.mrf.mxu3  ;;  %v279_v52 = vmul.f32 %v598_v49, %v598_v49  ;;  %v265_v57 = vsel %vm264_vm1, %v598_v49, 0.0 }
  0xa6   :  { %v218_v41 = vpop.f32.mrf.mxu0  ;;  %v261_v62 = vpop.f32.mrf.mxu2  ;;  %v283_v63 = vsel %vm264_vm1, %v279_v52, 0.0 }
  0xa7   :  { %v237_v40 = vpop.f32.mrf.mxu1 }
  0xa8   :  { %v238_v42 = vadd.f32 %v237_v40, %v218_v41 }
  0xaa   :  { %v596_v47 = vadd.f32 %v256_v39, %v238_v42 }
  0xac   :  { %v280_v51 = vmul.f32 %v596_v47, %v596_v47  ;;  %v266_v53 = vsel %vm264_vm1, %v596_v47, 0.0  ;;  %v223_v55 = vpop.f32.mrf.mxu3 }
  0xad   :  { %v267_v61 = vadd.f32 %v266_v53, %v265_v57 }
  0xae   :  { %v284_v58 = vsel %vm264_vm1, %v280_v51, 0.0 }
  0xaf   :  { %v240_v46 = vpop.f32.mrf.mxu1  ;;  %v285_v2 = vadd.f32 %v284_v58, %v283_v63 }
  0xb0   :  { %v241_v48 = vadd.f32 %v240_v46, %v221_v43 }
  0xb2   :  { %v600_v50 = vadd.f32 %v259_v45, %v241_v48 }
  0xb4   :  { %v281_v54 = vmul.f32 %v600_v50, %v600_v50  ;;  %v268_v59 = vsel %vm264_vm1, %v600_v50, 0.0 }
  0xb5   :  { %v269_v3 = vadd.f32 %v268_v59, %v267_v61 }
  0xb6   :  { %v286_v0 = vsel %vm264_vm1, %v281_v54, 0.0 }
  0xb7   :  { %v242_v56 = vpop.f32.mrf.mxu1  ;;  %v287_v6 = vadd.f32 %v286_v0, %v285_v2 }
  0xb8   :  { %v243_v60 = vadd.f32 %v242_v56, %v223_v55 }
  0xba   :  { %v262_v1 = vadd.f32 %v261_v62, %v243_v60 }
  0xbc   :  { %v270_v4 = vsel %vm264_vm1, %v262_v1, 0.0  ;;  %v282_v5 = vmul.f32 %v262_v1, %v262_v1 }
  0xbd   :  { %v271_v7 = vadd.f32 %v270_v4, %v269_v3 }
  0xbe   :  { %v288_v8 = vsel %vm264_vm1, %v282_v5, 0.0 }
  0xbf   :  { %v272_v9 = vrot.slane %v271_v7, 4  ;;  %v289_v10 = vadd.f32 %v288_v8, %v287_v6 }
  0xc1   :  { %v273_v11 = vadd.f32 %v272_v9, %v271_v7  ;;  %v290_v12 = vrot.slane %v289_v10, 4 }
  0xc3   :  { %v274_v13 = vrot.slane %v273_v11, 2  ;;  %v291_v14 = vadd.f32 %v290_v12, %v289_v10 }
  0xc5   :  { %v275_v15 = vadd.f32 %v274_v13, %v273_v11  ;;  %v292_v16 = vrot.slane %v291_v14, 2 }
  0xc7   :  { %v276_v17 = vrot.slane %v275_v15, 1  ;;  %v293_v18 = vadd.f32 %v292_v16, %v291_v14 }
  0xc9   :  { %v277_v19 = vadd.f32 %v276_v17, %v275_v15  ;;  %v294_v20 = vrot.slane %v293_v18, 1 }
  0xcb   :  { %v278_v21 = vmul.f32 0.03125, %v277_v19  ;;  %v295_v22 = vadd.f32 %v294_v20, %v293_v18 }
  0xcd   :  { %v296_v23 = vmul.f32 0.03125, %v295_v22  ;;  %v297_v24 = vmul.f32 %v278_v21, %v278_v21 }
  0xcf   :  { %v298_v25 = vsub.f32 %v296_v23, %v297_v24 }
  0xd1   :  { %v299_v26 = vmax.f32 %v298_v25, 0.0 }
  0xd3   :  { %v301_v27 = vadd.f32 1e-05, %v299_v26 }
  0xd5   :  { %477 = vrsqrt.f32 %v301_v27  ;;  %vm308_vm3 = vweird.f32 %v301_v27 }
  0xdb   :  { %v478_v28 = vpop.eup %477 }
  0xdc   :  { %v303_v29 = vmul.f32 %v478_v28, %v301_v27  ;;  %vm309_vm2 = vweird.f32 %v478_v28 }
  0xdd   :  { %vm310_vm4 = vmor %vm308_vm3, %vm309_vm2 }
  0xde   :  { %v304_v30 = vmul.f32 %v478_v28, %v303_v29 }
  0xe0   :  { %v305_v31 = vmul.f32 0.5, %v304_v30 }
  0xe2   :  { %v306_v32 = vsub.f32 1.5, %v305_v31 }
  0xe4   :  { %v307_v34 = vmul.f32 %v478_v28, %v306_v32 }
  0xe6   :  { %v311_v35 = vsel %vm310_vm4, %v478_v28, %v307_v34 }
  0xe7   :  { %v312_v36 = vmul.f32 %v311_v35, %v300_v33 }
  0xe9   :  { %v314_v38 = vmul.f32 %v312_v36, %v278_v21  ;;  %v317_v39 = vperm.slane %v312_v36, 0 }
  0xeb   :  { %v315_v40 = vsub.f32 %v313_v37, %v314_v38  ;;  %v319_v41 = vmul.f32 %v317_v39, %v598_v49  ;;  %v320_v42 = vmul.f32 %v317_v39, %v596_v47  ;;  %v321_v43 = vmul.f32 %v317_v39, %v600_v50 }
  0xec   :  { %v322_v44 = vmul.f32 %v317_v39, %v262_v1 }
  0xed   :  { %v324_v45 = vperm.slane %v315_v40, 0 }
  0xef   :  { %v326_v46 = vadd.f32 %v324_v45, %v319_v41  ;;  %v327_v48 = vadd.f32 %v324_v45, %v320_v42  ;;  %v328_v51 = vadd.f32 %v324_v45, %v321_v43  ;;  %v329_v52 = vadd.f32 %v324_v45, %v322_v44 }
  0xf1   :  { %v330_v53 = vmax.f32 %v326_v46, 0.0  ;;  %v331_v54 = vmax.f32 %v327_v48, 0.0  ;;  %v332_v55 = vmax.f32 %v328_v51, 0.0  ;;  %v333_v56 = vmax.f32 %v329_v52, 0.0 }
  0xf3   :  { %v334_v57 = vpack.c.bf16 %v330_v53, %v330_v53  ;;  %v335_v58 = vpack.c.bf16 %v331_v54, %v331_v54  ;;  %v336_v59 = vpack.c.bf16 %v332_v55, %v332_v55  ;;  %v337_v60 = vpack.c.bf16 %v333_v56, %v333_v56 }
  0xf5   :  { %339 = vst.msk [vmem:[%s644_s4] sm:$0xf] %vm338_vm5, %v334_v57 }
  0xf6   :  { %340 = vst.msk [vmem:[%s644_s4 + $0x4] sm:$0xf] %vm338_vm5, %v335_v58 }
  0xf7   :  { %341 = vst.msk [vmem:[%s644_s4 + $0x8] sm:$0xf] %vm338_vm5, %v336_v59 }
  0xf8   :  { %342 = vst.msk [vmem:[%s644_s4 + $0xc] sm:$0xf] %vm338_vm5, %v337_v60 }

// kernel: model_forward.13
= control target key start
LH: loop header
LB: loop body
LE: loop exit
PB: predicated region body
PF: predicated region fallthrough
CT: control target
= control target key end

     0   :  { %vm368_vm0 = vcmask 523264   ;;  %vm543_vm4 = vcmask 519168   ;;  %s1017_s1 = inlined_call_operand.vmem [shape: bf16[576,64], index: 1, kind: input, shape index: {}]   ;;  %s1018_s0 = inlined_call_operand.vmem [shape: bf16[32,576], index: 0, kind: input, shape index: {}]   ;;  %s1019_s2 = inlined_call_operand.vmem [shape: f32[1,64], index: 2, kind: input, shape index: {}]   ;;  %s1020_s3 = inlined_call_operand.vmem [shape: f32[1,64], index: 3, kind: input, shape index: {}]   ;;  %s1021_s4 = inlined_call_operand.vmem [shape: bf16[32,64], index: 4, kind: output, shape index: {}]  }
   0x1   :  { %v755_v0 = vld [vmem:[%s1017_s1 + $0x38] sm:$0xff]  ;;  %v754_v4 = vld [vmem:[%s1017_s1 + $0x30] sm:$0xff]  ;;  %v753_v8 = vld [vmem:[%s1017_s1 + $0x28] sm:$0xff] }
   0x2   :  { %v763_v1 = vld [vmem:[%s1017_s1 + $0x78] sm:$0xff]  ;;  %375 = vmatpush.bf16.msra.mxu0 %v755_v0  ;;  %v762_v5 = vld [vmem:[%s1017_s1 + $0x70] sm:$0xff]  ;;  %v761_v9 = vld [vmem:[%s1017_s1 + $0x68] sm:$0xff] }
   0x3   :  { %v771_v2 = vld [vmem:[%s1017_s1 + $0xb8] sm:$0xff]  ;;  %394 = vmatpush.bf16.msra.mxu1 %v763_v1  ;;  %v770_v6 = vld [vmem:[%s1017_s1 + $0xb0] sm:$0xff]  ;;  %v769_v10 = vld [vmem:[%s1017_s1 + $0xa8] sm:$0xff] }
   0x4   :  { %v779_v3 = vld [vmem:[%s1017_s1 + $0xf8] sm:$0xff]  ;;  %413 = vmatpush.bf16.msra.mxu2 %v771_v2  ;;  %v778_v7 = vld [vmem:[%s1017_s1 + $0xf0] sm:$0xff]  ;;  %v777_v11 = vld [vmem:[%s1017_s1 + $0xe8] sm:$0xff] }
   0x5   :  { %432 = vmatpush.bf16.msra.mxu3 %v779_v3  ;;  %v752_v12 = vld [vmem:[%s1017_s1 + $0x20] sm:$0xff]  ;;  %v751_v16 = vld [vmem:[%s1017_s1 + $0x18] sm:$0xff]  ;;  %v750_v20 = vld [vmem:[%s1017_s1 + $0x10] sm:$0xff] }
   0x6   :  { %376 = vmatpush.bf16.msra.mxu0 %v754_v4  ;;  %v760_v13 = vld [vmem:[%s1017_s1 + $0x60] sm:$0xff]  ;;  %v759_v17 = vld [vmem:[%s1017_s1 + $0x58] sm:$0xff]  ;;  %v758_v21 = vld [vmem:[%s1017_s1 + $0x50] sm:$0xff] }
   0x7   :  { %395 = vmatpush.bf16.msra.mxu1 %v762_v5  ;;  %v768_v14 = vld [vmem:[%s1017_s1 + $0xa0] sm:$0xff]  ;;  %v767_v18 = vld [vmem:[%s1017_s1 + $0x98] sm:$0xff]  ;;  %v766_v22 = vld [vmem:[%s1017_s1 + $0x90] sm:$0xff] }
   0x8   :  { %414 = vmatpush.bf16.msra.mxu2 %v770_v6  ;;  %v776_v15 = vld [vmem:[%s1017_s1 + $0xe0] sm:$0xff]  ;;  %v775_v19 = vld [vmem:[%s1017_s1 + $0xd8] sm:$0xff]  ;;  %v774_v23 = vld [vmem:[%s1017_s1 + $0xd0] sm:$0xff] }
   0x9   :  { %433 = vmatpush.bf16.msra.mxu3 %v778_v7  ;;  %v749_v24 = vld [vmem:[%s1017_s1 + $0x8] sm:$0xff]  ;;  %v748_v28 = vld [vmem:[%s1017_s1] sm:$0xff]  ;;  %v740_v33 = vld [vmem:[%s1018_s0 + $0x10] sm:$0xf0] }
   0xa   :  { %377 = vmatpush.bf16.msra.mxu0 %v753_v8  ;;  %v757_v25 = vld [vmem:[%s1017_s1 + $0x48] sm:$0xff]  ;;  %v756_v29 = vld [vmem:[%s1017_s1 + $0x40] sm:$0xff]  ;;  %v556_v35 = vld [vmem:[%s1018_s0 + $0x14] sm:$0xf0] }
   0xb   :  { %396 = vmatpush.bf16.msra.mxu1 %v761_v9  ;;  %v765_v26 = vld [vmem:[%s1017_s1 + $0x88] sm:$0xff]  ;;  %v764_v30 = vld [vmem:[%s1017_s1 + $0x80] sm:$0xff]  ;;  %v741_v37 = vld [vmem:[%s1018_s0 + $0x18] sm:$0xf0] }
   0xc   :  { %415 = vmatpush.bf16.msra.mxu2 %v769_v10  ;;  %v773_v27 = vld [vmem:[%s1017_s1 + $0xc8] sm:$0xff]  ;;  %v772_v31 = vld [vmem:[%s1017_s1 + $0xc0] sm:$0xff]  ;;  %v783_v40 = vld [vmem:[%s1017_s1 + $0x118] sm:$0xff] }
   0xd   :  { %434 = vmatpush.bf16.msra.mxu3 %v777_v11  ;;  %v554_v32 = vld [vmem:[%s1018_s0] sm:$0xf]  ;;  %v738_v34 = vld [vmem:[%s1018_s0 + $0x4] sm:$0xf]  ;;  %v562_v36 = vld [vmem:[%s1018_s0 + $0x8] sm:$0xf] }
   0xe   :  { %378 = vmatpush.bf16.msra.mxu0 %v752_v12  ;;  %v739_v38 = vld [vmem:[%s1018_s0 + $0xc] sm:$0xf]  ;;  %v564_v39 = vld [vmem:[%s1018_s0 + $0x1c] sm:$0xf0]  ;;  %v555_v41 = vor.u32 %v740_v33, %v554_v32  ;;  %v559_v42 = vor.u32 %v738_v34, %v556_v35  ;;  %v563_v43 = vor.u32 %v741_v37, %v562_v36  ;;  %v782_v45 = vld [vmem:[%s1017_s1 + $0x110] sm:$0xff] }
   0xf   :  { %397 = vmatpush.bf16.msra.mxu1 %v760_v13  ;;  %v567_v44 = vor.u32 %v739_v38, %v564_v39  ;;  %v781_v46 = vld [vmem:[%s1017_s1 + $0x108] sm:$0xff]  ;;  %v780_v47 = vld [vmem:[%s1017_s1 + $0x100] sm:$0xff]  ;;  %v745_v49 = vld [vmem:[%s1018_s0 + $0x38] sm:$0xf0] }
  0x10   :  { %416 = vmatpush.bf16.msra.mxu2 %v768_v14  ;;  %v574_v48 = vld [vmem:[%s1018_s0 + $0x28] sm:$0xf]  ;;  %v743_v50 = vld [vmem:[%s1018_s0 + $0x2c] sm:$0xf]  ;;  %v576_v51 = vld [vmem:[%s1018_s0 + $0x3c] sm:$0xf0] }
  0x11   :  { %435 = vmatpush.bf16.msra.mxu3 %v776_v15  ;;  %v582_v52 = vld [vmem:[%s1018_s0 + $0x30] sm:$0xf]  ;;  %v746_v53 = vld [vmem:[%s1018_s0 + $0x40] sm:$0xf0]  ;;  %v744_v54 = vld [vmem:[%s1018_s0 + $0x34] sm:$0xf]  ;;  %v575_v56 = vor.u32 %v745_v49, %v574_v48  ;;  %v579_v57 = vor.u32 %v743_v50, %v576_v51 }
  0x12   :  { %379 = vmatpush.bf16.msra.mxu0 %v751_v16  ;;  %v584_v55 = vld [vmem:[%s1018_s0 + $0x44] sm:$0xf0]  ;;  %v583_v58 = vor.u32 %v746_v53, %v582_v52  ;;  %v570_v60 = vld [vmem:[%s1018_s0 + $0x10] sm:$0xf]  ;;  %v742_v61 = vld [vmem:[%s1018_s0 + $0x20] sm:$0xf0] }
  0x13   :  { %398 = vmatpush.bf16.msra.mxu1 %v759_v17  ;;  %v587_v59 = vor.u32 %v744_v54, %v584_v55  ;;  %v590_v62 = vld [vmem:[%s1018_s0 + $0x38] sm:$0xf]  ;;  %v747_v63 = vld [vmem:[%s1018_s0 + $0x48] sm:$0xf0]  ;;  %v571_v0 = vor.u32 %v742_v61, %v570_v60 }
  0x14   :  { %417 = vmatpush.bf16.msra.mxu2 %v767_v18  ;;  %v591_v1 = vor.u32 %v747_v63, %v590_v62 }
  0x15   :  { %436 = vmatpush.bf16.msra.mxu3 %v775_v19 }
  0x16   :  { %380 = vmatpush.bf16.msra.mxu0 %v750_v20 }
  0x17   :  { %399 = vmatpush.bf16.msra.mxu1 %v758_v21 }
  0x18   :  { %418 = vmatpush.bf16.msra.mxu2 %v766_v22 }
  0x19   :  { %437 = vmatpush.bf16.msra.mxu3 %v774_v23 }
  0x1a   :  { %381 = vmatpush.bf16.msra.mxu0 %v749_v24 }
  0x1b   :  { %400 = vmatpush.bf16.msra.mxu1 %v757_v25 }
  0x1c   :  { %419 = vmatpush.bf16.msra.mxu2 %v765_v26 }
  0x1d   :  { %438 = vmatpush.bf16.msra.mxu3 %v773_v27 }
  0x1e   :  { %382 = vmatpush.bf16.msra.mxu0 %v748_v28 }
  0x1f   :  { %401 = vmatpush.bf16.msra.mxu1 %v756_v29 }
  0x20   :  { %420 = vmatpush.bf16.msra.mxu2 %v764_v30 }
  0x21   :  { %439 = vmatpush.bf16.msra.mxu3 %v772_v31  ;;  %383 = vmatmul.bf16.vlgmr.msra.gmra.mxu0 %v555_v41 }
  0x22   :  { %455 = vmatpush.bf16.msrb.mxu0 %v783_v40  ;;  %402 = vmatmul.bf16.vlgmr.msra.gmra.mxu1 %v559_v42 }
  0x23   :  { %784 = vmatpush.bf16.msrb.mxu1 %v783_v40  ;;  %421 = vmatmul.bf16.vlgmr.msra.gmra.mxu2 %v563_v43 }
  0x24   :  { %440 = vmatmul.bf16.vlgmr.msra.gmra.mxu3 %v567_v44 }
  0x26   :  { %456 = vmatpush.bf16.msrb.mxu0 %v782_v45 }
  0x27   :  { %785 = vmatpush.bf16.msrb.mxu1 %v782_v45 }
  0x2a   :  { %457 = vmatpush.bf16.msrb.mxu0 %v781_v46 }
  0x2b   :  { %786 = vmatpush.bf16.msrb.mxu1 %v781_v46 }
  0x2e   :  { %458 = vmatpush.bf16.msrb.mxu0 %v780_v47 }
  0x2f   :  { %787 = vmatpush.bf16.msrb.mxu1 %v780_v47 }
  0x31   :  { %388 = vmatmul.bf16.gmra.mxu0 %v575_v56 }
  0x32   :  { %407 = vmatmul.bf16.gmra.mxu1 %v579_v57 }
  0x33   :  { %426 = vmatmul.bf16.gmra.mxu2 %v583_v58 }
  0x34   :  { %445 = vmatmul.bf16.gmra.mxu3 %v587_v59 }
  0x41   :  { %736 = vmatmul.msk.bf16.vlgmr.msrb.gmra.mxu0 %vm368_vm0, %v571_v0 }
  0x42   :  { %737 = vmatmul.msk.bf16.vlgmr.msrb.gmra.mxu1 %vm368_vm0, %v591_v1 }
  0x9e   :  { %v384_v2 = vpop.f32.mrf.mxu0 }
  0x9f   :  { %v403_v3 = vpop.f32.mrf.mxu1 }
  0xa0   :  { %v404_v16 = vadd.f32 %v403_v3, %v384_v2 }
  0xa6   :  { %v422_v4 = vpop.f32.mrf.mxu2  ;;  %v386_v6 = vpop.f32.mrf.mxu0 }
  0xa7   :  { %v441_v5 = vpop.f32.mrf.mxu3  ;;  %v405_v7 = vpop.f32.mrf.mxu1  ;;  %v423_v17 = vadd.f32 %v422_v4, %v404_v16 }
  0xa8   :  { %v406_v22 = vadd.f32 %v405_v7, %v386_v6 }
  0xa9   :  { %v442_v25 = vadd.f32 %v441_v5, %v423_v17 }
  0xae   :  { %v424_v8 = vpop.f32.mrf.mxu2  ;;  %v389_v10 = vpop.f32.mrf.mxu0 }
  0xaf   :  { %v443_v9 = vpop.f32.mrf.mxu3  ;;  %v408_v11 = vpop.f32.mrf.mxu1  ;;  %v425_v26 = vadd.f32 %v424_v8, %v406_v22 }
  0xb0   :  { %v409_v18 = vadd.f32 %v408_v11, %v389_v10 }
  0xb1   :  { %v444_v31 = vadd.f32 %v443_v9, %v425_v26 }
  0xb6   :  { %v427_v12 = vpop.f32.mrf.mxu2  ;;  %v391_v13 = vpop.f32.mrf.mxu0 }
  0xb7   :  { %v410_v14 = vpop.f32.mrf.mxu1  ;;  %v446_v15 = vpop.f32.mrf.mxu3  ;;  %v428_v23 = vadd.f32 %v427_v12, %v409_v18 }
  0xb8   :  { %v411_v24 = vadd.f32 %v410_v14, %v391_v13 }
  0xb9   :  { %v447_v29 = vadd.f32 %v446_v15, %v428_v23  ;;  %v505_v15 = vld [vmem:[%s1019_s2] sm:$0x1] }
  0xbe   :  { %v429_v19 = vpop.f32.mrf.mxu2  ;;  %v460_v20 = vpop.f32.mrf.mxu0 }
  0xbf   :  { %v465_v21 = vpop.f32.mrf.mxu1  ;;  %v430_v27 = vadd.f32 %v429_v19, %v411_v24  ;;  %v448_v28 = vpop.f32.mrf.mxu3  ;;  %v985_v30 = vadd.f32 %v460_v20, %v442_v25  ;;  %v518_v19 = vld [vmem:[%s1020_s3] sm:$0x1] }
  0xc0   :  { %v466_v33 = vadd.f32 %v465_v21, %v447_v29 }
  0xc1   :  { %v449_v32 = vadd.f32 %v448_v28, %v430_v27  ;;  %v484_v36 = vmul.f32 %v985_v30, %v985_v30  ;;  %v470_v39 = vsel %vm368_vm0, %v985_v30, 0.0 }
  0xc2   :  { %v486_v40 = vmul.f32 %v466_v33, %v466_v33  ;;  %v473_v45 = vsel %vm368_vm0, %v466_v33, 0.0 }
  0xc3   :  { %v488_v44 = vsel %vm368_vm0, %v484_v36, 0.0 }
  0xc4   :  { %v491_v50 = vsel %vm368_vm0, %v486_v40, 0.0 }
  0xc6   :  { %v462_v34 = vpop.f32.mrf.mxu0 }
  0xc7   :  { %v467_v35 = vpop.f32.mrf.mxu1  ;;  %v463_v37 = vadd.f32 %v462_v34, %v444_v31 }
  0xc8   :  { %v468_v38 = vadd.f32 %v467_v35, %v449_v32 }
  0xc9   :  { %v471_v41 = vsel %vm368_vm0, %v463_v37, 0.0  ;;  %v485_v42 = vmul.f32 %v463_v37, %v463_v37 }
  0xca   :  { %v472_v43 = vadd.f32 %v471_v41, %v470_v39  ;;  %v487_v47 = vmul.f32 %v468_v38, %v468_v38  ;;  %v475_v51 = vsel %vm368_vm0, %v468_v38, 0.0 }
  0xcb   :  { %v489_v46 = vsel %vm368_vm0, %v485_v42, 0.0 }
  0xcc   :  { %v490_v48 = vadd.f32 %v489_v46, %v488_v44  ;;  %v474_v49 = vadd.f32 %v473_v45, %v472_v43  ;;  %v493_v54 = vsel %vm368_vm0, %v487_v47, 0.0 }
  0xce   :  { %v476_v52 = vadd.f32 %v475_v51, %v474_v49  ;;  %v492_v53 = vadd.f32 %v491_v50, %v490_v48 }
  0xd0   :  { %v477_v55 = vrot.slane %v476_v52, 4  ;;  %v494_v56 = vadd.f32 %v493_v54, %v492_v53 }
  0xd2   :  { %v478_v57 = vadd.f32 %v477_v55, %v476_v52  ;;  %v495_v58 = vrot.slane %v494_v56, 4 }
  0xd4   :  { %v479_v59 = vrot.slane %v478_v57, 2  ;;  %v496_v60 = vadd.f32 %v495_v58, %v494_v56 }
  0xd6   :  { %v480_v61 = vadd.f32 %v479_v59, %v478_v57  ;;  %v497_v62 = vrot.slane %v496_v60, 2 }
  0xd8   :  { %v481_v63 = vrot.slane %v480_v61, 1  ;;  %v498_v0 = vadd.f32 %v497_v62, %v496_v60 }
  0xda   :  { %v482_v1 = vadd.f32 %v481_v63, %v480_v61  ;;  %v499_v2 = vrot.slane %v498_v0, 1 }
  0xdc   :  { %v483_v3 = vmul.f32 0.03125, %v482_v1  ;;  %v500_v4 = vadd.f32 %v499_v2, %v498_v0 }
  0xde   :  { %v501_v5 = vmul.f32 0.03125, %v500_v4  ;;  %v502_v6 = vmul.f32 %v483_v3, %v483_v3 }
  0xe0   :  { %v503_v7 = vsub.f32 %v501_v5, %v502_v6 }
  0xe2   :  { %v504_v8 = vmax.f32 %v503_v7, 0.0 }
  0xe4   :  { %v506_v9 = vadd.f32 1e-05, %v504_v8 }
  0xe6   :  { %788 = vrsqrt.f32 %v506_v9  ;;  %vm513_vm2 = vweird.f32 %v506_v9 }
  0xec   :  { %v789_v10 = vpop.eup %788 }
  0xed   :  { %v508_v11 = vmul.f32 %v789_v10, %v506_v9  ;;  %vm514_vm1 = vweird.f32 %v789_v10 }
  0xee   :  { %vm515_vm3 = vmor %vm513_vm2, %vm514_vm1 }
  0xef   :  { %v509_v12 = vmul.f32 %v789_v10, %v508_v11 }
  0xf1   :  { %v510_v13 = vmul.f32 0.5, %v509_v12 }
  0xf3   :  { %v511_v14 = vsub.f32 1.5, %v510_v13 }
  0xf5   :  { %v512_v16 = vmul.f32 %v789_v10, %v511_v14 }
  0xf7   :  { %v516_v17 = vsel %vm515_vm3, %v789_v10, %v512_v16 }
  0xf8   :  { %v517_v18 = vmul.f32 %v516_v17, %v505_v15 }
  0xfa   :  { %v519_v20 = vmul.f32 %v517_v18, %v483_v3  ;;  %v522_v21 = vperm.slane %v517_v18, 0 }
  0xfc   :  { %v520_v22 = vsub.f32 %v518_v19, %v519_v20  ;;  %v524_v23 = vmul.f32 %v522_v21, %v985_v30  ;;  %v525_v24 = vmul.f32 %v522_v21, %v463_v37  ;;  %v526_v25 = vmul.f32 %v522_v21, %v466_v33 }
  0xfd   :  { %v527_v26 = vmul.f32 %v522_v21, %v468_v38 }
  0xfe   :  { %v529_v27 = vperm.slane %v520_v22, 0 }
 0x100   :  { %v531_v28 = vadd.f32 %v529_v27, %v524_v23  ;;  %v532_v29 = vadd.f32 %v529_v27, %v525_v24  ;;  %v533_v31 = vadd.f32 %v529_v27, %v526_v25  ;;  %v534_v32 = vadd.f32 %v529_v27, %v527_v26 }
 0x102   :  { %v535_v34 = vmax.f32 %v531_v28, 0.0  ;;  %v536_v35 = vmax.f32 %v532_v29, 0.0  ;;  %v537_v36 = vmax.f32 %v533_v31, 0.0  ;;  %v538_v39 = vmax.f32 %v534_v32, 0.0 }
 0x104   :  { %v539_v40 = vpack.c.bf16 %v535_v34, %v535_v34  ;;  %v540_v41 = vpack.c.bf16 %v536_v35, %v536_v35  ;;  %v541_v42 = vpack.c.bf16 %v537_v36, %v537_v36  ;;  %v542_v43 = vpack.c.bf16 %v538_v39, %v538_v39 }
 0x106   :  { %544 = vst.msk [vmem:[%s1021_s4] sm:$0xf] %vm543_vm4, %v539_v40 }
 0x107   :  { %545 = vst.msk [vmem:[%s1021_s4 + $0x4] sm:$0xf] %vm543_vm4, %v540_v41 }
 0x108   :  { %546 = vst.msk [vmem:[%s1021_s4 + $0x8] sm:$0xf] %vm543_vm4, %v541_v42 }
 0x109   :  { %547 = vst.msk [vmem:[%s1021_s4 + $0xc] sm:$0xf] %vm543_vm4, %v542_v43 }

// kernel: model_forward.14
= control target key start
LH: loop header
LB: loop body
LE: loop exit
PB: predicated region body
PF: predicated region fallthrough
CT: control target
= control target key end

     0   :  { %vm182_vm0 = vcmask 518144   ;;  %s346_s1 = inlined_call_operand.vmem [shape: bf16[256,64], index: 1, kind: input, shape index: {}]   ;;  %s347_s2 = inlined_call_operand.vmem [shape: f32[1,64], index: 2, kind: input, shape index: {}]   ;;  %s348_s0 = inlined_call_operand.vmem [shape: bf16[6,256], index: 0, kind: input, shape index: {}]   ;;  %s349_s3 = inlined_call_operand.vmem [shape: bf16[6,64], index: 3, kind: output, shape index: {}]  }
   0x1   :  { %v259_v0 = vld [vmem:[%s346_s1 + $0x38] sm:$0xff]  ;;  %v258_v2 = vld [vmem:[%s346_s1 + $0x30] sm:$0xff]  ;;  %v257_v4 = vld [vmem:[%s346_s1 + $0x28] sm:$0xff] }
   0x2   :  { %v267_v1 = vld [vmem:[%s346_s1 + $0x78] sm:$0xff]  ;;  %154 = vmatpush.bf16.msra.mxu0 %v259_v0  ;;  %v266_v3 = vld [vmem:[%s346_s1 + $0x70] sm:$0xff]  ;;  %v265_v5 = vld [vmem:[%s346_s1 + $0x68] sm:$0xff] }
   0x3   :  { %167 = vmatpush.bf16.msra.mxu1 %v267_v1  ;;  %v256_v6 = vld [vmem:[%s346_s1 + $0x20] sm:$0xff]  ;;  %v255_v8 = vld [vmem:[%s346_s1 + $0x18] sm:$0xff]  ;;  %v254_v10 = vld [vmem:[%s346_s1 + $0x10] sm:$0xff] }
   0x4   :  { %v264_v7 = vld [vmem:[%s346_s1 + $0x60] sm:$0xff]  ;;  %v263_v9 = vld [vmem:[%s346_s1 + $0x58] sm:$0xff]  ;;  %v262_v11 = vld [vmem:[%s346_s1 + $0x50] sm:$0xff] }
   0x5   :  { %v253_v12 = vld [vmem:[%s346_s1 + $0x8] sm:$0xff]  ;;  %v14_v14 = vld [vmem:[%s348_s0] sm:$0x77] }
   0x6   :  { %155 = vmatpush.bf16.msra.mxu0 %v258_v2  ;;  %v261_v13 = vld [vmem:[%s346_s1 + $0x48] sm:$0xff]  ;;  %v52_v15 = vunpack.c.l.b16 %v14_v14  ;;  %v53_v16 = vunpack.c.h.b16 %v14_v14  ;;  %v252_v17 = vld [vmem:[%s346_s1] sm:$0xff] }
   0x7   :  { %168 = vmatpush.bf16.msra.mxu1 %v266_v3  ;;  %v260_v18 = vld [vmem:[%s346_s1 + $0x40] sm:$0xff] }
   0x8   :  { %v54_v19 = vpack.c.b16 %v52_v15, %v52_v15  ;;  %v55_v20 = vpack.c.b16 %v53_v16, %v53_v16  ;;  %v268_v21 = vld [vmem:[%s347_s2] ss:$0 sm:$0xff] }
   0xa   :  { %156 = vmatpush.bf16.msra.mxu0 %v257_v4 }
   0xb   :  { %169 = vmatpush.bf16.msra.mxu1 %v265_v5 }
   0xe   :  { %157 = vmatpush.bf16.msra.mxu0 %v256_v6 }
   0xf   :  { %170 = vmatpush.bf16.msra.mxu1 %v264_v7 }
  0x12   :  { %158 = vmatpush.bf16.msra.mxu0 %v255_v8 }
  0x13   :  { %171 = vmatpush.bf16.msra.mxu1 %v263_v9 }
  0x16   :  { %159 = vmatpush.bf16.msra.mxu0 %v254_v10 }
  0x17   :  { %172 = vmatpush.bf16.msra.mxu1 %v262_v11 }
  0x1a   :  { %160 = vmatpush.bf16.msra.mxu0 %v253_v12 }
  0x1b   :  { %173 = vmatpush.bf16.msra.mxu1 %v261_v13 }
  0x1e   :  { %161 = vmatpush.bf16.msra.mxu0 %v252_v17 }
  0x1f   :  { %174 = vmatpush.bf16.msra.mxu1 %v260_v18 }
  0x21   :  { %162 = vmatmul.bf16.vlgmr.msra.gmra.mxu0 %v54_v19 }
  0x22   :  { %175 = vmatmul.bf16.vlgmr.msra.gmra.mxu1 %v55_v20 }
  0x9e   :  { %v163_v22 = vpop.f32.mrf.mxu0 }
  0x9f   :  { %v176_v23 = vpop.f32.mrf.mxu1  ;;  %v164_v24 = vadd.f32 %v268_v21, %v163_v22 }
  0xa1   :  { %v177_v25 = vadd.f32 %v176_v23, %v164_v24 }
  0xa3   :  { %v180_v26 = vmax.f32 %v177_v25, 0.0 }
  0xa5   :  { %v181_v27 = vpack.c.bf16 %v180_v26, %v180_v26 }
  0xa6   :  { %v165_v28 = vpop.f32.mrf.mxu0 }
  0xa7   :  { %v178_v29 = vpop.f32.mrf.mxu1  ;;  %183 = vst.msk [vmem:[%s349_s3] sm:$0x7] %vm182_vm0, %v181_v27 }

// kernel: model_forward.15
= control target key start
LH: loop header
LB: loop body
LE: loop exit
PB: predicated region body
PF: predicated region fallthrough
CT: control target
= control target key end

     0   :  { %vm101_vm0 = vcmask 523264   ;;  %v1903_v50 = vmov 0.0|0.0   ;;  %s1905_s23 = smov 32   ;;  %vm296_vm9 = vcmask 254976   ;;  %vm310_vm10 = vcmask 261120   ;;  %s2526_s1 = inlined_call_operand.vmem [shape: bf16[64,256], index: 1, kind: input, shape index: {}]   ;;  %s2527_s3 = inlined_call_operand.vmem [shape: bf16[64,256], index: 3, kind: input, shape index: {}]   ;;  %s2528_s0 = inlined_call_operand.vmem [shape: f32[6,64], index: 0, kind: input, shape index: {}]   ;;  %s2529_s2 = inlined_call_operand.vmem [shape: f32[1,256], index: 2, kind: input, shape index: {}]   ;;  %s2530_s4 = inlined_call_operand.vmem [shape: bf16[64,32], index: 4, kind: input, shape index: {}]   ;;  %s2531_s5 = inlined_call_operand.vmem [shape: f32[1,32], index: 5, kind: input, shape index: {}]   ;;  %s2532_s6 = inlined_call_operand.vmem [shape: bf16[32,256], index: 6, kind: input, shape index: {}]   ;;  %s2533_s8 = inlined_call_operand.vmem [shape: bf16[64,256], index: 8, kind: input, shape index: {}]   ;;  %s2534_s7 = inlined_call_operand.vmem [shape: f32[1,256], index: 7, kind: input, shape index: {}]   ;;  %s2535_s9 = inlined_call_operand.vmem [shape: bf16[64,32], index: 9, kind: input, shape index: {}]   ;;  %s2536_s10 = inlined_call_operand.vmem [shape: f32[1,32], index: 10, kind: input, shape index: {}]   ;;  %s2537_s11 = inlined_call_operand.vmem [shape: bf16[32,10], index: 11, kind: input, shape index: {}]   ;;  %s2538_s12 = inlined_call_operand.vmem [shape: f32[1,10], index: 12, kind: input, shape index: {}]   ;;  %s2539_s13 = inlined_call_operand.vmem [shape: f32[6,10], index: 13, kind: output, shape index: {}]  }
   0x1   :  { %v1450_v0 = vld [vmem:[%s2526_s1 + $0x30] sm:$0xf]  ;;  %v1738_v1 = vld [vmem:[%s2526_s1 + $0x34] sm:$0xf0]  ;;  %v1737_v2 = vld [vmem:[%s2526_s1 + $0x34] sm:$0xf] }
   0x2   :  { %v1451_v3 = vor.u32 %v1738_v1, %v1450_v0  ;;  %v1452_v4 = vld [vmem:[%s2526_s1 + $0x38] sm:$0xf0]  ;;  %v1745_v5 = vld [vmem:[%s2527_s3 + $0x34] sm:$0xf]  ;;  %v1442_v9 = vld [vmem:[%s2526_s1 + $0x20] sm:$0xf] }
   0x3   :  { %v1486_v6 = vld [vmem:[%s2527_s3 + $0x38] sm:$0xf0]  ;;  %v1455_v7 = vor.u32 %v1737_v2, %v1452_v4  ;;  %v1736_v10 = vld [vmem:[%s2526_s1 + $0x24] sm:$0xf0]  ;;  %v1735_v11 = vld [vmem:[%s2526_s1 + $0x24] sm:$0xf] }
   0x4   :  { %v1489_v8 = vor.u32 %v1745_v5, %v1486_v6  ;;  %109 = vmatpush.bf16.msra.mxu0 %v1451_v3  ;;  %v1443_v12 = vor.u32 %v1736_v10, %v1442_v9  ;;  %v1444_v13 = vld [vmem:[%s2526_s1 + $0x28] sm:$0xf0]  ;;  %v1484_v14 = vld [vmem:[%s2527_s3 + $0x30] sm:$0xf]  ;;  %v1746_v15 = vld [vmem:[%s2527_s3 + $0x34] sm:$0xf0] }
   0x5   :  { %122 = vmatpush.bf16.msra.mxu1 %v1455_v7  ;;  %v1447_v16 = vor.u32 %v1735_v11, %v1444_v13  ;;  %v1485_v17 = vor.u32 %v1746_v15, %v1484_v14  ;;  %v1743_v18 = vld [vmem:[%s2527_s3 + $0x24] sm:$0xf]  ;;  %v1478_v19 = vld [vmem:[%s2527_s3 + $0x28] sm:$0xf0]  ;;  %v1434_v20 = vld [vmem:[%s2526_s1 + $0x10] sm:$0xf] }
   0x6   :  { %204 = vmatpush.bf16.msra.mxu3 %v1489_v8  ;;  %v1481_v21 = vor.u32 %v1743_v18, %v1478_v19  ;;  %v1734_v22 = vld [vmem:[%s2526_s1 + $0x14] sm:$0xf0]  ;;  %v1733_v23 = vld [vmem:[%s2526_s1 + $0x14] sm:$0xf]  ;;  %v1436_v24 = vld [vmem:[%s2526_s1 + $0x18] sm:$0xf0] }
   0x7   :  { %191 = vmatpush.bf16.msra.mxu2 %v1485_v17  ;;  %v1476_v25 = vld [vmem:[%s2527_s3 + $0x20] sm:$0xf]  ;;  %v1744_v26 = vld [vmem:[%s2527_s3 + $0x24] sm:$0xf0]  ;;  %v1741_v27 = vld [vmem:[%s2527_s3 + $0x14] sm:$0xf]  ;;  %v1435_v28 = vor.u32 %v1734_v22, %v1434_v20  ;;  %v1439_v33 = vor.u32 %v1733_v23, %v1436_v24 }
   0x8   :  { %110 = vmatpush.bf16.msra.mxu0 %v1443_v12  ;;  %v1477_v29 = vor.u32 %v1744_v26, %v1476_v25  ;;  %v1470_v30 = vld [vmem:[%s2527_s3 + $0x18] sm:$0xf0]  ;;  %v1426_v31 = vld [vmem:[%s2526_s1] sm:$0xf]  ;;  %v1732_v32 = vld [vmem:[%s2526_s1 + $0x4] sm:$0xf0] }
   0x9   :  { %123 = vmatpush.bf16.msra.mxu1 %v1447_v16  ;;  %v1473_v34 = vor.u32 %v1741_v27, %v1470_v30  ;;  %v1731_v35 = vld [vmem:[%s2526_s1 + $0x4] sm:$0xf]  ;;  %v1428_v36 = vld [vmem:[%s2526_s1 + $0x8] sm:$0xf0]  ;;  %v1468_v37 = vld [vmem:[%s2527_s3 + $0x10] sm:$0xf]  ;;  %v1427_v42 = vor.u32 %v1732_v32, %v1426_v31 }
   0xa   :  { %205 = vmatpush.bf16.msra.mxu3 %v1481_v21  ;;  %v1742_v38 = vld [vmem:[%s2527_s3 + $0x14] sm:$0xf0]  ;;  %v1739_v39 = vld [vmem:[%s2527_s3 + $0x4] sm:$0xf]  ;;  %v1462_v40 = vld [vmem:[%s2527_s3 + $0x8] sm:$0xf0]  ;;  %v1431_v46 = vor.u32 %v1731_v35, %v1428_v36 }
   0xb   :  { %192 = vmatpush.bf16.msra.mxu2 %v1477_v29  ;;  %v1469_v41 = vor.u32 %v1742_v38, %v1468_v37  ;;  %v45_v43 = vld [vmem:[%s2528_s0] sm:$0x3f]  ;;  %v1740_v45 = vld [vmem:[%s2527_s3 + $0x4] sm:$0xf0]  ;;  %v1465_v47 = vor.u32 %v1739_v39, %v1462_v40 }
   0xc   :  { %111 = vmatpush.bf16.msra.mxu0 %v1435_v28  ;;  %v1460_v44 = vld [vmem:[%s2527_s3] sm:$0xf]  ;;  %v46_v48 = vpack.c.bf16 %v45_v43, %v45_v43 }
   0xd   :  { %124 = vmatpush.bf16.msra.mxu1 %v1439_v33  ;;  %v1461_v49 = vor.u32 %v1740_v45, %v1460_v44  ;;  %v55_v51 = vld [vmem:[%s2529_s2] sm:$0x3]  ;;  %s1904_s2 = smov 64   ;;  %v1753_v45 = vld [vmem:[%s2527_s3 + $0x34] sm:$0xf] }
   0xe   :  { %206 = vmatpush.bf16.msra.mxu3 %v1473_v34  ;;  %v57_v52 = vperm.slane %v55_v51, 0  ;;  %v58_v53 = vperm.slane %v55_v51, 1  ;;  %v1751_v51 = vld [vmem:[%s2527_s3 + $0x24] sm:$0xf] }
   0xf   :  { %193 = vmatpush.bf16.msra.mxu2 %v1469_v41 }
  0x10   :  { %112 = vmatpush.bf16.msra.mxu0 %v1427_v42 }
  0x11   :  { %125 = vmatpush.bf16.msra.mxu1 %v1431_v46  ;;  %v1520_v46 = vld [vmem:[%s2527_s3 + $0x38] sm:$0xf0] }
  0x12   :  { %207 = vmatpush.bf16.msra.mxu3 %v1465_v47  ;;  %v1518_v47 = vld [vmem:[%s2527_s3 + $0x30] sm:$0xf] }
  0x13   :  { %1456 = vmatmul.msk.bf16.vlgmr.msra.gmra.mxu0 %vm101_vm0, %v46_v48  ;;  %194 = vmatpush.bf16.msra.mxu2 %v1461_v49  ;;  %v1754_v49 = vld [vmem:[%s2527_s3 + $0x34] sm:$0xf0] }
  0x14   :  { %1457 = vmatmul.msk.bf16.vlgmr.msra.gmra.mxu1 %vm101_vm0, %v46_v48  ;;  %v1523_v48 = vor.u32 %v1753_v45, %v1520_v46 }
  0x15   :  { %208 = vmatmul.bf16.vlgmr.msra.gmra.mxu3 %v1903_v50 }
  0x16   :  { %195 = vmatmul.bf16.vlgmr.msra.gmra.mxu2 %v1903_v50  ;;  %381 = vmatpush.bf16.msrb.mxu1 %v1523_v48 }
  0x90   :  { %v114_v54 = vpop.f32.mrf.mxu0 }
  0x91   :  { %v115_v55 = vadd.f32 %v114_v54, %v57_v52  ;;  %v127_v56 = vpop.f32.mrf.mxu1  ;;  %v1512_v52 = vld [vmem:[%s2527_s3 + $0x28] sm:$0xf0]  ;;  %v1510_v54 = vld [vmem:[%s2527_s3 + $0x20] sm:$0xf] }
  0x92   :  { %v128_v57 = vadd.f32 %v127_v56, %v58_v53  ;;  %v1519_v53 = vor.u32 %v1754_v49, %v1518_v47  ;;  %v1515_v56 = vor.u32 %v1751_v51, %v1512_v52 }
  0x93   :  { %131 = vst [vmem:[#allocation2] sm:$0x3f] %v115_v55  ;;  %v1752_v55 = vld [vmem:[%s2527_s3 + $0x24] sm:$0xf0] }
  0x94   :  { %132 = vst [vmem:[#allocation2 + $0x8] sm:$0x3f] %v128_v57  ;;  %368 = vmatpush.bf16.msrb.mxu0 %v1519_v53  ;;  %v1511_v57 = vor.u32 %v1752_v55, %v1510_v54  ;;  %382 = vmatpush.bf16.msrb.mxu1 %v1515_v56 }
  0x98   :  { %v209_v58 = vpop.f32.mrf.mxu3  ;;  %v116_v60 = vpop.f32.mrf.mxu0  ;;  %369 = vmatpush.bf16.msrb.mxu0 %v1511_v57 }
  0x99   :  { %v215_v59 = vrot.slane %v209_v58, 4  ;;  %v129_v61 = vpop.f32.mrf.mxu1  ;;  %v196_v62 = vpop.f32.mrf.mxu2 }
  0x9a   :  { %v133_v1 = vld [vmem:[#allocation2] sm:$0x3] }
  0x9b   :  { %v134_v63 = vld [vmem:[#allocation2 + $0x8] sm:$0x30]  ;;  %v213_v4 = vadd.f32 %v196_v62, %v133_v1  ;;  %v1502_v1 = vld [vmem:[%s2527_s3 + $0x10] sm:$0xf] }
  0x9c   :  { %v217_v0 = vadd.f32 %v215_v59, %v134_v63  ;;  %v1749_v63 = vld [vmem:[%s2527_s3 + $0x14] sm:$0xf] }
  0x9d   :  { %v1490_v8 = vmul.f32 -1.442695, %v213_v4 }
  0x9e   :  { %1807 = vtanh.f32 %v217_v0  ;;  %v1491_v7 = vmul.f32 -1.442695, %v217_v0  ;;  %v1504_v0 = vld [vmem:[%s2527_s3 + $0x18] sm:$0xf0] }
  0x9f   :  { %1809 = vtanh.f32 %v213_v4  ;;  %v1747_v4 = vld [vmem:[%s2527_s3 + $0x4] sm:$0xf] }
  0xa0   :  { %v211_v2 = vpop.f32.mrf.mxu3  ;;  %1811 = vpow2.f32 %v1491_v7 }
  0xa1   :  { %v198_v3 = vpop.f32.mrf.mxu2  ;;  %1813 = vpow2.f32 %v1490_v8  ;;  %v1507_v2 = vor.u32 %v1749_v63, %v1504_v0  ;;  %v1494_v8 = vld [vmem:[%s2527_s3] sm:$0xf] }
  0xa2   :  { %v1750_v3 = vld [vmem:[%s2527_s3 + $0x14] sm:$0xf0] }
  0xa3   :  { %383 = vmatpush.bf16.msrb.mxu1 %v1507_v2 }
  0xa4   :  { %v1808_v5 = vpop.eup %1807 }
  0xa5   :  { %277 = vrot.lane.b32.xlu0 %v1808_v5, %s1904_s2  ;;  %v1810_v6 = vpop.eup %1809  ;;  %v1496_v5 = vld [vmem:[%s2527_s3 + $0x8] sm:$0xf0] }
  0xa6   :  { %v1812_v9 = vpop.eup %1811  ;;  %v1499_v7 = vor.u32 %v1747_v4, %v1496_v5 }
  0xa7   :  { %v258_v10 = vadd.f32 1.0, %v1812_v9  ;;  %v1814_v11 = vpop.eup %1813  ;;  %v1748_v9 = vld [vmem:[%s2527_s3 + $0x4] sm:$0xf0] }
  0xa8   :  { %v221_v12 = vadd.f32 1.0, %v1814_v11  ;;  %384 = vmatpush.bf16.msrb.mxu1 %v1499_v7 }
  0xa9   :  { %1815 = vrcp.f32 %v258_v10  ;;  %v270_v21 = vand.u32 2147483648, %v258_v10  ;;  %vm264_vm2 = vweird.f32 %v258_v10  ;;  %v268_v22 = vand.u32 2147483647, %v258_v10 }
  0xaa   :  { %1817 = vrcp.f32 %v221_v12  ;;  %vm227_vm5 = vweird.f32 %v221_v12  ;;  %v233_v30 = vand.u32 2147483648, %v221_v12  ;;  %v231_v31 = vand.u32 2147483647, %v221_v12 }
  0xab   :  { %v271_v25 = vor.u32 1.1754944e-38, %v270_v21  ;;  %vm269_vm4 = vcmp.eq.f32.partialorder %v268_v22, 8.507059e+37 }
  0xac   :  { %v234_v33 = vor.u32 1.1754944e-38, %v233_v30  ;;  %vm232_vm8 = vcmp.eq.f32.partialorder %v231_v31, 8.507059e+37 }
  0xad   :  { %240 = vrot.lane.b32.xlu0 %v1810_v6, %s1904_s2  ;;  %v1503_v6 = vor.u32 %v1750_v3, %v1502_v1 }
  0xaf   :  { %v1816_v13 = vpop.eup %1815  ;;  %370 = vmatpush.bf16.msrb.mxu0 %v1503_v6 }
  0xb0   :  { %v260_v14 = vmul.f32 %v1816_v13, %v258_v10  ;;  %v1818_v16 = vpop.eup %1817  ;;  %vm265_vm1 = vweird.f32 %v1816_v13  ;;  %v1495_v10 = vor.u32 %v1748_v9, %v1494_v8  ;;  %v1761_v9 = vld [vmem:[%s2527_s3 + $0x34] sm:$0xf] }
  0xb1   :  { %v223_v18 = vmul.f32 %v1818_v16, %v221_v12  ;;  %vm266_vm3 = vmor %vm264_vm2, %vm265_vm1  ;;  %vm228_vm6 = vweird.f32 %v1818_v16 }
  0xb2   :  { %v261_v15 = vsub.f32 1.0, %v260_v14  ;;  %vm229_vm7 = vmor %vm227_vm5, %vm228_vm6 }
  0xb3   :  { %v224_v20 = vsub.f32 1.0, %v223_v18  ;;  %371 = vmatpush.bf16.msrb.mxu0 %v1495_v10  ;;  %v1556_v10 = vld [vmem:[%s2527_s3 + $0x38] sm:$0xf0] }
  0xb4   :  { %v262_v17 = vmul.f32 %v1816_v13, %v261_v15 }
  0xb5   :  { %v225_v24 = vmul.f32 %v1818_v16, %v224_v20  ;;  %v305_v20 = vld [vmem:[#allocation2 + $0x8] sm:$0xc] }
  0xb6   :  { %v263_v19 = vadd.f32 %v1816_v13, %v262_v17 }
  0xb7   :  { %v226_v29 = vadd.f32 %v1818_v16, %v225_v24 }
  0xb8   :  { %v267_v23 = vsel %vm266_vm3, %v1816_v13, %v263_v19  ;;  %v304_v19 = vld [vmem:[#allocation2] sm:$0xc] }
  0xb9   :  { %v272_v27 = vsel %vm269_vm4, %v271_v25, %v267_v23  ;;  %v230_v32 = vsel %vm229_vm7, %v1818_v16, %v226_v29  ;;  %vm482_vm4 = vcmask 257026  }
  0xba   :  { %v235_v35 = vsel %vm232_vm8, %v234_v33, %v230_v32  ;;  %v275_v37 = vmul.f32 0.0, %v272_v27 }
  0xbb   :  { %v238_v40 = vmul.f32 0.0, %v235_v35 }
 0x117   :  { %v278_v26 = vpop.permute.xlu0 %277 }
 0x118   :  { %v280_v28 = vmul.f32 %v278_v26, %v272_v27 }
 0x11a   :  { %282 = vrot.lane.b32.xlu1 %v280_v28, %s1905_s23 }
 0x11f   :  { %v241_v34 = vpop.permute.xlu0 %240 }
 0x120   :  { %v243_v36 = vmul.f32 %v241_v34, %v235_v35 }
 0x122   :  { %245 = vrot.lane.b32.xlu1 %v243_v36, %s1905_s23 }
 0x18c   :  { %v283_v38 = vpop.permute.xlu1 %282 }
 0x18d   :  { %v2086_v39 = vadd.f32 %v283_v38, %v275_v37 }
 0x18f   :  { %1819 = vtanh.f32 %v2086_v39 }
 0x194   :  { %v246_v41 = vpop.permute.xlu1 %245 }
 0x195   :  { %v1820_v42 = vpop.eup %1819  ;;  %v2089_v43 = vadd.f32 %v246_v41, %v238_v40 }
 0x196   :  { %288 = vrot.lane.b32.xlu2 %v1820_v42, %s1904_s2 }
 0x197   :  { %1821 = vtanh.f32 %v2089_v43 }
 0x19d   :  { %v1822_v44 = vpop.eup %1821 }
 0x19e   :  { %251 = vrot.lane.b32.xlu2 %v1822_v44, %s1904_s2 }
 0x1f0   :  { %v289_v58 = vpop.permute.xlu2 %288 }
 0x1f1   :  { %v2118_v59 = vmul.f32 %v289_v58, %v272_v27 }
 0x1f3   :  { %v306_v60 = vrot.slane %v2118_v59, 4 }
 0x1f5   :  { %307 = vrot.lane.b32.xlu1 %v306_v60, %s1904_s2 }
 0x1f8   :  { %v252_v61 = vpop.permute.xlu2 %251 }
 0x1f9   :  { %v254_v62 = vmul.f32 %v252_v61, %v235_v35  ;;  %v419_v61 = vrot.slane %v2089_v43, 6 }
 0x1fb   :  { %293 = vrot.lane.b32.xlu0 %v254_v62, %s1905_s23  ;;  %v459_v62 = vrot.slane %v2086_v39, 2 }
 0x267   :  { %v308_v11 = vpop.permute.xlu1 %307 }
 0x26d   :  { %v294_v12 = vpop.permute.xlu0 %293 }
 0x26e   :  { %297 = vst.msk [vmem:[#allocation3] sm:$0x3] %vm296_vm9, %v294_v12  ;;  %v311_v13 = vsel %vm310_vm10, %v294_v12, %v308_v11  ;;  %v1554_v11 = vld [vmem:[%s2527_s3 + $0x30] sm:$0xf]  ;;  %v1559_v12 = vor.u32 %v1761_v9, %v1556_v10 }
 0x26f   :  { %v312_v14 = vpack.c.bf16 %v311_v13, %v311_v13  ;;  %v1762_v13 = vld [vmem:[%s2527_s3 + $0x34] sm:$0xf0] }
 0x270   :  { %566 = vmatpush.bf16.msrb.mxu3 %v1559_v12 }
 0x271   :  { %1524 = vmatmul.msk.bf16.vlgmr.msrb.gmra.mxu0 %vm101_vm0, %v312_v14  ;;  %1525 = vmatmul.msk.bf16.vlgmr.msrb.gmra.mxu1 %vm101_vm0, %v312_v14  ;;  %v1759_v14 = vld [vmem:[%s2527_s3 + $0x24] sm:$0xf] }
 0x2ee   :  { %v373_v15 = vpop.f32.mrf.mxu0  ;;  %v386_v16 = vpop.f32.mrf.mxu1 }
 0x2ef   :  { %v391_v17 = vrot.slane %v373_v15, 6  ;;  %v395_v18 = vrot.slane %v386_v16, 6  ;;  %v1548_v15 = vld [vmem:[%s2527_s3 + $0x28] sm:$0xf0]  ;;  %v1555_v16 = vor.u32 %v1762_v13, %v1554_v11 }
 0x2f1   :  { %v393_v21 = vadd.f32 %v391_v17, %v304_v19  ;;  %v397_v22 = vadd.f32 %v395_v18, %v305_v20  ;;  %v1546_v17 = vld [vmem:[%s2527_s3 + $0x20] sm:$0xf]  ;;  %v1760_v18 = vld [vmem:[%s2527_s3 + $0x24] sm:$0xf0]  ;;  %v1551_v19 = vor.u32 %v1759_v14, %v1548_v15  ;;  %553 = vmatpush.bf16.msrb.mxu2 %v1555_v16 }
 0x2f2   :  { %v1547_v20 = vor.u32 %v1760_v18, %v1546_v17 }
 0x2f3   :  { %1823 = vtanh.f32 %v393_v21  ;;  %v1526_v27 = vmul.f32 -1.442695, %v393_v21  ;;  %v1527_v31 = vmul.f32 -1.442695, %v397_v22  ;;  %v1757_v21 = vld [vmem:[%s2527_s3 + $0x14] sm:$0xf]  ;;  %567 = vmatpush.bf16.msrb.mxu3 %v1551_v19 }
 0x2f4   :  { %1825 = vtanh.f32 %v397_v22  ;;  %v1540_v22 = vld [vmem:[%s2527_s3 + $0x18] sm:$0xf0] }
 0x2f5   :  { %1827 = vpow2.f32 %v1526_v27  ;;  %554 = vmatpush.bf16.msrb.mxu2 %v1547_v20  ;;  %v1755_v27 = vld [vmem:[%s2527_s3 + $0x4] sm:$0xf] }
 0x2f6   :  { %v375_v23 = vpop.f32.mrf.mxu0  ;;  %v388_v24 = vpop.f32.mrf.mxu1 }
 0x2f7   :  { %v1538_v23 = vld [vmem:[%s2527_s3 + $0x10] sm:$0xf]  ;;  %v1758_v24 = vld [vmem:[%s2527_s3 + $0x14] sm:$0xf0] }
 0x2f9   :  { %v1824_v25 = vpop.eup %1823 }
 0x2fa   :  { %v1826_v26 = vpop.eup %1825  ;;  %423 = vrot.lane.b32.xlu2 %v1824_v25, %s1904_s2  ;;  %v1543_v25 = vor.u32 %v1757_v21, %v1540_v22 }
 0x2fb   :  { %463 = vrot.lane.b32.xlu0 %v1826_v26, %s1904_s2  ;;  %v1828_v28 = vpop.eup %1827  ;;  %v1539_v26 = vor.u32 %v1758_v24, %v1538_v23 }
 0x2fc   :  { %v401_v29 = vadd.f32 1.0, %v1828_v28  ;;  %568 = vmatpush.bf16.msrb.mxu3 %v1543_v25  ;;  %v1532_v28 = vld [vmem:[%s2527_s3 + $0x8] sm:$0xf0] }
 0x2fd   :  { %555 = vmatpush.bf16.msrb.mxu2 %v1539_v26 }
 0x2fe   :  { %1829 = vrcp.f32 %v401_v29  ;;  %v413_v38 = vand.u32 2147483648, %v401_v29  ;;  %vm407_vm12 = vweird.f32 %v401_v29  ;;  %v411_v40 = vand.u32 2147483647, %v401_v29 }
 0x2ff   :  { %1831 = vpow2.f32 %v1527_v31  ;;  %v1756_v31 = vld [vmem:[%s2527_s3 + $0x4] sm:$0xf0] }
 0x300   :  { %v414_v42 = vor.u32 1.1754944e-38, %v413_v38  ;;  %vm412_vm14 = vcmp.eq.f32.partialorder %v411_v40, 8.507059e+37  ;;  %v490_v40 = vld [vmem:[#allocation2 + $0x8] sm:$0x3] }
 0x304   :  { %v1830_v30 = vpop.eup %1829 }
 0x305   :  { %v403_v32 = vmul.f32 %v1830_v30, %v401_v29  ;;  %v1832_v35 = vpop.eup %1831  ;;  %vm408_vm11 = vweird.f32 %v1830_v30  ;;  %v1530_v29 = vld [vmem:[%s2527_s3] sm:$0xf] }
 0x306   :  { %v441_v36 = vadd.f32 1.0, %v1832_v35  ;;  %vm409_vm13 = vmor %vm407_vm12, %vm408_vm11 }
 0x307   :  { %v404_v33 = vsub.f32 1.0, %v403_v32  ;;  %v1531_v32 = vor.u32 %v1756_v31, %v1530_v29 }
 0x308   :  { %1833 = vrcp.f32 %v441_v36  ;;  %v453_v53 = vand.u32 2147483648, %v441_v36  ;;  %vm447_vm1 = vweird.f32 %v441_v36  ;;  %v451_v54 = vand.u32 2147483647, %v441_v36 }
 0x309   :  { %v405_v34 = vmul.f32 %v1830_v30, %v404_v33  ;;  %556 = vmatpush.bf16.msrb.mxu2 %v1531_v32 }
 0x30a   :  { %v454_v56 = vor.u32 1.1754944e-38, %v453_v53  ;;  %vm452_vm3 = vcmp.eq.f32.partialorder %v451_v54, 8.507059e+37 }
 0x30b   :  { %v406_v37 = vadd.f32 %v1830_v30, %v405_v34 }
 0x30d   :  { %v410_v41 = vsel %vm409_vm13, %v1830_v30, %v406_v37  ;;  %v1535_v30 = vor.u32 %v1755_v27, %v1532_v28 }
 0x30e   :  { %v415_v45 = vsel %vm412_vm14, %v414_v42, %v410_v41  ;;  %v1834_v47 = vpop.eup %1833 }
 0x30f   :  { %v443_v48 = vmul.f32 %v1834_v47, %v441_v36  ;;  %vm448_vm15 = vweird.f32 %v1834_v47  ;;  %v421_v63 = vmul.f32 %v419_v61, %v415_v45  ;;  %569 = vmatpush.bf16.msrb.mxu3 %v1535_v30 }
 0x310   :  { %vm449_vm2 = vmor %vm447_vm1, %vm448_vm15  ;;  %vm302_vm15 = vcmask 259076  }
 0x311   :  { %v444_v49 = vsub.f32 1.0, %v443_v48 }
 0x313   :  { %v445_v51 = vmul.f32 %v1834_v47, %v444_v49 }
 0x315   :  { %v446_v52 = vadd.f32 %v1834_v47, %v445_v51 }
 0x317   :  { %v450_v55 = vsel %vm449_vm2, %v1834_v47, %v446_v52 }
 0x318   :  { %v455_v58 = vsel %vm452_vm3, %v454_v56, %v450_v55 }
 0x319   :  { %v461_v0 = vmul.f32 %v459_v62, %v455_v58 }
 0x354   :  { %v424_v44 = vpop.permute.xlu2 %423 }
 0x355   :  { %v426_v46 = vmul.f32 %v424_v44, %v415_v45 }
 0x357   :  { %428 = vrot.lane.b32.xlu1 %v426_v46, %s1905_s23 }
 0x36d   :  { %v464_v57 = vpop.permute.xlu0 %463 }
 0x36e   :  { %v466_v60 = vmul.f32 %v464_v57, %v455_v58 }
 0x370   :  { %468 = vrot.lane.b32.xlu2 %v466_v60, %s1905_s23 }
 0x3c9   :  { %v429_v1 = vpop.permute.xlu1 %428 }
 0x3ca   :  { %v469_v2 = vpop.permute.xlu2 %468  ;;  %v2157_v3 = vadd.f32 %v429_v1, %v421_v63 }
 0x3cb   :  { %v2159_v4 = vadd.f32 %v469_v2, %v461_v0 }
 0x3cc   :  { %1835 = vtanh.f32 %v2157_v3  ;;  %v601_v20 = vrot.slane %v2157_v3, 6 }
 0x3cd   :  { %1837 = vtanh.f32 %v2159_v4  ;;  %v641_v25 = vrot.slane %v2159_v4, 2  ;;  %v1766_v4 = vld [vmem:[%s2530_s4 + $0x18] sm:$0xff] }
 0x3ce   :  { %721 = vmatpush.bf16.msra.mxu0 %v1766_v4 }
 0x3d2   :  { %v1836_v5 = vpop.eup %1835 }
 0x3d3   :  { %v1838_v6 = vpop.eup %1837  ;;  %434 = vrot.lane.b32.xlu0 %v1836_v5, %s1904_s2 }
 0x3d4   :  { %474 = vrot.lane.b32.xlu1 %v1838_v6, %s1904_s2 }
 0x445   :  { %v435_v43 = vpop.permute.xlu0 %434 }
 0x446   :  { %v475_v39 = vpop.permute.xlu1 %474  ;;  %v437_v7 = vmul.f32 %v435_v43, %v415_v45  ;;  %v489_v45 = vld [vmem:[#allocation2] sm:$0x30] }
 0x447   :  { %v2165_v8 = vmul.f32 %v475_v39, %v455_v58 }
 0x448   :  { %479 = vrot.lane.b32.xlu2 %v437_v7, %s1905_s23 }
 0x449   :  { %491 = vrot.lane.b32.xlu0 %v2165_v8, %s1904_s2 }
 0x4a2   :  { %v480_v33 = vpop.permute.xlu2 %479 }
 0x4a3   :  { %483 = vst.msk [vmem:[#allocation3] sm:$0xc] %vm482_vm4, %v480_v33 }
 0x4bb   :  { %v492_v34 = vpop.permute.xlu0 %491 }
 0x4bc   :  { %v494_v35 = vsel %vm310_vm10, %v480_v33, %v492_v34  ;;  %v1764_v34 = vld [vmem:[%s2530_s4 + $0x8] sm:$0xff] }
 0x4bd   :  { %v495_v36 = vpack.c.bf16 %v494_v35, %v494_v35  ;;  %v1763_v35 = vld [vmem:[%s2530_s4] sm:$0xff] }
 0x4bf   :  { %v505_v37 = vrot.slane %v495_v36, 1 }
 0x4c1   :  { %1560 = vmatmul.msk.bf16.vlgmr.msrb.gmra.mxu2 %vm101_vm0, %v505_v37  ;;  %1561 = vmatmul.msk.bf16.vlgmr.msrb.gmra.mxu3 %vm101_vm0, %v505_v37 }
 0x544   :  { %v558_v38 = vpop.f32.mrf.mxu2  ;;  %v571_v41 = vpop.f32.mrf.mxu3 }
 0x545   :  { %v576_v42 = vrot.slane %v558_v38, 4  ;;  %v579_v44 = vadd.f32 %v571_v41, %v490_v40  ;;  %v1769_v40 = vld [vmem:[%s2532_s6 + $0x14] sm:$0xf]  ;;  %v1593_v41 = vld [vmem:[%s2532_s6 + $0x18] sm:$0xf0] }
 0x547   :  { %v578_v46 = vadd.f32 %v576_v42, %v489_v45  ;;  %1839 = vtanh.f32 %v579_v44  ;;  %v1563_v55 = vmul.f32 -1.442695, %v579_v44  ;;  %v1625_v42 = vld [vmem:[%s2533_s8 + $0x30] sm:$0xf]  ;;  %v1596_v44 = vor.u32 %v1769_v40, %v1593_v41  ;;  %v1778_v45 = vld [vmem:[%s2533_s8 + $0x34] sm:$0xf0] }
 0x549   :  { %1841 = vtanh.f32 %v578_v46  ;;  %v1562_v52 = vmul.f32 -1.442695, %v578_v46  ;;  %v1777_v46 = vld [vmem:[%s2533_s8 + $0x34] sm:$0xf]  ;;  %783 = vmatpush.bf16.msra.mxu2 %v1596_v44 }
 0x54b   :  { %1843 = vpow2.f32 %v1562_v52  ;;  %v1770_v52 = vld [vmem:[%s2532_s6 + $0x14] sm:$0xf0] }
 0x54c   :  { %v560_v47 = vpop.f32.mrf.mxu2  ;;  %v573_v48 = vpop.f32.mrf.mxu3 }
 0x54d   :  { %v1840_v49 = vpop.eup %1839  ;;  %v1627_v47 = vld [vmem:[%s2533_s8 + $0x38] sm:$0xf0]  ;;  %v1626_v48 = vor.u32 %v1778_v45, %v1625_v42 }
 0x54e   :  { %645 = vrot.lane.b32.xlu1 %v1840_v49, %s1904_s2  ;;  %v1630_v49 = vor.u32 %v1777_v46, %v1627_v47 }
 0x54f   :  { %v1842_v51 = vpop.eup %1841  ;;  %846 = vmatpush.bf16.msra.mxu3 %v1626_v48 }
 0x550   :  { %605 = vrot.lane.b32.xlu2 %v1842_v51, %s1904_s2  ;;  %v1591_v51 = vld [vmem:[%s2532_s6 + $0x10] sm:$0xf] }
 0x551   :  { %v1844_v53 = vpop.eup %1843 }
 0x552   :  { %v583_v54 = vadd.f32 1.0, %v1844_v53  ;;  %v1767_v53 = vld [vmem:[%s2532_s6 + $0x4] sm:$0xf] }
 0x554   :  { %1845 = vrcp.f32 %v583_v54  ;;  %v595_v0 = vand.u32 2147483648, %v583_v54  ;;  %vm589_vm6 = vweird.f32 %v583_v54  ;;  %v593_v1 = vand.u32 2147483647, %v583_v54 }
 0x555   :  { %1847 = vpow2.f32 %v1563_v55  ;;  %v1585_v55 = vld [vmem:[%s2532_s6 + $0x8] sm:$0xf0] }
 0x556   :  { %v596_v5 = vor.u32 1.1754944e-38, %v595_v0  ;;  %vm594_vm8 = vcmp.eq.f32.partialorder %v593_v1, 8.507059e+37  ;;  %v1775_v1 = vld [vmem:[%s2533_s8 + $0x24] sm:$0xf] }
 0x55a   :  { %v1846_v56 = vpop.eup %1845 }
 0x55b   :  { %v585_v57 = vmul.f32 %v1846_v56, %v583_v54  ;;  %v1848_v60 = vpop.eup %1847  ;;  %vm590_vm5 = vweird.f32 %v1846_v56  ;;  %v1592_v54 = vor.u32 %v1770_v52, %v1591_v51 }
 0x55c   :  { %v623_v62 = vadd.f32 1.0, %v1848_v60  ;;  %vm591_vm7 = vmor %vm589_vm6, %vm590_vm5 }
 0x55d   :  { %v586_v58 = vsub.f32 1.0, %v585_v57  ;;  %v1776_v57 = vld [vmem:[%s2533_s8 + $0x24] sm:$0xf0]  ;;  %770 = vmatpush.bf16.msra.mxu1 %v1592_v54 }
 0x55e   :  { %1849 = vrcp.f32 %v623_v62  ;;  %v635_v13 = vand.u32 2147483648, %v623_v62  ;;  %vm629_vm12 = vweird.f32 %v623_v62  ;;  %v633_v14 = vand.u32 2147483647, %v623_v62 }
 0x55f   :  { %v587_v61 = vmul.f32 %v1846_v56, %v586_v58  ;;  %v1588_v58 = vor.u32 %v1767_v53, %v1585_v55 }
 0x560   :  { %v636_v16 = vor.u32 1.1754944e-38, %v635_v13  ;;  %vm634_vm14 = vcmp.eq.f32.partialorder %v633_v14, 8.507059e+37  ;;  %v1601_v14 = vld [vmem:[%s2533_s8] sm:$0xf] }
 0x561   :  { %v588_v63 = vadd.f32 %v1846_v56, %v587_v61  ;;  %784 = vmatpush.bf16.msra.mxu2 %v1588_v58 }
 0x563   :  { %v592_v2 = vsel %vm591_vm7, %v1846_v56, %v588_v63  ;;  %v1617_v56 = vld [vmem:[%s2533_s8 + $0x20] sm:$0xf] }
 0x564   :  { %v1850_v6 = vpop.eup %1849  ;;  %v597_v39 = vsel %vm594_vm8, %v596_v5, %v592_v2  ;;  %v1618_v60 = vor.u32 %v1776_v57, %v1617_v56  ;;  %v1619_v2 = vld [vmem:[%s2533_s8 + $0x28] sm:$0xf0] }
 0x565   :  { %v625_v9 = vmul.f32 %v1850_v6, %v623_v62  ;;  %vm630_vm11 = vweird.f32 %v1850_v6  ;;  %v603_v21 = vmul.f32 %v601_v20, %v597_v39  ;;  %v1622_v5 = vor.u32 %v1775_v1, %v1619_v2  ;;  %v1804_v20 = vld [vmem:[%s2531_s5] ss:$0 sm:$0xff] }
 0x566   :  { %vm631_vm13 = vmor %vm629_vm12, %vm630_vm11  ;;  %847 = vmatpush.bf16.msra.mxu3 %v1618_v60 }
 0x567   :  { %v626_v10 = vsub.f32 1.0, %v625_v9  ;;  %v1774_v9 = vld [vmem:[%s2533_s8 + $0x14] sm:$0xf0] }
 0x569   :  { %v627_v11 = vmul.f32 %v1850_v6, %v626_v10 }
 0x56b   :  { %v628_v12 = vadd.f32 %v1850_v6, %v627_v11  ;;  %v1773_v11 = vld [vmem:[%s2533_s8 + $0x14] sm:$0xf] }
 0x56d   :  { %v632_v15 = vsel %vm631_vm13, %v1850_v6, %v628_v12  ;;  %v1583_v6 = vld [vmem:[%s2532_s6] sm:$0xf]  ;;  %v1611_v12 = vld [vmem:[%s2533_s8 + $0x18] sm:$0xf0] }
 0x56e   :  { %v637_v18 = vsel %vm634_vm14, %v636_v16, %v632_v15  ;;  %v1614_v13 = vor.u32 %v1773_v11, %v1611_v12  ;;  %v1772_v15 = vld [vmem:[%s2533_s8 + $0x4] sm:$0xf0] }
 0x56f   :  { %v643_v26 = vmul.f32 %v641_v25, %v637_v18  ;;  %v1602_v16 = vor.u32 %v1772_v15, %v1601_v14 }
 0x5aa   :  { %v606_v43 = vpop.permute.xlu2 %605 }
 0x5ab   :  { %v608_v7 = vmul.f32 %v606_v43, %v597_v39  ;;  %v1768_v43 = vld [vmem:[%s2532_s6 + $0x4] sm:$0xf0] }
 0x5ad   :  { %610 = vrot.lane.b32.xlu1 %v608_v7, %s1905_s23  ;;  %v1584_v7 = vor.u32 %v1768_v43, %v1583_v6 }
 0x5af   :  { %771 = vmatpush.bf16.msra.mxu1 %v1584_v7 }
 0x5b5   :  { %299 = vrot.lane.b32.xlu1 %v2118_v59, %s1905_s23 }
 0x5c0   :  { %v646_v17 = vpop.permute.xlu1 %645 }
 0x5c1   :  { %v648_v19 = vmul.f32 %v646_v17, %v637_v18  ;;  %v1771_v17 = vld [vmem:[%s2533_s8 + $0x4] sm:$0xf] }
 0x5c3   :  { %650 = vrot.lane.b32.xlu0 %v648_v19, %s1905_s23 }
 0x61f   :  { %v611_v22 = vpop.permute.xlu1 %610 }
 0x620   :  { %v613_v59 = vadd.f32 %v611_v22, %v603_v21 }
 0x622   :  { %1851 = vtanh.f32 %v613_v59 }
 0x627   :  { %v300_v23 = vpop.permute.xlu1 %299 }
 0x628   :  { %v1852_v24 = vpop.eup %1851  ;;  %303 = vst.msk [vmem:[#allocation4] sm:$0x30] %vm302_vm15, %v300_v23 }
 0x629   :  { %616 = vrot.lane.b32.xlu0 %v1852_v24, %s1904_s2 }
 0x635   :  { %v651_v27 = vpop.permute.xlu0 %650 }
 0x636   :  { %v653_v28 = vadd.f32 %v651_v27, %v643_v26 }
 0x638   :  { %1853 = vtanh.f32 %v653_v28 }
 0x63e   :  { %v1854_v29 = vpop.eup %1853 }
 0x63f   :  { %656 = vrot.lane.b32.xlu2 %v1854_v29, %s1904_s2 }
 0x647   :  { %485 = vrot.lane.b32.xlu2 %v2165_v8, %s1905_s23  ;;  %v1765_v8 = vld [vmem:[%s2530_s4 + $0x10] sm:$0xff] }
 0x648   :  { %722 = vmatpush.bf16.msra.mxu0 %v1765_v8 }
 0x64c   :  { %723 = vmatpush.bf16.msra.mxu0 %v1764_v34 }
 0x650   :  { %724 = vmatpush.bf16.msra.mxu0 %v1763_v35 }
 0x654   :  { %859 = vmatpush.bf16.msrb.mxu0 %v1630_v49 }
 0x658   :  { %860 = vmatpush.bf16.msrb.mxu0 %v1622_v5 }
 0x65c   :  { %861 = vmatpush.bf16.msrb.mxu0 %v1614_v13 }
 0x699   :  { %v657_v3 = vpop.permute.xlu2 %656 }
 0x69a   :  { %v659_v30 = vmul.f32 %v657_v3, %v637_v18  ;;  %v1603_v18 = vld [vmem:[%s2533_s8 + $0x8] sm:$0xf0] }
 0x69b   :  { %v617_v31 = vpop.permute.xlu0 %616  ;;  %v1606_v19 = vor.u32 %v1771_v17, %v1603_v18 }
 0x69c   :  { %v619_v32 = vmul.f32 %v617_v31, %v597_v39  ;;  %666 = vrot.lane.b32.xlu0 %v659_v30, %s1905_s23  ;;  %v1609_v39 = vld [vmem:[%s2533_s8 + $0x10] sm:$0xf] }
 0x69d   :  { %v1610_v10 = vor.u32 %v1774_v9, %v1609_v39  ;;  %862 = vmatpush.bf16.msrb.mxu0 %v1606_v19  ;;  %v1785_v19 = vld [vmem:[%s2533_s8 + $0x34] sm:$0xf] }
 0x69e   :  { %661 = vrot.lane.b32.xlu1 %v619_v32, %s1905_s23 }
 0x69f   :  { %848 = vmatpush.bf16.msra.mxu3 %v1610_v10 }
 0x6a1   :  { %v486_v33 = vpop.permute.xlu2 %485 }
 0x6a2   :  { %488 = vst.msk [vmem:[#allocation4] sm:$0xc] %vm482_vm4, %v486_v33 }
 0x6a3   :  { %849 = vmatpush.bf16.msra.mxu3 %v1602_v16 }
 0x6a6   :  { %850 = vmatmul.bf16.vlgmr.msra.gmra.mxu3 %v1903_v50 }
 0x70e   :  { %v667_v36 = vpop.permute.xlu0 %666 }
 0x70f   :  { %669 = vst.msk [vmem:[#allocation4] sm:$0x3] %vm296_vm9, %v667_v36 }
 0x710   :  { %v662_v37 = vpop.permute.xlu1 %661 }
 0x711   :  { %664 = vst.msk [vmem:[#allocation3] sm:$0x30] %vm302_vm15, %v662_v37 }
 0x716   :  { %v671_v38 = vld [vmem:[#allocation4] sm:$0x3f] }
 0x717   :  { %673 = vrot.lane.b32.xlu2 %v671_v38, %s1905_s23 }
 0x718   :  { %v670_v62 = vld [vmem:[#allocation3] sm:$0x3f] }
 0x729   :  { %v851_v25 = vpop.f32.mrf.mxu3 }
 0x731   :  { %v853_v27 = vpop.f32.mrf.mxu3 }
 0x771   :  { %v674_v61 = vpop.permute.xlu2 %673 }
 0x772   :  { %v676_v63 = vsel %vm310_vm10, %v670_v62, %v674_v61 }
 0x773   :  { %v677_v0 = vpack.c.bf16 %v676_v63, %v676_v63 }
 0x775   :  { %1580 = vmatmul.msk.bf16.vlgmr.msra.gmra.mxu0 %vm101_vm0, %v677_v0 }
 0x785   :  { %863 = vmatmul.bf16.vlgmr.msrb.gmra.mxu0 %v1903_v50  ;;  %v735_v50 = vld [vmem:[%s2534_s7] sm:$0x3] }
 0x786   :  { %v737_v28 = vperm.slane %v735_v50, 0  ;;  %v738_v30 = vperm.slane %v735_v50, 1 }
 0x7f2   :  { %v726_v21 = vpop.f32.mrf.mxu0 }
 0x7f3   :  { %v727_v22 = vadd.f32 %v1804_v20, %v726_v21  ;;  %v1661_v20 = vld [vmem:[%s2533_s8 + $0x38] sm:$0xf0]  ;;  %v1659_v21 = vld [vmem:[%s2533_s8 + $0x30] sm:$0xf] }
 0x7f5   :  { %v730_v59 = vpack.c.bf16 %v727_v22, %v727_v22  ;;  %v1664_v22 = vor.u32 %v1785_v19, %v1661_v20 }
 0x7f7   :  { %1597 = vmatmul.msk.bf16.vlgmr.msra.gmra.mxu1 %vm310_vm10, %v730_v59  ;;  %1598 = vmatmul.msk.bf16.vlgmr.msra.gmra.mxu2 %vm310_vm10, %v730_v59  ;;  %v1786_v59 = vld [vmem:[%s2533_s8 + $0x34] sm:$0xf0] }
 0x7f8   :  { %1033 = vmatpush.bf16.msrb.mxu2 %v1664_v22 }
 0x7fa   :  { %v728_v23 = vpop.f32.mrf.mxu0 }
 0x7fb   :  { %v1783_v23 = vld [vmem:[%s2533_s8 + $0x24] sm:$0xf] }
 0x802   :  { %v864_v24 = vpop.f32.mrf.mxu0 }
 0x803   :  { %v870_v34 = vrot.slane %v864_v24, 4  ;;  %v1653_v24 = vld [vmem:[%s2533_s8 + $0x28] sm:$0xf0] }
 0x80a   :  { %v866_v26 = vpop.f32.mrf.mxu0 }
 0x80b   :  { %v1656_v26 = vor.u32 %v1783_v23, %v1653_v24 }
 0x80d   :  { %1034 = vmatpush.bf16.msrb.mxu2 %v1656_v26 }
 0x874   :  { %v773_v29 = vpop.f32.mrf.mxu1 }
 0x875   :  { %v774_v3 = vadd.f32 %v773_v29, %v737_v28 }
 0x877   :  { %790 = vst [vmem:[#allocation2] sm:$0x3f] %v774_v3 }
 0x87a   :  { %v786_v31 = vpop.f32.mrf.mxu2 }
 0x87b   :  { %v787_v32 = vadd.f32 %v786_v31, %v738_v30  ;;  %v1651_v30 = vld [vmem:[%s2533_s8 + $0x20] sm:$0xf]  ;;  %v1784_v31 = vld [vmem:[%s2533_s8 + $0x24] sm:$0xf0] }
 0x87c   :  { %v775_v33 = vpop.f32.mrf.mxu1 }
 0x87d   :  { %791 = vst [vmem:[#allocation2 + $0x8] sm:$0x3f] %v787_v32  ;;  %v1652_v32 = vor.u32 %v1784_v31, %v1651_v30  ;;  %v1781_v33 = vld [vmem:[%s2533_s8 + $0x14] sm:$0xf] }
 0x87e   :  { %v792_v4 = vld [vmem:[#allocation2] sm:$0x3] }
 0x87f   :  { %v868_v8 = vadd.f32 %v851_v25, %v792_v4  ;;  %v1660_v25 = vor.u32 %v1786_v59, %v1659_v21  ;;  %v1645_v4 = vld [vmem:[%s2533_s8 + $0x18] sm:$0xf0] }
 0x881   :  { %1855 = vtanh.f32 %v868_v8  ;;  %v1631_v41 = vmul.f32 -1.442695, %v868_v8  ;;  %1020 = vmatpush.bf16.msrb.mxu1 %v1660_v25  ;;  %v1643_v8 = vld [vmem:[%s2533_s8 + $0x10] sm:$0xf] }
 0x882   :  { %v788_v35 = vpop.f32.mrf.mxu2 }
 0x883   :  { %v1782_v35 = vld [vmem:[%s2533_s8 + $0x14] sm:$0xf0] }
 0x884   :  { %v793_v36 = vld [vmem:[#allocation2 + $0x8] sm:$0x30] }
 0x885   :  { %v872_v37 = vadd.f32 %v870_v34, %v793_v36  ;;  %1021 = vmatpush.bf16.msrb.mxu1 %v1652_v32  ;;  %v1648_v34 = vor.u32 %v1781_v33, %v1645_v4  ;;  %v1779_v36 = vld [vmem:[%s2533_s8 + $0x4] sm:$0xf] }
 0x887   :  { %v1856_v38 = vpop.eup %1855  ;;  %1857 = vtanh.f32 %v872_v37  ;;  %v1632_v42 = vmul.f32 -1.442695, %v872_v37  ;;  %v1637_v37 = vld [vmem:[%s2533_s8 + $0x8] sm:$0xf0]  ;;  %1035 = vmatpush.bf16.msrb.mxu2 %v1648_v34 }
 0x888   :  { %895 = vrot.lane.b32.xlu1 %v1856_v38, %s1904_s2  ;;  %1859 = vpow2.f32 %v1631_v41  ;;  %v1644_v38 = vor.u32 %v1782_v35, %v1643_v8  ;;  %v1635_v41 = vld [vmem:[%s2533_s8] sm:$0xf] }
 0x889   :  { %1861 = vpow2.f32 %v1632_v42  ;;  %v1780_v42 = vld [vmem:[%s2533_s8 + $0x4] sm:$0xf0] }
 0x88a   :  { %1022 = vmatpush.bf16.msrb.mxu1 %v1644_v38 }
 0x88d   :  { %v1858_v40 = vpop.eup %1857 }
 0x88e   :  { %932 = vrot.lane.b32.xlu0 %v1858_v40, %s1904_s2  ;;  %v1860_v44 = vpop.eup %1859  ;;  %v1640_v40 = vor.u32 %v1779_v36, %v1637_v37 }
 0x88f   :  { %v876_v45 = vadd.f32 1.0, %v1860_v44  ;;  %v1862_v46 = vpop.eup %1861  ;;  %v1636_v44 = vor.u32 %v1780_v42, %v1635_v41  ;;  %v1793_v41 = vld [vmem:[%s2533_s8 + $0x34] sm:$0xf]  ;;  %v1697_v42 = vld [vmem:[%s2533_s8 + $0x38] sm:$0xf0] }
 0x890   :  { %v913_v47 = vadd.f32 1.0, %v1862_v46  ;;  %1036 = vmatpush.bf16.msrb.mxu2 %v1640_v40 }
 0x891   :  { %1863 = vrcp.f32 %v876_v45  ;;  %v888_v57 = vand.u32 2147483648, %v876_v45  ;;  %vm882_vm2 = vweird.f32 %v876_v45  ;;  %v886_v58 = vand.u32 2147483647, %v876_v45  ;;  %1023 = vmatpush.bf16.msrb.mxu1 %v1636_v44  ;;  %v1695_v44 = vld [vmem:[%s2533_s8 + $0x30] sm:$0xf] }
 0x892   :  { %1865 = vrcp.f32 %v913_v47  ;;  %v925_v2 = vand.u32 2147483648, %v913_v47  ;;  %vm919_vm7 = vweird.f32 %v913_v47  ;;  %v923_v6 = vand.u32 2147483647, %v913_v47 }
 0x893   :  { %v889_v62 = vor.u32 1.1754944e-38, %v888_v57  ;;  %vm887_vm5 = vcmp.eq.f32.partialorder %v886_v58, 8.507059e+37 }
 0x894   :  { %v926_v39 = vor.u32 1.1754944e-38, %v925_v2  ;;  %vm924_vm11 = vcmp.eq.f32.partialorder %v923_v6, 8.507059e+37 }
 0x897   :  { %v1864_v48 = vpop.eup %1863 }
 0x898   :  { %v878_v49 = vmul.f32 %v1864_v48, %v876_v45  ;;  %v1866_v51 = vpop.eup %1865  ;;  %vm883_vm1 = vweird.f32 %v1864_v48 }
 0x899   :  { %v915_v53 = vmul.f32 %v1866_v51, %v913_v47  ;;  %vm884_vm3 = vmor %vm882_vm2, %vm883_vm1  ;;  %vm920_vm6 = vweird.f32 %v1866_v51 }
 0x89a   :  { %v879_v52 = vsub.f32 1.0, %v878_v49  ;;  %vm921_vm8 = vmor %vm919_vm7, %vm920_vm6 }
 0x89b   :  { %v916_v55 = vsub.f32 1.0, %v915_v53 }
 0x89c   :  { %v880_v54 = vmul.f32 %v1864_v48, %v879_v52  ;;  %v957_v52 = vld [vmem:[#allocation2] sm:$0xc] }
 0x89d   :  { %v917_v60 = vmul.f32 %v1866_v51, %v916_v55 }
 0x89e   :  { %v881_v56 = vadd.f32 %v1864_v48, %v880_v54 }
 0x89f   :  { %v918_v63 = vadd.f32 %v1866_v51, %v917_v60 }
 0x8a0   :  { %v885_v61 = vsel %vm884_vm3, %v1864_v48, %v881_v56  ;;  %v958_v56 = vld [vmem:[#allocation2 + $0x8] sm:$0xc] }
 0x8a1   :  { %v890_v1 = vsel %vm887_vm5, %v889_v62, %v885_v61  ;;  %v922_v43 = vsel %vm921_vm8, %v1866_v51, %v918_v63 }
 0x8a2   :  { %v927_v9 = vsel %vm924_vm11, %v926_v39, %v922_v43  ;;  %v893_v15 = vmul.f32 0.0, %v890_v1 }
 0x8a3   :  { %v930_v11 = vmul.f32 0.0, %v927_v9 }
 0x8fa   :  { %v896_v0 = vpop.permute.xlu1 %895 }
 0x8fb   :  { %v898_v5 = vmul.f32 %v896_v0, %v890_v1 }
 0x8fd   :  { %900 = vrot.lane.b32.xlu0 %v898_v5, %s1905_s23 }
 0x900   :  { %v933_v7 = vpop.permute.xlu0 %932 }
 0x901   :  { %v935_v10 = vmul.f32 %v933_v7, %v927_v9 }
 0x903   :  { %937 = vrot.lane.b32.xlu2 %v935_v10, %s1905_s23 }
 0x95d   :  { %v938_v12 = vpop.permute.xlu2 %937 }
 0x95e   :  { %v2341_v13 = vadd.f32 %v938_v12, %v930_v11 }
 0x960   :  { %1867 = vtanh.f32 %v2341_v13  ;;  %v1111_v4 = vrot.slane %v2341_v13, 2 }
 0x966   :  { %v1868_v14 = vpop.eup %1867 }
 0x967   :  { %943 = vrot.lane.b32.xlu1 %v1868_v14, %s1904_s2 }
 0x96f   :  { %v901_v16 = vpop.permute.xlu0 %900 }
 0x970   :  { %v2345_v17 = vadd.f32 %v901_v16, %v893_v15 }
 0x972   :  { %1869 = vtanh.f32 %v2345_v17  ;;  %v1071_v30 = vrot.slane %v2345_v17, 6 }
 0x978   :  { %v1870_v18 = vpop.eup %1869 }
 0x979   :  { %906 = vrot.lane.b32.xlu2 %v1870_v18, %s1904_s2 }
 0x9d3   :  { %v907_v27 = vpop.permute.xlu2 %906 }
 0x9d4   :  { %v909_v50 = vmul.f32 %v907_v27, %v890_v1 }
 0x9d6   :  { %948 = vrot.lane.b32.xlu0 %v909_v50, %s1905_s23 }
 0x9d9   :  { %v944_v28 = vpop.permute.xlu1 %943 }
 0x9da   :  { %v2368_v29 = vmul.f32 %v944_v28, %v927_v9 }
 0x9dc   :  { %v959_v3 = vrot.slane %v2368_v29, 4 }
 0x9de   :  { %960 = vrot.lane.b32.xlu1 %v959_v3, %s1904_s2 }
 0xa48   :  { %v949_v45 = vpop.permute.xlu0 %948 }
 0xa49   :  { %951 = vst.msk [vmem:[#allocation3] sm:$0x3] %vm296_vm9, %v949_v45 }
 0xa50   :  { %v961_v46 = vpop.permute.xlu1 %960 }
 0xa51   :  { %v963_v47 = vsel %vm310_vm10, %v949_v45, %v961_v46  ;;  %v1700_v45 = vor.u32 %v1793_v41, %v1697_v42  ;;  %v1794_v46 = vld [vmem:[%s2533_s8 + $0x34] sm:$0xf0] }
 0xa52   :  { %v964_v48 = vpack.c.bf16 %v963_v47, %v963_v47  ;;  %v1791_v47 = vld [vmem:[%s2533_s8 + $0x24] sm:$0xf] }
 0xa53   :  { %1217 = vmatpush.bf16.msra.mxu0 %v1700_v45 }
 0xa54   :  { %1665 = vmatmul.msk.bf16.vlgmr.msrb.gmra.mxu1 %vm101_vm0, %v964_v48  ;;  %1666 = vmatmul.msk.bf16.vlgmr.msrb.gmra.mxu2 %vm101_vm0, %v964_v48  ;;  %v1689_v48 = vld [vmem:[%s2533_s8 + $0x28] sm:$0xf0] }
 0xad1   :  { %v1025_v49 = vpop.f32.mrf.mxu1 }
 0xad2   :  { %v1043_v51 = vrot.slane %v1025_v49, 6  ;;  %v1696_v49 = vor.u32 %v1794_v46, %v1695_v44 }
 0xad4   :  { %v1045_v53 = vadd.f32 %v1043_v51, %v957_v52  ;;  %v1687_v51 = vld [vmem:[%s2533_s8 + $0x20] sm:$0xf]  ;;  %v1792_v52 = vld [vmem:[%s2533_s8 + $0x24] sm:$0xf0]  ;;  %1204 = vmatpush.bf16.msrb.mxu3 %v1696_v49 }
 0xad6   :  { %1871 = vtanh.f32 %v1045_v53  ;;  %v1667_v63 = vmul.f32 -1.442695, %v1045_v53  ;;  %v1692_v53 = vor.u32 %v1791_v47, %v1689_v48 }
 0xad7   :  { %v1038_v54 = vpop.f32.mrf.mxu2 }
 0xad8   :  { %v1047_v55 = vrot.slane %v1038_v54, 6  ;;  %v1688_v54 = vor.u32 %v1792_v52, %v1687_v51  ;;  %1218 = vmatpush.bf16.msra.mxu0 %v1692_v53 }
 0xad9   :  { %v1027_v57 = vpop.f32.mrf.mxu1 }
 0xada   :  { %v1049_v58 = vadd.f32 %v1047_v55, %v958_v56  ;;  %v1789_v55 = vld [vmem:[%s2533_s8 + $0x14] sm:$0xf]  ;;  %v1681_v56 = vld [vmem:[%s2533_s8 + $0x18] sm:$0xf0]  ;;  %v1679_v57 = vld [vmem:[%s2533_s8 + $0x10] sm:$0xf]  ;;  %1205 = vmatpush.bf16.msrb.mxu3 %v1688_v54 }
 0xadc   :  { %v1872_v60 = vpop.eup %1871  ;;  %1873 = vtanh.f32 %v1049_v58  ;;  %v1668_v6 = vmul.f32 -1.442695, %v1049_v58  ;;  %v1790_v58 = vld [vmem:[%s2533_s8 + $0x14] sm:$0xf0] }
 0xadd   :  { %1075 = vrot.lane.b32.xlu2 %v1872_v60, %s1904_s2  ;;  %1875 = vpow2.f32 %v1667_v63  ;;  %v1684_v60 = vor.u32 %v1789_v55, %v1681_v56  ;;  %v1673_v63 = vld [vmem:[%s2533_s8 + $0x8] sm:$0xf0] }
 0xadf   :  { %v1040_v61 = vpop.f32.mrf.mxu2  ;;  %1219 = vmatpush.bf16.msra.mxu0 %v1684_v60 }
 0xae0   :  { %v1680_v61 = vor.u32 %v1790_v58, %v1679_v57 }
 0xae2   :  { %v1874_v62 = vpop.eup %1873  ;;  %1206 = vmatpush.bf16.msrb.mxu3 %v1680_v61 }
 0xae3   :  { %1115 = vrot.lane.b32.xlu0 %v1874_v62, %s1904_s2  ;;  %v1876_v0 = vpop.eup %1875  ;;  %v1787_v62 = vld [vmem:[%s2533_s8 + $0x4] sm:$0xf] }
 0xae4   :  { %v1053_v1 = vadd.f32 1.0, %v1876_v0  ;;  %v1671_v0 = vld [vmem:[%s2533_s8] sm:$0xf] }
 0xae6   :  { %1877 = vrcp.f32 %v1053_v1  ;;  %v1065_v9 = vand.u32 2147483648, %v1053_v1  ;;  %vm1059_vm13 = vweird.f32 %v1053_v1  ;;  %v1063_v11 = vand.u32 2147483647, %v1053_v1 }
 0xae7   :  { %1879 = vpow2.f32 %v1668_v6 }
 0xae8   :  { %v1066_v15 = vor.u32 1.1754944e-38, %v1065_v9  ;;  %vm1064_vm1 = vcmp.eq.f32.partialorder %v1063_v11, 8.507059e+37 }
 0xaec   :  { %v1878_v2 = vpop.eup %1877 }
 0xaed   :  { %v1055_v5 = vmul.f32 %v1878_v2, %v1053_v1  ;;  %vm1060_vm12 = vweird.f32 %v1878_v2  ;;  %v1880_v10 = vpop.eup %1879 }
 0xaee   :  { %vm1061_vm14 = vmor %vm1059_vm13, %vm1060_vm12  ;;  %v1093_v14 = vadd.f32 1.0, %v1880_v10  ;;  %v1141_v10 = vld [vmem:[#allocation2 + $0x8] sm:$0x3] }
 0xaef   :  { %v1056_v43 = vsub.f32 1.0, %v1055_v5  ;;  %v1788_v5 = vld [vmem:[%s2533_s8 + $0x4] sm:$0xf0] }
 0xaf0   :  { %1881 = vrcp.f32 %v1093_v14  ;;  %v1105_v24 = vand.u32 2147483648, %v1093_v14  ;;  %vm1099_vm3 = vweird.f32 %v1093_v14  ;;  %v1103_v25 = vand.u32 2147483647, %v1093_v14 }
 0xaf1   :  { %v1057_v39 = vmul.f32 %v1878_v2, %v1056_v43  ;;  %v1672_v6 = vor.u32 %v1788_v5, %v1671_v0 }
 0xaf2   :  { %v1106_v27 = vor.u32 1.1754944e-38, %v1105_v24  ;;  %vm1104_vm6 = vcmp.eq.f32.partialorder %v1103_v25, 8.507059e+37 }
 0xaf3   :  { %v1058_v7 = vadd.f32 %v1878_v2, %v1057_v39  ;;  %1207 = vmatpush.bf16.msrb.mxu3 %v1672_v6  ;;  %v1796_v6 = vld [vmem:[%s2535_s9 + $0x8] sm:$0xff] }
 0xaf5   :  { %v1062_v12 = vsel %vm1061_vm14, %v1878_v2, %v1058_v7  ;;  %v1676_v2 = vor.u32 %v1787_v62, %v1673_v63 }
 0xaf6   :  { %v1067_v18 = vsel %vm1064_vm1, %v1066_v15, %v1062_v12  ;;  %v1882_v20 = vpop.eup %1881 }
 0xaf7   :  { %v1095_v21 = vmul.f32 %v1882_v20, %v1093_v14  ;;  %vm1100_vm2 = vweird.f32 %v1882_v20  ;;  %v1073_v31 = vmul.f32 %v1071_v30, %v1067_v18  ;;  %1220 = vmatpush.bf16.msra.mxu0 %v1676_v2 }
 0xaf8   :  { %vm1101_vm5 = vmor %vm1099_vm3, %vm1100_vm2 }
 0xaf9   :  { %v1096_v22 = vsub.f32 1.0, %v1095_v21 }
 0xafb   :  { %v1097_v59 = vmul.f32 %v1882_v20, %v1096_v22 }
 0xafd   :  { %v1098_v23 = vadd.f32 %v1882_v20, %v1097_v59 }
 0xaff   :  { %v1102_v26 = vsel %vm1101_vm5, %v1882_v20, %v1098_v23 }
 0xb00   :  { %v1107_v28 = vsel %vm1104_vm6, %v1106_v27, %v1102_v26 }
 0xb01   :  { %v1113_v8 = vmul.f32 %v1111_v4, %v1107_v28 }
 0xb37   :  { %v1076_v16 = vpop.permute.xlu2 %1075 }
 0xb38   :  { %v1078_v19 = vmul.f32 %v1076_v16, %v1067_v18  ;;  %v1140_v16 = vld [vmem:[#allocation2] sm:$0x30] }
 0xb3a   :  { %1080 = vrot.lane.b32.xlu1 %v1078_v19, %s1905_s23 }
 0xb55   :  { %v1116_v50 = vpop.permute.xlu0 %1115 }
 0xb56   :  { %v1118_v3 = vmul.f32 %v1116_v50, %v1107_v28 }
 0xb58   :  { %1120 = vrot.lane.b32.xlu2 %v1118_v3, %s1905_s23 }
 0xbac   :  { %v1081_v32 = vpop.permute.xlu1 %1080 }
 0xbad   :  { %v2411_v33 = vadd.f32 %v1081_v32, %v1073_v31 }
 0xbaf   :  { %1883 = vtanh.f32 %v2411_v33  ;;  %v1252_v53 = vrot.slane %v2411_v33, 6 }
 0xbb2   :  { %v1121_v34 = vpop.permute.xlu2 %1120 }
 0xbb3   :  { %v2415_v35 = vadd.f32 %v1121_v34, %v1113_v8 }
 0xbb5   :  { %v1884_v36 = vpop.eup %1883  ;;  %1885 = vtanh.f32 %v2415_v35 }
 0xbb6   :  { %1086 = vrot.lane.b32.xlu0 %v1884_v36, %s1904_s2 }
 0xbbb   :  { %v1886_v37 = vpop.eup %1885 }
 0xbbc   :  { %1126 = vrot.lane.b32.xlu1 %v1886_v37, %s1904_s2 }
 0xc28   :  { %v1087_v17 = vpop.permute.xlu0 %1086 }
 0xc29   :  { %v1089_v38 = vmul.f32 %v1087_v17, %v1067_v18 }
 0xc2b   :  { %1131 = vrot.lane.b32.xlu2 %v1089_v38, %s1905_s23 }
 0xc2e   :  { %v1127_v40 = vpop.permute.xlu1 %1126 }
 0xc2f   :  { %v2421_v13 = vmul.f32 %v1127_v40, %v1107_v28 }
 0xc31   :  { %1142 = vrot.lane.b32.xlu0 %v2421_v13, %s1904_s2 }
 0xc85   :  { %v1132_v1 = vpop.permute.xlu2 %1131 }
 0xc86   :  { %1134 = vst.msk [vmem:[#allocation3] sm:$0xc] %vm482_vm4, %v1132_v1 }
 0xca3   :  { %v1143_v43 = vpop.permute.xlu0 %1142 }
 0xca4   :  { %v1145_v39 = vsel %vm310_vm10, %v1132_v1, %v1143_v43  ;;  %v1795_v43 = vld [vmem:[%s2535_s9] sm:$0xff] }
 0xca5   :  { %v1146_v7 = vpack.c.bf16 %v1145_v39, %v1145_v39 }
 0xca7   :  { %v1156_v9 = vrot.slane %v1146_v7, 1 }
 0xca9   :  { %1701 = vmatmul.msk.bf16.vlgmr.msrb.gmra.mxu3 %vm101_vm0, %v1156_v9  ;;  %1702 = vmatmul.msk.bf16.vlgmr.msra.gmra.mxu0 %vm101_vm0, %v1156_v9 }
 0xd26   :  { %v1222_v11 = vpop.f32.mrf.mxu0 }
 0xd27   :  { %v1230_v12 = vadd.f32 %v1222_v11, %v1141_v10  ;;  %v1800_v10 = vld [vmem:[%s2537_s11 + $0x8] sm:$0xff]  ;;  %v1799_v11 = vld [vmem:[%s2537_s11] sm:$0xff] }
 0xd28   :  { %1411 = vmatpush.bf16.msra.mxu2 %v1800_v10 }
 0xd29   :  { %1887 = vtanh.f32 %v1230_v12  ;;  %v1704_v25 = vmul.f32 -1.442695, %v1230_v12 }
 0xd2c   :  { %v1209_v14 = vpop.f32.mrf.mxu3  ;;  %1412 = vmatpush.bf16.msra.mxu2 %v1799_v11 }
 0xd2d   :  { %v1227_v15 = vrot.slane %v1209_v14, 4 }
 0xd2e   :  { %v1224_v18 = vpop.f32.mrf.mxu0 }
 0xd2f   :  { %v1888_v19 = vpop.eup %1887  ;;  %v1229_v20 = vadd.f32 %v1227_v15, %v1140_v16  ;;  %v1805_v18 = vld [vmem:[%s2536_s10] ss:$0 sm:$0xff] }
 0xd30   :  { %1296 = vrot.lane.b32.xlu1 %v1888_v19, %s1904_s2 }
 0xd31   :  { %1889 = vtanh.f32 %v1229_v20  ;;  %v1703_v59 = vmul.f32 -1.442695, %v1229_v20 }
 0xd33   :  { %1891 = vpow2.f32 %v1703_v59  ;;  %v1806_v59 = vld [vmem:[%s2538_s12] ss:$0 sm:$0xff] }
 0xd34   :  { %v1211_v21 = vpop.f32.mrf.mxu3 }
 0xd37   :  { %v1890_v22 = vpop.eup %1889 }
 0xd38   :  { %1256 = vrot.lane.b32.xlu2 %v1890_v22, %s1904_s2 }
 0xd39   :  { %v1892_v23 = vpop.eup %1891 }
 0xd3a   :  { %v1234_v24 = vadd.f32 1.0, %v1892_v23 }
 0xd3c   :  { %1893 = vrcp.f32 %v1234_v24  ;;  %v1246_v4 = vand.u32 2147483648, %v1234_v24  ;;  %vm1240_vm8 = vweird.f32 %v1234_v24  ;;  %v1244_v8 = vand.u32 2147483647, %v1234_v24 }
 0xd3d   :  { %1895 = vpow2.f32 %v1704_v25 }
 0xd3e   :  { %v1247_v37 = vor.u32 1.1754944e-38, %v1246_v4  ;;  %vm1245_vm12 = vcmp.eq.f32.partialorder %v1244_v8, 8.507059e+37 }
 0xd42   :  { %v1894_v26 = vpop.eup %1893 }
 0xd43   :  { %v1896_v27 = vpop.eup %1895  ;;  %v1236_v50 = vmul.f32 %v1894_v26, %v1234_v24  ;;  %vm1241_vm7 = vweird.f32 %v1894_v26 }
 0xd44   :  { %v1274_v28 = vadd.f32 1.0, %v1896_v27  ;;  %vm1242_vm11 = vmor %vm1240_vm8, %vm1241_vm7 }
 0xd45   :  { %v1237_v3 = vsub.f32 1.0, %v1236_v50 }
 0xd46   :  { %1897 = vrcp.f32 %v1274_v28  ;;  %v1286_v45 = vand.u32 2147483648, %v1274_v28  ;;  %vm1280_vm14 = vweird.f32 %v1274_v28  ;;  %v1284_v46 = vand.u32 2147483647, %v1274_v28 }
 0xd47   :  { %v1238_v30 = vmul.f32 %v1894_v26, %v1237_v3 }
 0xd48   :  { %v1287_v48 = vor.u32 1.1754944e-38, %v1286_v45  ;;  %vm1285_vm2 = vcmp.eq.f32.partialorder %v1284_v46, 8.507059e+37 }
 0xd49   :  { %v1239_v31 = vadd.f32 %v1894_v26, %v1238_v30 }
 0xd4b   :  { %v1243_v34 = vsel %vm1242_vm11, %v1894_v26, %v1239_v31 }
 0xd4c   :  { %v1898_v32 = vpop.eup %1897  ;;  %v1248_v38 = vsel %vm1245_vm12, %v1247_v37, %v1243_v34 }
 0xd4d   :  { %v1276_v36 = vmul.f32 %v1898_v32, %v1274_v28  ;;  %vm1281_vm13 = vweird.f32 %v1898_v32  ;;  %v1254_v54 = vmul.f32 %v1252_v53, %v1248_v38 }
 0xd4e   :  { %vm1282_vm1 = vmor %vm1280_vm14, %vm1281_vm13 }
 0xd4f   :  { %v1277_v41 = vsub.f32 1.0, %v1276_v36 }
 0xd51   :  { %v1278_v42 = vmul.f32 %v1898_v32, %v1277_v41 }
 0xd53   :  { %v1279_v44 = vadd.f32 %v1898_v32, %v1278_v42 }
 0xd55   :  { %v1283_v47 = vsel %vm1282_vm1, %v1898_v32, %v1279_v44 }
 0xd56   :  { %v1288_v51 = vsel %vm1285_vm2, %v1287_v48, %v1283_v47 }
 0xd92   :  { %v1257_v17 = vpop.permute.xlu2 %1256 }
 0xd93   :  { %v1259_v40 = vmul.f32 %v1257_v17, %v1248_v38 }
 0xd95   :  { %1261 = vrot.lane.b32.xlu1 %v1259_v40, %s1905_s23 }
 0xd9d   :  { %953 = vrot.lane.b32.xlu1 %v2368_v29, %s1905_s23  ;;  %v1292_v29 = vrot.slane %v2415_v35, 2  ;;  %v1798_v35 = vld [vmem:[%s2535_s9 + $0x18] sm:$0xff] }
 0xd9e   :  { %1372 = vmatpush.bf16.msra.mxu1 %v1798_v35 }
 0xd9f   :  { %v1294_v60 = vmul.f32 %v1292_v29, %v1288_v51 }
 0xda2   :  { %v1297_v49 = vpop.permute.xlu1 %1296 }
 0xda3   :  { %v1299_v52 = vmul.f32 %v1297_v49, %v1288_v51 }
 0xda5   :  { %1301 = vrot.lane.b32.xlu0 %v1299_v52, %s1905_s23 }
 0xe07   :  { %v1262_v55 = vpop.permute.xlu1 %1261 }
 0xe08   :  { %v1264_v56 = vadd.f32 %v1262_v55, %v1254_v54 }
 0xe0a   :  { %1899 = vtanh.f32 %v1264_v56 }
 0xe0f   :  { %v954_v57 = vpop.permute.xlu1 %953 }
 0xe10   :  { %v1900_v58 = vpop.eup %1899  ;;  %956 = vst.msk [vmem:[#allocation4] sm:$0x30] %vm302_vm15, %v954_v57 }
 0xe11   :  { %1267 = vrot.lane.b32.xlu0 %v1900_v58, %s1904_s2 }
 0xe17   :  { %v1302_v61 = vpop.permute.xlu0 %1301 }
 0xe18   :  { %v1304_v62 = vadd.f32 %v1302_v61, %v1294_v60 }
 0xe1a   :  { %1901 = vtanh.f32 %v1304_v62 }
 0xe20   :  { %v1902_v63 = vpop.eup %1901 }
 0xe21   :  { %1307 = vrot.lane.b32.xlu2 %v1902_v63, %s1904_s2 }
 0xe29   :  { %1136 = vrot.lane.b32.xlu2 %v2421_v13, %s1905_s23  ;;  %v1797_v13 = vld [vmem:[%s2535_s9 + $0x10] sm:$0xff] }
 0xe2a   :  { %1373 = vmatpush.bf16.msra.mxu1 %v1797_v13 }
 0xe2e   :  { %1374 = vmatpush.bf16.msra.mxu1 %v1796_v6 }
 0xe32   :  { %1375 = vmatpush.bf16.msra.mxu1 %v1795_v43 }
 0xe7b   :  { %v1308_v33 = vpop.permute.xlu2 %1307 }
 0xe7c   :  { %v1310_v0 = vmul.f32 %v1308_v33, %v1288_v51 }
 0xe7e   :  { %1317 = vrot.lane.b32.xlu0 %v1310_v0, %s1905_s23 }
 0xe83   :  { %v1137_v1 = vpop.permute.xlu2 %1136  ;;  %v1268_v2 = vpop.permute.xlu0 %1267 }
 0xe84   :  { %1139 = vst.msk [vmem:[#allocation4] sm:$0xc] %vm482_vm4, %v1137_v1  ;;  %v1270_v5 = vmul.f32 %v1268_v2, %v1248_v38 }
 0xe86   :  { %1312 = vrot.lane.b32.xlu1 %v1270_v5, %s1905_s23 }
 0xef0   :  { %v1318_v39 = vpop.permute.xlu0 %1317 }
 0xef1   :  { %1320 = vst.msk [vmem:[#allocation4] sm:$0x3] %vm296_vm9, %v1318_v39  ;;  %vm1418_vm9 = vcmask 78848  }
 0xef8   :  { %v1313_v7 = vpop.permute.xlu1 %1312  ;;  %v1322_v9 = vld [vmem:[#allocation4] sm:$0x3f] }
 0xef9   :  { %1315 = vst.msk [vmem:[#allocation3] sm:$0x30] %vm302_vm15, %v1313_v7  ;;  %1324 = vrot.lane.b32.xlu2 %v1322_v9, %s1905_s23 }
 0xf00   :  { %v1321_v14 = vld [vmem:[#allocation3] sm:$0x3f] }
 0xf53   :  { %v1325_v12 = vpop.permute.xlu2 %1324 }
 0xf54   :  { %v1327_v15 = vsel %vm310_vm10, %v1321_v14, %v1325_v12 }
 0xf55   :  { %v1328_v16 = vpack.c.bf16 %v1327_v15, %v1327_v15 }
 0xf57   :  { %1721 = vmatmul.msk.bf16.vlgmr.msra.gmra.mxu1 %vm101_vm0, %v1328_v16 }
 0xfd4   :  { %v1377_v19 = vpop.f32.mrf.mxu1 }
 0xfd5   :  { %v1378_v20 = vadd.f32 %v1805_v18, %v1377_v19 }
 0xfd7   :  { %v1381_v21 = vpack.c.bf16 %v1378_v20, %v1378_v20 }
 0xfd9   :  { %1730 = vmatmul.msk.bf16.vlgmr.msra.gmra.mxu2 %vm310_vm10, %v1381_v21 }
 0xfdc   :  { %v1379_v22 = vpop.f32.mrf.mxu1 }
0x105c   :  { %v1414_v23 = vpop.f32.mrf.mxu2 }
0x105d   :  { %v1415_v24 = vadd.f32 %v1806_v59, %v1414_v23 }
0x105f   :  { %1419 = vst.msk [vmem:[%s2539_s13] sm:$0x3f] %vm1418_vm9, %v1415_v24 }
0x1064   :  { %v1416_v25 = vpop.f32.mrf.mxu2 }

</bundles_post_ra>
